<compile_context>
chip_gen: v5e
topology: v5e:2x2
jax: 0.10.0
libtpu: 0.0.40
codegen_flags: <defaults>
</compile_context>

<pallas_src>
import functools

import jax
import jax.numpy as jnp
from jax import lax
from jax.experimental import pallas as pl
from jax.experimental.pallas import tpu as pltpu


def _res_block_kernel(x_ref, w1_ref, b1_ref, w2_ref, b2_ref, o_ref, xpad_ref, *,
                      C, H, W, K, pad, neg_slope, res_scale, compute_dtype):
    """Fused residual conv block on one (1, C, H, W) batch tile.

    xpad_ref : VMEM scratch (C, H+2p, W+2p); holds the zero-padded image for
               conv1 and is then reused (same zero border) for conv2's input h.
    """
    Hp, Wp = H + 2 * pad, W + 2 * pad
    HW = H * W

    def im2col():
        # (K*K*C, H*W) patch matrix; row order (kh, kw, cin) matches the
        # wrapper-side weight reshape (Cout, KH*KW*Cin).
        slabs = [
            xpad_ref[:, kh:kh + H, kw:kw + W].reshape(C, HW)
            for kh in range(K) for kw in range(K)
        ]
        return jnp.concatenate(slabs, axis=0)

    # Zero the padded scratch every step (only the border really needs it, but
    # re-zeroing keeps the kernel correct even if the batch axis is sharded
    # across TensorCores, where per-core scratch may start uninitialized).
    xpad_ref[...] = jnp.zeros((C, Hp, Wp), jnp.float32)

    # Load the input tile once; it is both conv1's input and the residual.
    x = x_ref[0].astype(jnp.float32)                       # (C, H, W)
    xpad_ref[:, pad:pad + H, pad:pad + W] = x
    residual = x.reshape(C, HW)

    w1 = w1_ref[...].astype(compute_dtype)                 # (C, K*K*C)
    w2 = w2_ref[...].astype(compute_dtype)
    b1 = b1_ref[...].astype(jnp.float32)                   # (C, 1)
    b2 = b2_ref[...].astype(jnp.float32)

    # ---- conv1: one MXU matmul + bias + LeakyReLU(0.2) ----
    p1 = im2col().astype(compute_dtype)                    # (K*K*C, H*W)
    h = jnp.dot(w1, p1, preferred_element_type=jnp.float32) + b1
    h = jnp.where(h >= 0.0, h, neg_slope * h)

    # ---- conv2 input: overwrite interior with h (zero border is reused) ----
    xpad_ref[:, pad:pad + H, pad:pad + W] = h.reshape(C, H, W)

    # ---- conv2 (no activation) fused with the residual epilogue ----
    p2 = im2col().astype(compute_dtype)
    out = jnp.dot(w2, p2, preferred_element_type=jnp.float32) + b2
    final = res_scale * out + residual                     # (C, H*W) lane-dense
    o_ref[...] = final.astype(o_ref.dtype)[None, :, :]


def res_conv2d_layer(x_nchw, params, *, padding=1, neg_slope=0.2, res_scale=0.1,
                     compute_dtype=jnp.float32):
    """ResConv2dLayer forward. x_nchw: (N, C, H, W) like PyTorch.

    compute_dtype: set to jnp.bfloat16 on v6e/v7x for 2x MXU throughput when
    the accuracy budget allows (accumulation stays f32).
    """
    N, C, H, W = x_nchw.shape
    K = params["w1"].shape[0]
    assert 2 * padding == K - 1, "residual add requires a shape-preserving conv"
    HW = H * W
    Hp, Wp = H + 2 * padding, W + 2 * padding

    # Weights (KH, KW, Cin, Cout) -> (Cout, KH*KW*Cin), reshaped once wrapper-
    # side, so the kernel issues a single matmul per conv and never re-slices w.
    w1m = params["w1"].reshape(K * K * C, C).T
    w2m = params["w2"].reshape(K * K * C, C).T
    b1 = params["b1"].reshape(C, 1)
    b2 = params["b2"].reshape(C, 1)

    kern = functools.partial(
        _res_block_kernel, C=C, H=H, W=W, K=K, pad=padding,
        neg_slope=neg_slope, res_scale=res_scale, compute_dtype=compute_dtype)

    itemsize = jnp.dtype(x_nchw.dtype).itemsize
    cost = pl.CostEstimate(
        flops=2 * 2 * N * HW * C * (K * K * C),             # two convs
        transcendentals=0,
        bytes_accessed=(2 * N * C * HW + 2 * C * K * K * C + 2 * C) * itemsize,
    )

    out_flat = pl.pallas_call(
        kern,
        out_shape=jax.ShapeDtypeStruct((N, C, HW), x_nchw.dtype),
        grid_spec=pltpu.PrefetchScalarGridSpec(
            num_scalar_prefetch=0,
            grid=(N,),
            in_specs=[
                pl.BlockSpec((1, C, H, W), lambda n: (n, 0, 0, 0)),
                pl.BlockSpec((C, K * K * C), lambda n: (0, 0)),
                pl.BlockSpec((C, 1), lambda n: (0, 0)),
                pl.BlockSpec((C, K * K * C), lambda n: (0, 0)),
                pl.BlockSpec((C, 1), lambda n: (0, 0)),
            ],
            out_specs=pl.BlockSpec((1, C, HW), lambda n: (n, 0, 0)),
            scratch_shapes=[pltpu.VMEM((C, Hp, Wp), jnp.float32)],
        ),
        compiler_params=pltpu.CompilerParams(
            dimension_semantics=("parallel",),
            vmem_limit_bytes=32 * 1024 * 1024,   # safe on v5e/v6e/v7x
        ),
        cost_estimate=cost,
    )(x_nchw, w1m, b1, w2m, b2)

    # (N, C, H*W) -> (N, C, H, W): contiguous split of the last dim (free).
    return out_flat.reshape(N, C, H, W)


def _init_params(key, C, K):
    """Deterministic kaiming-uniform-ish init (PyTorch Conv2d default style)."""
    k1, k2, k3, k4 = jax.random.split(key, 4)
    fan_in = C * K * K
    bound = 1.0 / (fan_in ** 0.5)
    # weights stored as (KH, KW, Cin, Cout); biases as (Cout,)
    return {
        "w1": jax.random.uniform(k1, (K, K, C, C), jnp.float32, -bound, bound),
        "b1": jax.random.uniform(k2, (C,), jnp.float32, -bound, bound),
        "w2": jax.random.uniform(k3, (K, K, C, C), jnp.float32, -bound, bound),
        "b2": jax.random.uniform(k4, (C,), jnp.float32, -bound, bound),
    }


def _reference(x_nchw, params, padding, neg_slope, res_scale):
    """Pure-JAX reference (lax.conv) for correctness checking."""
    def conv(x, w, b):  # x NCHW, w (KH,KW,Cin,Cout)
        w_oihw = jnp.transpose(w, (3, 2, 0, 1))
        y = lax.conv_general_dilated(
            x, w_oihw, window_strides=(1, 1),
            padding=[(padding, padding), (padding, padding)],
            dimension_numbers=("NCHW", "OIHW", "NCHW"))
        return y + b.reshape(1, -1, 1, 1)

    h = conv(x_nchw, params["w1"], params["b1"])
    h = jnp.where(h >= 0, h, neg_slope * h)
    o = conv(h, params["w2"], params["b2"])
    return res_scale * o + x_nchw


if __name__ == "__main__":
    key = jax.random.PRNGKey(0)
    kx, kp = jax.random.split(key)

    N, C, H, W = 2, 4, 16, 16
    K, PAD = 3, 1  # kernel_size=3, padding=1 -> spatial preserved for residual

    x = jax.random.normal(kx, (N, C, H, W), jnp.float32)
    params = _init_params(kp, C, K)

    out = res_conv2d_layer(x, params, padding=PAD, neg_slope=0.2)
    out = jax.block_until_ready(out)

    ref = _reference(x, params, PAD, 0.2, 0.1)
    assert out.shape == (N, C, H, W)
    assert jnp.allclose(out, ref, rtol=1e-4, atol=1e-4), "mismatch vs JAX reference"

    print("KERNEL_OK")
</pallas_src>

<mosaic_0001>
module attributes {stable_mosaic.version = 11 : i64} {
  func.func @_res_block_kernel(%arg0: i32, %arg1: memref<1x4x16x16xf32, #tpu.memory_space<vmem>>, %arg2: memref<4x36xf32, #tpu.memory_space<vmem>>, %arg3: memref<4x1xf32, #tpu.memory_space<vmem>>, %arg4: memref<4x36xf32, #tpu.memory_space<vmem>>, %arg5: memref<4x1xf32, #tpu.memory_space<vmem>>, %arg6: memref<1x4x256xf32, #tpu.memory_space<vmem>>, %arg7: memref<4x18x18xf32, #tpu.memory_space<vmem>>) attributes {dimension_semantics = [#tpu.dimension_semantics<parallel>], iteration_bounds = array<i64: 2>, scalar_prefetch = 0 : i64, scratch_operands = 1 : i64, tpu.core_type = #tpu.core_type<tc>, window_params = [{transform_indices = @transform_0, window_bounds = array<i64: 1, 4, 16, 16>}, {pipeline_mode = #tpu.pipeline_mode<synchronous>, transform_indices = @transform_1, window_bounds = array<i64: 4, 36>}, {pipeline_mode = #tpu.pipeline_mode<synchronous>, transform_indices = @transform_2, window_bounds = array<i64: 4, 1>}, {pipeline_mode = #tpu.pipeline_mode<synchronous>, transform_indices = @transform_3, window_bounds = array<i64: 4, 36>}, {pipeline_mode = #tpu.pipeline_mode<synchronous>, transform_indices = @transform_4, window_bounds = array<i64: 4, 1>}, {transform_indices = @transform_5, window_bounds = array<i64: 1, 4, 256>}]} {
    %cst = arith.constant 0.000000e+00 : f32
    %0 = vector.broadcast %cst : f32 to vector<4x18x18xf32>
    %c0 = arith.constant 0 : index
    %c0_0 = arith.constant 0 : index
    %c0_1 = arith.constant 0 : index
    %1 = vector.load %arg7[%c0, %c0_0, %c0_1] : memref<4x18x18xf32, #tpu.memory_space<vmem>>, vector<4x18x18xf32>
    tpu.vector_store %arg7[%c0, %c0_0, %c0_1], %0 {strides = array<i32>} : memref<4x18x18xf32, #tpu.memory_space<vmem>>, vector<4x18x18xf32>,
    %c0_2 = arith.constant 0 : index
    %c0_3 = arith.constant 0 : index
    %c0_4 = arith.constant 0 : index
    %c0_5 = arith.constant 0 : index
    %2 = vector.load %arg1[%c0_2, %c0_3, %c0_4, %c0_5] : memref<1x4x16x16xf32, #tpu.memory_space<vmem>>, vector<1x4x16x16xf32>
    %3 = vector.shape_cast %2 : vector<1x4x16x16xf32> to vector<4x16x16xf32>
    %c0_6 = arith.constant 0 : index
    %c1 = arith.constant 1 : index
    %c1_7 = arith.constant 1 : index
    %4 = vector.load %arg7[%c0_6, %c1, %c1_7] : memref<4x18x18xf32, #tpu.memory_space<vmem>>, vector<4x16x16xf32>
    tpu.vector_store %arg7[%c0_6, %c1, %c1_7], %3 {strides = array<i32>} : memref<4x18x18xf32, #tpu.memory_space<vmem>>, vector<4x16x16xf32>,
    %5 = vector.shape_cast %3 : vector<4x16x16xf32> to vector<4x256xf32>
    %c0_8 = arith.constant 0 : index
    %c0_9 = arith.constant 0 : index
    %6 = vector.load %arg2[%c0_8, %c0_9] : memref<4x36xf32, #tpu.memory_space<vmem>>, vector<4x36xf32>
    %c0_10 = arith.constant 0 : index
    %c0_11 = arith.constant 0 : index
    %7 = vector.load %arg4[%c0_10, %c0_11] : memref<4x36xf32, #tpu.memory_space<vmem>>, vector<4x36xf32>
    %c0_12 = arith.constant 0 : index
    %c0_13 = arith.constant 0 : index
    %8 = vector.load %arg3[%c0_12, %c0_13] : memref<4x1xf32, #tpu.memory_space<vmem>>, vector<4x1xf32>
    %c0_14 = arith.constant 0 : index
    %c0_15 = arith.constant 0 : index
    %9 = vector.load %arg5[%c0_14, %c0_15] : memref<4x1xf32, #tpu.memory_space<vmem>>, vector<4x1xf32>
    %c0_16 = arith.constant 0 : index
    %c0_17 = arith.constant 0 : index
    %c0_18 = arith.constant 0 : index
    %10 = vector.load %arg7[%c0_16, %c0_17, %c0_18] : memref<4x18x18xf32, #tpu.memory_space<vmem>>, vector<4x16x16xf32>
    %11 = vector.shape_cast %10 : vector<4x16x16xf32> to vector<4x256xf32>
    %c0_19 = arith.constant 0 : index
    %c0_20 = arith.constant 0 : index
    %c1_21 = arith.constant 1 : index
    %12 = vector.load %arg7[%c0_19, %c0_20, %c1_21] : memref<4x18x18xf32, #tpu.memory_space<vmem>>, vector<4x16x16xf32>
    %13 = vector.shape_cast %12 : vector<4x16x16xf32> to vector<4x256xf32>
    %c0_22 = arith.constant 0 : index
    %c0_23 = arith.constant 0 : index
    %c2 = arith.constant 2 : index
    %14 = vector.load %arg7[%c0_22, %c0_23, %c2] : memref<4x18x18xf32, #tpu.memory_space<vmem>>, vector<4x16x16xf32>
    %15 = vector.shape_cast %14 : vector<4x16x16xf32> to vector<4x256xf32>
    %c0_24 = arith.constant 0 : index
    %c1_25 = arith.constant 1 : index
    %c0_26 = arith.constant 0 : index
    %16 = vector.load %arg7[%c0_24, %c1_25, %c0_26] : memref<4x18x18xf32, #tpu.memory_space<vmem>>, vector<4x16x16xf32>
    %17 = vector.shape_cast %16 : vector<4x16x16xf32> to vector<4x256xf32>
    %c0_27 = arith.constant 0 : index
    %c1_28 = arith.constant 1 : index
    %c1_29 = arith.constant 1 : index
    %18 = vector.load %arg7[%c0_27, %c1_28, %c1_29] : memref<4x18x18xf32, #tpu.memory_space<vmem>>, vector<4x16x16xf32>
    %19 = vector.shape_cast %18 : vector<4x16x16xf32> to vector<4x256xf32>
    %c0_30 = arith.constant 0 : index
    %c1_31 = arith.constant 1 : index
    %c2_32 = arith.constant 2 : index
    %20 = vector.load %arg7[%c0_30, %c1_31, %c2_32] : memref<4x18x18xf32, #tpu.memory_space<vmem>>, vector<4x16x16xf32>
    %21 = vector.shape_cast %20 : vector<4x16x16xf32> to vector<4x256xf32>
    %c0_33 = arith.constant 0 : index
    %c2_34 = arith.constant 2 : index
    %c0_35 = arith.constant 0 : index
    %22 = vector.load %arg7[%c0_33, %c2_34, %c0_35] : memref<4x18x18xf32, #tpu.memory_space<vmem>>, vector<4x16x16xf32>
    %23 = vector.shape_cast %22 : vector<4x16x16xf32> to vector<4x256xf32>
    %c0_36 = arith.constant 0 : index
    %c2_37 = arith.constant 2 : index
    %c1_38 = arith.constant 1 : index
    %24 = vector.load %arg7[%c0_36, %c2_37, %c1_38] : memref<4x18x18xf32, #tpu.memory_space<vmem>>, vector<4x16x16xf32>
    %25 = vector.shape_cast %24 : vector<4x16x16xf32> to vector<4x256xf32>
    %c0_39 = arith.constant 0 : index
    %c2_40 = arith.constant 2 : index
    %c2_41 = arith.constant 2 : index
    %26 = vector.load %arg7[%c0_39, %c2_40, %c2_41] : memref<4x18x18xf32, #tpu.memory_space<vmem>>, vector<4x16x16xf32>
    %27 = vector.shape_cast %26 : vector<4x16x16xf32> to vector<4x256xf32>
    %28 = tpu.concatenate %11, %13, %15, %17, %19, %21, %23, %25, %27 in 0 : vector<4x256xf32>, vector<4x256xf32>, vector<4x256xf32>, vector<4x256xf32>, vector<4x256xf32>, vector<4x256xf32>, vector<4x256xf32>, vector<4x256xf32>, vector<4x256xf32> -> vector<36x256xf32>
    %cst_42 = arith.constant dense<0.000000e+00> : vector<4x256xf32>
    %29 = tpu.matmul %6, %28, %cst_42 {dimension_numbers = #tpu.dot_dimension_numbers<[1], [0], [0], [1], [0, 0, 1, 1], [], []>} : vector<4x36xf32>, vector<36x256xf32>, vector<4x256xf32> -> vector<4x256xf32>
    %30 = vector.broadcast %8 : vector<4x1xf32> to vector<4x256xf32>
    %31 = arith.addf %29, %30 : vector<4x256xf32>
    %cst_43 = arith.constant 0.000000e+00 : f32
    %32 = vector.broadcast %cst_43 : f32 to vector<4x256xf32>
    %33 = arith.cmpf oge, %31, %32 : vector<4x256xf32>
    %cst_44 = arith.constant 2.000000e-01 : f32
    %34 = vector.broadcast %cst_44 : f32 to vector<4x256xf32>
    %35 = arith.mulf %34, %31 : vector<4x256xf32>
    %36 = arith.select %33, %31, %35 : vector<4x256xi1>, vector<4x256xf32>
    %37 = vector.shape_cast %36 : vector<4x256xf32> to vector<4x16x16xf32>
    %c0_45 = arith.constant 0 : index
    %c1_46 = arith.constant 1 : index
    %c1_47 = arith.constant 1 : index
    %38 = vector.load %arg7[%c0_45, %c1_46, %c1_47] : memref<4x18x18xf32, #tpu.memory_space<vmem>>, vector<4x16x16xf32>
    tpu.vector_store %arg7[%c0_45, %c1_46, %c1_47], %37 {strides = array<i32>} : memref<4x18x18xf32, #tpu.memory_space<vmem>>, vector<4x16x16xf32>,
    %c0_48 = arith.constant 0 : index
    %c0_49 = arith.constant 0 : index
    %c0_50 = arith.constant 0 : index
    %39 = vector.load %arg7[%c0_48, %c0_49, %c0_50] : memref<4x18x18xf32, #tpu.memory_space<vmem>>, vector<4x16x16xf32>
    %40 = vector.shape_cast %39 : vector<4x16x16xf32> to vector<4x256xf32>
    %c0_51 = arith.constant 0 : index
    %c0_52 = arith.constant 0 : index
    %c1_53 = arith.constant 1 : index
    %41 = vector.load %arg7[%c0_51, %c0_52, %c1_53] : memref<4x18x18xf32, #tpu.memory_space<vmem>>, vector<4x16x16xf32>
    %42 = vector.shape_cast %41 : vector<4x16x16xf32> to vector<4x256xf32>
    %c0_54 = arith.constant 0 : index
    %c0_55 = arith.constant 0 : index
    %c2_56 = arith.constant 2 : index
    %43 = vector.load %arg7[%c0_54, %c0_55, %c2_56] : memref<4x18x18xf32, #tpu.memory_space<vmem>>, vector<4x16x16xf32>
    %44 = vector.shape_cast %43 : vector<4x16x16xf32> to vector<4x256xf32>
    %c0_57 = arith.constant 0 : index
    %c1_58 = arith.constant 1 : index
    %c0_59 = arith.constant 0 : index
    %45 = vector.load %arg7[%c0_57, %c1_58, %c0_59] : memref<4x18x18xf32, #tpu.memory_space<vmem>>, vector<4x16x16xf32>
    %46 = vector.shape_cast %45 : vector<4x16x16xf32> to vector<4x256xf32>
    %c0_60 = arith.constant 0 : index
    %c1_61 = arith.constant 1 : index
    %c1_62 = arith.constant 1 : index
    %47 = vector.load %arg7[%c0_60, %c1_61, %c1_62] : memref<4x18x18xf32, #tpu.memory_space<vmem>>, vector<4x16x16xf32>
    %48 = vector.shape_cast %47 : vector<4x16x16xf32> to vector<4x256xf32>
    %c0_63 = arith.constant 0 : index
    %c1_64 = arith.constant 1 : index
    %c2_65 = arith.constant 2 : index
    %49 = vector.load %arg7[%c0_63, %c1_64, %c2_65] : memref<4x18x18xf32, #tpu.memory_space<vmem>>, vector<4x16x16xf32>
    %50 = vector.shape_cast %49 : vector<4x16x16xf32> to vector<4x256xf32>
    %c0_66 = arith.constant 0 : index
    %c2_67 = arith.constant 2 : index
    %c0_68 = arith.constant 0 : index
    %51 = vector.load %arg7[%c0_66, %c2_67, %c0_68] : memref<4x18x18xf32, #tpu.memory_space<vmem>>, vector<4x16x16xf32>
    %52 = vector.shape_cast %51 : vector<4x16x16xf32> to vector<4x256xf32>
    %c0_69 = arith.constant 0 : index
    %c2_70 = arith.constant 2 : index
    %c1_71 = arith.constant 1 : index
    %53 = vector.load %arg7[%c0_69, %c2_70, %c1_71] : memref<4x18x18xf32, #tpu.memory_space<vmem>>, vector<4x16x16xf32>
    %54 = vector.shape_cast %53 : vector<4x16x16xf32> to vector<4x256xf32>
    %c0_72 = arith.constant 0 : index
    %c2_73 = arith.constant 2 : index
    %c2_74 = arith.constant 2 : index
    %55 = vector.load %arg7[%c0_72, %c2_73, %c2_74] : memref<4x18x18xf32, #tpu.memory_space<vmem>>, vector<4x16x16xf32>
    %56 = vector.shape_cast %55 : vector<4x16x16xf32> to vector<4x256xf32>
    %57 = tpu.concatenate %40, %42, %44, %46, %48, %50, %52, %54, %56 in 0 : vector<4x256xf32>, vector<4x256xf32>, vector<4x256xf32>, vector<4x256xf32>, vector<4x256xf32>, vector<4x256xf32>, vector<4x256xf32>, vector<4x256xf32>, vector<4x256xf32> -> vector<36x256xf32>
    %cst_75 = arith.constant dense<0.000000e+00> : vector<4x256xf32>
    %58 = tpu.matmul %7, %57, %cst_75 {dimension_numbers = #tpu.dot_dimension_numbers<[1], [0], [0], [1], [0, 0, 1, 1], [], []>} : vector<4x36xf32>, vector<36x256xf32>, vector<4x256xf32> -> vector<4x256xf32>
    %59 = vector.broadcast %9 : vector<4x1xf32> to vector<4x256xf32>
    %60 = arith.addf %58, %59 : vector<4x256xf32>
    %cst_76 = arith.constant 1.000000e-01 : f32
    %61 = vector.broadcast %cst_76 : f32 to vector<4x256xf32>
    %62 = arith.mulf %61, %60 : vector<4x256xf32>
    %63 = arith.addf %62, %5 : vector<4x256xf32>
    %64 = vector.shape_cast %63 : vector<4x256xf32> to vector<1x4x256xf32>
    %c0_77 = arith.constant 0 : index
    %c0_78 = arith.constant 0 : index
    %c0_79 = arith.constant 0 : index
    %65 = vector.load %arg6[%c0_77, %c0_78, %c0_79] : memref<1x4x256xf32, #tpu.memory_space<vmem>>, vector<1x4x256xf32>
    tpu.vector_store %arg6[%c0_77, %c0_78, %c0_79], %64 {strides = array<i32>} : memref<1x4x256xf32, #tpu.memory_space<vmem>>, vector<1x4x256xf32>,
    return
  }
  func.func @transform_0(%arg0: i32) -> (i32, i32, i32, i32) {
    %c0_i32 = arith.constant 0 : i32
    %c0_i32_0 = arith.constant 0 : i32
    %c0_i32_1 = arith.constant 0 : i32
    %c0_i32_2 = arith.constant 0 : i32
    return %arg0, %c0_i32, %c0_i32_0, %c0_i32_1 : i32, i32, i32, i32
  }
  func.func @transform_1(%arg0: i32) -> (i32, i32) {
    %c0_i32 = arith.constant 0 : i32
    %c0_i32_0 = arith.constant 0 : i32
    %c0_i32_1 = arith.constant 0 : i32
    return %c0_i32, %c0_i32_0 : i32, i32
  }
  func.func @transform_2(%arg0: i32) -> (i32, i32) {
    %c0_i32 = arith.constant 0 : i32
    %c0_i32_0 = arith.constant 0 : i32
    %c0_i32_1 = arith.constant 0 : i32
    return %c0_i32, %c0_i32_0 : i32, i32
  }
  func.func @transform_3(%arg0: i32) -> (i32, i32) {
    %c0_i32 = arith.constant 0 : i32
    %c0_i32_0 = arith.constant 0 : i32
    %c0_i32_1 = arith.constant 0 : i32
    return %c0_i32, %c0_i32_0 : i32, i32
  }
  func.func @transform_4(%arg0: i32) -> (i32, i32) {
    %c0_i32 = arith.constant 0 : i32
    %c0_i32_0 = arith.constant 0 : i32
    %c0_i32_1 = arith.constant 0 : i32
    return %c0_i32, %c0_i32_0 : i32, i32
  }
  func.func @transform_5(%arg0: i32) -> (i32, i32, i32) {
    %c0_i32 = arith.constant 0 : i32
    %c0_i32_0 = arith.constant 0 : i32
    %c0_i32_1 = arith.constant 0 : i32
    return %arg0, %c0_i32, %c0_i32_0 : i32, i32, i32
  }
}

</mosaic_0001>

<bundles_post_ra>
// kernel: tpu_custom_call.1
= control target key start
LH: loop header
LB: loop body
LE: loop exit
PB: predicated region body
PF: predicated region fallthrough
CT: control target
= control target key end

     0   :  { %10 = vsyncpa [#allocation4], 0  ;;  %s9126_s0 = inlined_call_operand.hbm [shape: f32[2,4,16,16], index: 0, kind: input, shape index: {}]   ;;  %s9127_s1 = inlined_call_operand.vmem [shape: f32[4,36], index: 1, kind: input, shape index: {}]   ;;  %s9128_s2 = inlined_call_operand.vmem [shape: f32[4,1], index: 2, kind: input, shape index: {}]   ;;  %s9129_s3 = inlined_call_operand.vmem [shape: f32[4,36], index: 3, kind: input, shape index: {}]   ;;  %s9130_s4 = inlined_call_operand.vmem [shape: f32[4,1], index: 4, kind: input, shape index: {}]   ;;  %s9131_s5 = inlined_call_operand.hbm [shape: f32[2,4,256], index: 5, kind: output, shape index: {}]  }
   0x1   :  { %12 = vsyncpa [#allocation4 + $0x1], 0 }
   0x2   :  { %13 = vsyncpa [#allocation5], 0 }
   0x3   :  { %15 = vsyncpa [#allocation5 + $0x1], 0  ;;  %s5628_s18 = smov 0   ;;  %s5630_s19 = smov 0  }
   0x4   :  { %s5632_s20 = smov 0   ;;  %s5634_s21 = smov 0  }
   0x5 LB: > { %s5649_s22 = sadd.s32 4294967295, %s5580_s21   ;;  %s4635_s23 = sadd.s32 4294967294, %s5580_s21   ;;  %s5580_s21 = sphi %s5634_s21, %s9444_s21   ;;  %s5576_s20 = sphi %s5632_s20, %s9443_s20   ;;  %s5572_s19 = sphi %s5630_s19, %s9442_s19   ;;  %s5568_s18 = sphi %s5628_s18, %s9441_s18  }
   0x6   : > { %s5653_s24 = sadd.s32 1, %s5580_s21   ;;  %s28_s25 = sadd.s32 1, %s5576_s20 }
   0x7   : > { %s25_s26 = ssub.s32 %s5580_s21, %s5653_s24  ;;  %p35_p0 = scmp.ne.s32.totalorder %s5576_s20, %s5572_s19 }
   0x8   : > { %p26_p1 = scmp.eq.s32.totalorder %s25_s26, 0  ;;  %p36_p2 = scmp.eq.s32.totalorder %s5580_s21, 0 }
   0x9   : > { %p41_p3 = scmp.ne.s32.totalorder %s5572_s19, %s5568_s18  ;;  %p42_p4 = scmp.eq.s32.totalorder %s5649_s22, 0 }
   0xa   : > { %s5665_s27 = scalar_select %p26_p1, %s5576_s20, %s28_s25  }
   0xb   : > { %p5667_p5 = por %p36_p2, %p35_p0  ;;  %p5671_p6 = por %p42_p4, %p41_p3 }
   0xc   : > { %p149_p7 = scmp.eq.s32.totalorder %s5649_s22, 1  ;;  %p155_p8 = scmp.eq.s32.totalorder %s4635_s23, 1 }
   0xd   : > { %p4671_p10 = scmp.lt.s32.totalorder %s5580_s21, 2  ;;  %s187_s7 = sand.u32 1, %s5576_s20  }
   0xe   : > { %p5678_p11 = por %p149_p7, %p35_p0  ;;  %p5682_p12 = por %p155_p8, %p41_p3 }
   0xf   : > { %s4657_s8 = sshll.u32 %s5580_s21, 6  ;;  %s4638_s9 = sshll.u32 %s187_s7, 6 }
  0x10   : > { %s196_s12 = scalar_lea.hbm %s9126_s0, %s4657_s8  ;;  %s191_s14 = scalar_lea.vmem [#allocation3], %s4638_s9 }
  0x11   : > { %s197_s13 = sshll.u32 %s196_s12, 4  ;;  %s199_s15 = sshll.u32 %s191_s14, 4  ;;  %s198_s13 = int_to_ptr.hbm [resolvable:$true] %s197_s13  ;;  %s200_s15 = int_to_ptr.vmem [resolvable:$true] %s199_s15 }
  0x12   : > { %p5693_p13 = pnand %p4671_p10, %p5667_p5  ;;  %p4641_p0 = scmp.ge.s32.totalorder %s5580_s21, 1 }
  0x13   : > { %p207_p1 = scmp.lt.s32.totalorder %s5580_s21, 3  ;;  %s188_s17 = scalar_lea.sflag [#allocation4], %s187_s7 }
  0x14   : > { %s5484_s23 = sshra.s32 %s198_s13, 4  ;;  %p5488_p3 = pneg %p5693_p13  ;;  %s5485_s23 = int_to_ptr.hbm [resolvable:$true] %s5484_s23 }
  0x15   : > { %s5486_s25 = scalar_lea.hbm %s5485_s23, 64  ;;  %s5491_s28 = scalar_lea.hbm %s9126_s0, 128 }
  0x16   : > { %p5487_p2 = scmp.ne.s32.totalorder %s5485_s23, %s5486_s25  ;;  %p5492_p5 = scmp.lt.s32.totalorder %s5485_s23, %s9126_s0 }
  0x17   : > { %p5493_p8 = scmp.lt.s32.totalorder %s5491_s28, %s5486_s25 }
  0x18   : > { %p5489_p4 = pnand %p5488_p3, %p5487_p2 }
  0x19   : > { %p5494_p10 = por %p5493_p8, %p5492_p5 }
  0x1a   : > { %p5490_p7 = pneg %p5489_p4 }
  0x1c   : > { %p5495_p9 = pnand %p5494_p10, %p5490_p7 }
  0x1e   : > { %5498 = shalt.err (!%p5495_p9)
}
  0x1f   : > { %s5582_s7 = smov 128   ;;  %s5583_s11 = smov 8  }
  0x20   : > { %4666 = dma.hbm_to_vmem [thread:$0]  (!%p5693_p13), %s198_s13, 1024, %s200_s15, %s188_s17, %s5582_s7, %s5582_s7, %s5583_s11  }
  0x21   : > { %p208_p2 = pnand %p4641_p0, %p207_p1 }
  0x23   : > { %211 = sbr.rel (%p208_p2) target bundleno = 1753 (0x6d9), region = 40 }
  0x28   : > { %s5714_s12 = sand.u32 1, %s5572_s19  }
  0x29   : > { %s4642_s14 = sshll.u32 %s5714_s12, 6  ;;  %s214_s23 = scalar_lea.sflag [#allocation4], %s5714_s12 }
  0x2a   : > { %s5718_s25 = scalar_lea.vmem [#allocation3], %s4642_s14 }
  0x2b   : > { %5559 = dma.done.wait (%p5671_p6), %s214_s23, 1024  }
  0x2c   : > { %5561 = vsyncadd (%p5671_p6), %s214_s23, 4294966272  ;;  %v5584_v0 = vmov 1983009808   ;;  %v263_v2 = vld [vmem:[%s5718_s25 + $0x20] sm:$0xff]  ;;  %v261_v3 = vld [vmem:[%s5718_s25 + $0x10] sm:$0xff]  ;;  %vm309_vm0 = vcmask 1047556  }
  0x2d   : > { %v314_v1 = vunpack.c.l.s4 %v5584_v0  ;;  %v259_v4 = vld [vmem:[%s5718_s25] sm:$0xff]  ;;  %s5585_s13 = smov 1   ;;  %v308_v6 = vrot.slane %v263_v2, 4  ;;  %vm245_vm1 = vcmask 146432   ;;  %v5586_v8 = vmov 0.0   ;;  %v265_v10 = vld [vmem:[%s5718_s25 + $0x30] sm:$0xff] }
  0x2e   : > { %283 = vrot.lane.b32.xlu2 %v263_v2, %s5585_s13  ;;  %279 = vrot.lane.b32.xlu1 %v261_v3, %s5585_s13  ;;  %253 = vst.msk [vmem:[#allocation2 + $0x30] sm:$0xff] %vm245_vm1, %v5586_v8  ;;  %v264_v11 = vld [vmem:[%s5718_s25 + $0x28] sm:$0xff]  ;;  %v262_v12 = vld [vmem:[%s5718_s25 + $0x18] sm:$0xff]  ;;  %v321_v13 = vrot.slane %v265_v10, 4  ;;  %v5587_v14 = vmov 1934713408  }
  0x2f   : > { %v5727_v5 = vunpack.c.0.s8 %v314_v1  ;;  %275 = vrot.lane.b32.xlu0 %v259_v4, %s5585_s13  ;;  %v310_v7 = vsel %vm309_vm0, %v308_v6, %v259_v4  ;;  %254 = vst.msk [vmem:[#allocation2 + $0x38] sm:$0xff] %vm245_vm1, %v5586_v8  ;;  %v338_v15 = vunpack.c.l.s4 %v5587_v14  ;;  %v260_v17 = vld [vmem:[%s5718_s25 + $0x8] sm:$0xff]  ;;  %v311_v21 = vrot.slane %v259_v4, 4  ;;  %v266_v23 = vld [vmem:[%s5718_s25 + $0x38] sm:$0xff]  ;;  %s5588_s29 = smov 48   ;;  %s5589_s15 = smov 32  }
  0x30   : > { %246 = vst.msk [vmem:[#allocation2] sm:$0xff] %vm245_vm1, %v5586_v8  ;;  %v322_v18 = vsel %vm309_vm0, %v321_v13, %v261_v3  ;;  %v323_v25 = vrot.slane %v261_v3, 4  ;;  %s5590_s16 = smov 96   ;;  %v365_v35 = vrot.slane %v264_v11, 4  ;;  %v379_v37 = vrot.slane %v262_v12, 4  ;;  %s5591_s17 = smov 80  }
  0x31   : > { %9212 = vst [vmem:[#allocation9_spill] sm:$0xff] %v5727_v5  ;;  %v316_v9 = vperm.slane %v310_v7, %v5727_v5  ;;  %v328_v19 = vperm.slane %v322_v18, %v5727_v5  ;;  %v5757_v20 = vunpack.c.0.s8 %v338_v15  ;;  %v312_v26 = vsel %vm309_vm0, %v263_v2, %v311_v21  ;;  %s5592_s26 = smov 16   ;;  %s5593_s8 = smov 64  }
  0x32   : > { %247 = vst.msk [vmem:[#allocation2 + $0x8] sm:$0xff] %vm245_vm1, %v5586_v8  ;;  %v320_v27 = vperm.slane %v312_v26, %v5727_v5  ;;  %v324_v29 = vsel %vm309_vm0, %v265_v10, %v323_v25  ;;  %v366_v36 = vsel %vm309_vm0, %v365_v35, %v260_v17  ;;  %v377_v38 = vrot.slane %v266_v23, 4  ;;  %s5594_s28 = smov 112   ;;  %s5595_s9 = smov 127  }
  0x33   : > { %v335_v16 = vrot.slane %v316_v9, 4  ;;  %250 = vst.msk [vmem:[#allocation2 + $0x18] sm:$0xff] %vm245_vm1, %v5586_v8  ;;  %v332_v30 = vperm.slane %v324_v29, %v5727_v5  ;;  %v372_v40 = vperm.slane %v366_v36, %v5727_v5  ;;  %v367_v41 = vrot.slane %v260_v17, 4  ;;  %s5596_s10 = smov 126   ;;  %s4549_s7 = scalar_lea.sflag [#allocation5], %s5714_s12 }
  0x34   : > { %251 = vst.msk [vmem:[#allocation2 + $0x20] sm:$0xff] %vm245_vm1, %v5586_v8  ;;  %v347_v32 = vrot.slane %v320_v27, 4  ;;  %v380_v42 = vsel %vm309_vm0, %v266_v23, %v379_v37  ;;  %v378_v43 = vsel %vm309_vm0, %v377_v38, %v262_v12  ;;  %v333_v45 = vrot.slane %v328_v19, 4 }
  0x35   : > { %256 = vst.msk [vmem:[#allocation2 + $0x48] sm:$0xff] %vm245_vm1, %v5586_v8  ;;  %v336_v22 = vsel %vm309_vm0, %v328_v19, %v335_v16  ;;  %v345_v39 = vrot.slane %v332_v30, 4  ;;  %v391_v46 = vrot.slane %v372_v40, 4  ;;  %v388_v48 = vperm.slane %v380_v42, %v5727_v5 }
  0x36   : > { %285 = vrot.lane.b32.xlu2 %v264_v11, %s5585_s13  ;;  %281 = vrot.lane.b32.xlu1 %v262_v12, %s5585_s13  ;;  %9213 = vst [vmem:[#allocation10_spill] sm:$0xff] %v5757_v20  ;;  %v344_v24 = vperm.slane %v336_v22, %v5757_v20  ;;  %v348_v33 = vsel %vm309_vm0, %v332_v30, %v347_v32  ;;  %vm248_vm2 = vcmask 140288   ;;  %vm299_vm3 = vcmask 138248  }
  0x37   : > { %277 = vrot.lane.b32.xlu0 %v260_v17, %s5585_s13  ;;  %257 = vst.msk [vmem:[#allocation2 + $0x50] sm:$0xff] %vm245_vm1, %v5586_v8  ;;  %v356_v34 = vperm.slane %v348_v33, %v5757_v20  ;;  %v346_v44 = vsel %vm309_vm0, %v345_v39, %v320_v27  ;;  %v334_v49 = vsel %vm309_vm0, %v333_v45, %v316_v9  ;;  %v401_v58 = vrot.slane %v388_v48, 4 }
  0x38   : > { %v359_v28 = vrot.slane %v344_v24, 4  ;;  %v352_v47 = vperm.slane %v346_v44, %v5757_v20  ;;  %v368_v50 = vsel %vm309_vm0, %v264_v11, %v367_v41  ;;  %v384_v52 = vperm.slane %v378_v43, %v5727_v5  ;;  %255 = vst.msk [vmem:[#allocation2 + $0x40] sm:$0x3] %vm248_vm2, %v5586_v8 }
  0x39   : > { %v5787_v53 = vperm.slane %v334_v49, %v5757_v20  ;;  %v376_v57 = vperm.slane %v368_v50, %v5727_v5  ;;  %249 = vst.msk [vmem:[#allocation2 + $0x10] sm:$0x3] %vm248_vm2, %v5586_v8  ;;  %v363_v7 = vrot.slane %v356_v34, 4  ;;  %vm477_vm4 = vcmask 130048  }
  0x3a   : > { %v360_v31 = vsel %vm309_vm0, 0.0, %v359_v28  ;;  %v361_v51 = vrot.slane %v352_v47, 4  ;;  %v392_v55 = vsel %vm309_vm0, %v384_v52, %v391_v46  ;;  %v389_v60 = vrot.slane %v384_v52, 4  ;;  %252 = vst.msk [vmem:[#allocation2 + $0x28] sm:$0x3] %vm248_vm2, %v5586_v8 }
  0x3b   : > { %9214 = vst [vmem:[#allocation11_spill] sm:$0xff] %v5787_v53  ;;  %v357_v56 = vrot.slane %v5787_v53, 4  ;;  %v400_v59 = vperm.slane %v392_v55, %v5757_v20  ;;  %v402_v0 = vsel %vm309_vm0, %v401_v58, %v376_v57  ;;  %v403_v9 = vrot.slane %v376_v57, 4 }
  0x3c   : > { %v362_v54 = vsel %vm309_vm0, 0.0, %v361_v51  ;;  %v390_v62 = vsel %vm309_vm0, %v389_v60, %v372_v40  ;;  %258 = vst.msk [vmem:[#allocation2 + $0x58] sm:$0x3] %vm248_vm2, %v5586_v8  ;;  %v408_v2 = vperm.slane %v402_v0, %v5757_v20  ;;  %v364_v8 = vsel %vm309_vm0, 0.0, %v363_v7 }
  0x3d   : > { %v358_v61 = vsel %vm309_vm0, 0.0, %v357_v56  ;;  %v5804_v63 = vperm.slane %v390_v62, %v5757_v20  ;;  %v415_v14 = vrot.slane %v400_v59, 4  ;;  %vm479_vm5 = vcmask 261120  }
  0x3e   : > { %289 = vrot.lane.b32.xlu1 %v266_v23, %s5585_s13  ;;  %422 = vrot.lane.b32.xlu2 %v358_v61, %s5592_s26  ;;  %v417_v4 = vrot.slane %v408_v2, 4  ;;  %vm481_vm6 = vcmask 392192   ;;  %vm483_vm7 = vcmask 523264   ;;  %vm485_vm8 = vcmask 654336  }
  0x3f   : > { %287 = vrot.lane.b32.xlu0 %v265_v10, %s5585_s13  ;;  %9215 = vst [vmem:[#allocation12_spill] sm:$0xff] %v5804_v63  ;;  %v413_v1 = vrot.slane %v5804_v63, 4  ;;  %v404_v10 = vsel %vm309_vm0, %v388_v48, %v403_v9  ;;  %v416_v15 = vsel %vm309_vm0, 0.0, %v415_v14  ;;  %vm487_vm9 = vcmask 785408  }
  0x40   : > { %v418_v6 = vsel %vm309_vm0, 0.0, %v417_v4  ;;  %v412_v11 = vperm.slane %v404_v10, %v5757_v20  ;;  %vm489_vm10 = vcmask 916480   ;;  %vm2356_vm11 = vcmask 1043456  }
  0x41   : > { %v414_v3 = vsel %vm309_vm0, 0.0, %v413_v1  ;;  %vm2370_vm12 = vcmask 293888  }
  0x42   : > { %v419_v12 = vrot.slane %v412_v11, 4 }
  0x44   : > { %v420_v13 = vsel %vm309_vm0, 0.0, %v419_v12 }
  0x46   : > { %430 = vrot.lane.b32.xlu1 %v360_v31, %s5588_s29  ;;  %434 = vrot.lane.b32.xlu2 %v352_v47, %s5593_s8 }
  0x47   : > { %426 = vrot.lane.b32.xlu0 %v344_v24, %s5589_s15 }
  0x4e   : > { %442 = vrot.lane.b32.xlu1 %v356_v34, %s5590_s16  ;;  %446 = vrot.lane.b32.xlu2 %v364_v8, %s5594_s28 }
  0x4f   : > { %438 = vrot.lane.b32.xlu0 %v362_v54, %s5591_s17 }
  0x56   : > { %454 = vrot.lane.b32.xlu1 %v400_v59, %s5589_s15  ;;  %458 = vrot.lane.b32.xlu2 %v416_v15, %s5588_s29 }
  0x57   : > { %450 = vrot.lane.b32.xlu0 %v414_v3, %s5592_s26 }
  0x5e   : > { %466 = vrot.lane.b32.xlu1 %v418_v6, %s5591_s17  ;;  %470 = vrot.lane.b32.xlu2 %v412_v11, %s5590_s16 }
  0x5f   : > { %462 = vrot.lane.b32.xlu0 %v408_v2, %s5593_s8 }
  0x67   : > { %474 = vrot.lane.b32.xlu0 %v420_v13, %s5594_s28 }
  0x88   : > { %v284_v16 = vpop.permute.xlu2 %283 }
  0x89   : > { %304 = vst.msk [vmem:[#allocation2 + $0x31] sm:$0xff] %vm299_vm3, %v284_v16 }
  0x90   : > { %v286_v17 = vpop.permute.xlu2 %285  ;;  %v506_v18 = vld [vmem:[#allocation2 + $0x30] sm:$0xff] }
  0x91   : > { %305 = vst.msk [vmem:[#allocation2 + $0x39] sm:$0xff] %vm299_vm3, %v286_v17  ;;  %v1116_v37 = vld [vmem:[#allocation2 + $0x31] sm:$0xff]  ;;  %v510_v38 = vrot.slane %v506_v18, 4 }
  0x92   : > { %v1120_v39 = vrot.slane %v1116_v37, 4 }
  0x98   : > { %v5826_v19 = vld [vmem:[#allocation2 + $0x38] sm:$0xff] }
  0x99   : > { %v4731_v21 = vpack.i.bf16 %v5826_v19, %v506_v18  ;;  %v1117_v42 = vld [vmem:[#allocation2 + $0x39] sm:$0xff]  ;;  %v566_v0 = vrot.slane %v5826_v19, 4 }
  0x9a   : > { %v5849_v46 = vpack.i.bf16 %v1117_v42, %v1116_v37  ;;  %v5853_v51 = vld [vmem:[#allocation2 + $0x32] sm:$0xff]  ;;  %v1176_v54 = vrot.slane %v1117_v42, 4  ;;  %v5870_v61 = vld [vmem:[#allocation2 + $0x3a] sm:$0xff] }
  0x9b   : > { %4732 = vrot.lane.b32.xlu1 %v4731_v21, %s5595_s9  ;;  %v1730_v1 = vrot.slane %v5853_v51, 4  ;;  %v1786_v2 = vrot.slane %v5870_v61, 4 }
  0xa0   : > { %v280_v22 = vpop.permute.xlu1 %279 }
  0xa1   : > { %302 = vst.msk [vmem:[#allocation2 + $0x19] sm:$0xff] %vm299_vm3, %v280_v22  ;;  %v276_v23 = vpop.permute.xlu0 %275 }
  0xa2   : > { %300 = vst.msk [vmem:[#allocation2 + $0x1] sm:$0xff] %vm299_vm3, %v276_v23 }
  0xa8   : > { %v282_v24 = vpop.permute.xlu1 %281  ;;  %v5834_v27 = vld [vmem:[#allocation2 + $0x18] sm:$0xff] }
  0xa9   : > { %303 = vst.msk [vmem:[#allocation2 + $0x21] sm:$0xff] %vm299_vm3, %v282_v24  ;;  %v278_v25 = vpop.permute.xlu0 %277  ;;  %v502_v31 = vld [vmem:[#allocation2] sm:$0xff]  ;;  %v524_v52 = vrot.slane %v5834_v27, 4 }
  0xaa   : > { %301 = vst.msk [vmem:[#allocation2 + $0x9] sm:$0xff] %vm299_vm3, %v278_v25  ;;  %v1112_v40 = vld [vmem:[#allocation2 + $0x1] sm:$0xff]  ;;  %v512_v41 = vrot.slane %v502_v31, 4  ;;  %v511_v45 = vsel %vm309_vm0, %v510_v38, %v502_v31  ;;  %v5863_v57 = vld [vmem:[#allocation2 + $0x19] sm:$0xff] }
  0xab   : > { %v1122_v44 = vrot.slane %v1112_v40, 4  ;;  %v1121_v47 = vsel %vm309_vm0, %v1120_v39, %v1112_v40  ;;  %v5859_v55 = vperm.slane %v511_v45, %v5727_v5  ;;  %v1134_v9 = vrot.slane %v5863_v57, 4 }
  0xac   : > { %v513_v49 = vsel %vm309_vm0, %v506_v18, %v512_v41  ;;  %v5868_v60 = vperm.slane %v1121_v47, %v5727_v5 }
  0xad   : > { %v1123_v59 = vsel %vm309_vm0, %v1116_v37, %v1122_v44  ;;  %v521_v62 = vperm.slane %v513_v49, %v5727_v5  ;;  %v536_v10 = vrot.slane %v5859_v55, 4 }
  0xae   : > { %v5883_v12 = vperm.slane %v1123_v59, %v5727_v5  ;;  %v1146_v15 = vrot.slane %v5868_v60, 4 }
  0xb0   : > { %v290_v26 = vpop.permute.xlu1 %289  ;;  %v5836_v28 = vld [vmem:[#allocation2 + $0x20] sm:$0xff] }
  0xb1   : > { %307 = vst.msk [vmem:[#allocation2 + $0x51] sm:$0xff] %vm299_vm3, %v290_v26  ;;  %v288_v29 = vpop.permute.xlu0 %287  ;;  %v4726_v30 = vpack.i.bf16 %v5836_v28, %v5834_v27  ;;  %v503_v32 = vld [vmem:[#allocation2 + $0x8] sm:$0xff]  ;;  %v580_v58 = vrot.slane %v5836_v28, 4  ;;  %v548_v26 = vrot.slane %v521_v62, 4 }
  0xb2   : > { %306 = vst.msk [vmem:[#allocation2 + $0x49] sm:$0xff] %vm299_vm3, %v288_v29  ;;  %v4741_v33 = vpack.i.bf16 %v503_v32, %v502_v31  ;;  %v1113_v43 = vld [vmem:[#allocation2 + $0x9] sm:$0xff]  ;;  %v568_v50 = vrot.slane %v503_v32, 4  ;;  %v1115_v8 = vld [vmem:[#allocation2 + $0x21] sm:$0xff]  ;;  %v567_v13 = vsel %vm309_vm0, %v566_v0, %v503_v32  ;;  %v1158_v31 = vrot.slane %v5883_v12, 4 }
  0xb3   : > { %4727 = vrot.lane.b32.xlu0 %v4726_v30, %s5595_s9  ;;  %v4761_v48 = vpack.i.bf16 %v1113_v43, %v1112_v40  ;;  %v1178_v56 = vrot.slane %v1113_v43, 4  ;;  %v5888_v16 = vld [vmem:[#allocation2 + $0x2] sm:$0xff]  ;;  %v1177_v23 = vsel %vm309_vm0, %v1176_v54, %v1113_v43  ;;  %v4766_v25 = vpack.i.bf16 %v1115_v8, %v5863_v57 }
  0xb4   : > { %4742 = vrot.lane.b32.xlu1 %v4741_v33, %s5596_s10  ;;  %4722 = vrot.lane.b32.xlu2 %v4741_v33, %s5595_s9  ;;  %v569_v6 = vsel %vm309_vm0, %v5826_v19, %v568_v50  ;;  %v1732_v32 = vrot.slane %v5888_v16, 4  ;;  %v1190_v33 = vrot.slane %v1115_v8, 4  ;;  %v1731_v45 = vsel %vm309_vm0, %v1730_v1, %v5888_v16 }
  0xb5   : > { %v1179_v14 = vsel %vm309_vm0, %v1117_v42, %v1178_v56 }
  0xb8   : > { %v1119_v18 = vld [vmem:[#allocation2 + $0x51] sm:$0xff] }
  0xb9   : > { %v508_v34 = vld [vmem:[#allocation2 + $0x48] sm:$0xff]  ;;  %v509_v35 = vld [vmem:[#allocation2 + $0x50] sm:$0xff]  ;;  %v1188_v40 = vrot.slane %v1119_v18, 4  ;;  %v1191_v43 = vsel %vm309_vm0, %v1119_v18, %v1190_v33 }
  0xba   : > { %v4756_v36 = vpack.i.bf16 %v509_v35, %v508_v34  ;;  %v522_v3 = vrot.slane %v508_v34, 4  ;;  %v525_v4 = vsel %vm309_vm0, %v508_v34, %v524_v52  ;;  %v581_v7 = vsel %vm309_vm0, %v509_v35, %v580_v58  ;;  %v1118_v17 = vld [vmem:[#allocation2 + $0x49] sm:$0xff] }
  0xbb   : > { %4752 = vrot.lane.b32.xlu0 %v4731_v21, %s5596_s10  ;;  %v578_v11 = vrot.slane %v509_v35, 4  ;;  %v533_v19 = vperm.slane %v525_v4, %v5727_v5  ;;  %v577_v21 = vperm.slane %v569_v6, %v5727_v5  ;;  %v589_v22 = vperm.slane %v581_v7, %v5727_v5  ;;  %v5953_v7 = vld [vmem:[#allocation2 + $0x1a] sm:$0xff] }
  0xbc   : > { %4757 = vrot.lane.b32.xlu1 %v4756_v36, %s5596_s10  ;;  %4737 = vrot.lane.b32.xlu2 %v4756_v36, %s5595_s9  ;;  %v4776_v24 = vpack.i.bf16 %v1119_v18, %v1118_v17  ;;  %v523_v29 = vsel %vm309_vm0, %v522_v3, %v5834_v27  ;;  %v5905_v34 = vperm.slane %v567_v13, %v5727_v5  ;;  %v5913_v36 = vld [vmem:[#allocation2 + $0xa] sm:$0xff]  ;;  %v1132_v41 = vrot.slane %v1118_v17, 4 }
  0xbd   : > { %v5908_v35 = vperm.slane %v1179_v14, %v5727_v5  ;;  %v5911_v27 = vperm.slane %v1177_v23, %v5727_v5  ;;  %v546_v37 = vrot.slane %v533_v19, 4  ;;  %v602_v38 = vrot.slane %v589_v22, 4  ;;  %v5973_v14 = vld [vmem:[#allocation2 + $0x4a] sm:$0xff] }
  0xbe   : > { %v5916_v39 = vperm.slane %v523_v29, %v5727_v5  ;;  %v1135_v44 = vsel %vm309_vm0, %v1118_v17, %v1134_v9  ;;  %v1787_v47 = vsel %vm309_vm0, %v1786_v2, %v5913_v36  ;;  %v549_v49 = vsel %vm309_vm0, %v533_v19, %v548_v26  ;;  %v5955_v9 = vld [vmem:[#allocation2 + $0x22] sm:$0xff]  ;;  %v5975_v17 = vld [vmem:[#allocation2 + $0x52] sm:$0xff] }
  0xbf   : > { %v592_v52 = vrot.slane %v5905_v34, 4  ;;  %v547_v54 = vsel %vm309_vm0, %v546_v37, %v521_v62  ;;  %v603_v56 = vsel %vm309_vm0, %v602_v38, %v577_v21  ;;  %v1199_v59 = vperm.slane %v1191_v43, %v5727_v5 }
  0xc0   : > { %v537_v58 = vsel %vm309_vm0, %v5916_v39, %v536_v10  ;;  %v1143_v1 = vperm.slane %v1135_v44, %v5727_v5  ;;  %v1133_v2 = vsel %vm309_vm0, %v1132_v41, %v5863_v57  ;;  %v1189_v3 = vsel %vm309_vm0, %v1188_v40, %v1115_v8 }
  0xc1   : > { %v5947_v62 = vperm.slane %v549_v49, %v5757_v20  ;;  %v1202_v6 = vrot.slane %v5911_v27, 4  ;;  %v5958_v10 = vperm.slane %v1731_v45, %v5727_v5  ;;  %v5964_v57 = vperm.slane %v547_v54, %v5757_v20 }
  0xc2   : > { %v5967_v8 = vperm.slane %v603_v56, %v5757_v20  ;;  %v1214_v13 = vrot.slane %v5908_v35, 4  ;;  %v1212_v19 = vrot.slane %v1199_v59, 4  ;;  %v5987_v23 = vperm.slane %v1787_v47, %v5727_v5 }
  0xc3   : > { %4772 = vrot.lane.b32.xlu0 %v5849_v46, %s5595_s9  ;;  %v534_v29 = vrot.slane %v5916_v39, 4  ;;  %v1159_v44 = vsel %vm309_vm0, %v1143_v1, %v1158_v31  ;;  %v1788_v47 = vrot.slane %v5913_v36, 4  ;;  %v6036_v31 = vpop.permute.xlu2 %422 }
  0xc4   : > { %4762 = vrot.lane.b32.xlu1 %v4761_v48, %s5595_s9  ;;  %4747 = vrot.lane.b32.xlu2 %v4726_v30, %s5596_s10  ;;  %v579_v30 = vsel %vm309_vm0, %v578_v11, %v5836_v28  ;;  %v604_v28 = vrot.slane %v577_v21, 4  ;;  %v5970_v11 = vperm.slane %v537_v58, %v5757_v20  ;;  %v5984_v21 = vperm.slane %v1189_v3, %v5727_v5 }
  0xc5   : > { %v5919_v42 = vperm.slane %v579_v30, %v5727_v5  ;;  %v1742_v30 = vrot.slane %v5973_v14, 4  ;;  %v4806_v33 = vpack.i.bf16 %v5967_v8, %v5964_v57  ;;  %v1213_v39 = vsel %vm309_vm0, %v1212_v19, %v5908_v35  ;;  %9216 = vst [vmem:[#allocation13_spill] sm:$0xff] %v6036_v31 }
  0xc6   : > { %v605_v50 = vsel %vm309_vm0, %v589_v22, %v604_v28  ;;  %v1156_v22 = vrot.slane %v1143_v1, 4  ;;  %v1215_v45 = vsel %vm309_vm0, %v1199_v59, %v1214_v13 }
  0xc7   : > { %v593_v0 = vsel %vm309_vm0, %v5919_v42, %v592_v52  ;;  %v5950_v4 = vperm.slane %v605_v50, %v5757_v20  ;;  %v590_v28 = vrot.slane %v5919_v42, 4  ;;  %v1203_v42 = vsel %vm309_vm0, %v5984_v21, %v1202_v6 }
  0xc8   : > { %v5978_v18 = vperm.slane %v593_v0, %v5757_v20  ;;  %v1157_v43 = vsel %vm309_vm0, %v1156_v22, %v5883_v12  ;;  %v1743_v35 = vsel %vm309_vm0, %v1742_v30, %v5953_v7  ;;  %v6034_v12 = vperm.slane %v1213_v39, %v5757_v20 }
  0xc9   : > { %v4811_v26 = vpack.i.bf16 %v5950_v4, %v5947_v62  ;;  %v535_v52 = vsel %vm309_vm0, %v534_v29, %v5859_v55  ;;  %v591_v54 = vsel %vm309_vm0, %v590_v28, %v5905_v34  ;;  %v6043_v56 = vperm.slane %v1157_v43, %v5757_v20 }
  0xca   : > { %v4801_v40 = vpack.i.bf16 %v5978_v18, %v5970_v11  ;;  %v6049_v59 = vperm.slane %v1203_v42, %v5757_v20  ;;  %v6052_v0 = vperm.slane %v1159_v44, %v5757_v20  ;;  %v6055_v1 = vperm.slane %v1215_v45, %v5757_v20 }
  0xcb   : > { %4782 = vrot.lane.b32.xlu0 %v4761_v48, %s5596_s10  ;;  %v5929_v48 = vsel %vm309_vm0, %v5853_v51, %v1732_v32  ;;  %v1798_v32 = vrot.slane %v5975_v17, 4  ;;  %v6058_v55 = vperm.slane %v1743_v35, %v5727_v5  ;;  %v6068_v13 = vperm.slane %v535_v52, %v5757_v20  ;;  %v6113_v44 = vpop.permute.xlu2 %434 }
  0xcc   : > { %4777 = vrot.lane.b32.xlu1 %v4776_v24, %s5595_s9  ;;  %4767 = vrot.lane.b32.xlu2 %v4766_v25, %s5595_s9  ;;  %v6071_v19 = vperm.slane %v591_v54, %v5757_v20  ;;  %v1756_v22 = vrot.slane %v5958_v10, 4  ;;  %9219 = vst [vmem:[#allocation16_spill] sm:$0xff] %v6113_v44  ;;  %v560_v54 = vrot.slane %v5970_v11, 4 }
  0xcd   : > { %9217 = vst [vmem:[#allocation14_spill] sm:$0xff] %v6068_v13 }
  0xce   : > { %9218 = vst [vmem:[#allocation15_spill] sm:$0xff] %v6071_v19 }
  0xd3   : > { %4797 = vrot.lane.b32.xlu0 %v4776_v24, %s5596_s10  ;;  %v1744_v24 = vrot.slane %v5953_v7, 4 }
  0xd4   : > { %4787 = vrot.lane.b32.xlu1 %v4766_v25, %s5596_s10  ;;  %4792 = vrot.lane.b32.xlu2 %v5849_v46, %s5596_s10  ;;  %v5981_v46 = vperm.slane %v1133_v2, %v5727_v5  ;;  %v1800_v25 = vrot.slane %v5955_v9, 4  ;;  %v1789_v2 = vsel %vm309_vm0, %v5870_v61, %v1788_v47  ;;  %v1200_v47 = vrot.slane %v5984_v21, 4 }
  0xd5   : > { %v1745_v37 = vsel %vm309_vm0, %v5973_v14, %v1744_v24  ;;  %v1812_v24 = vrot.slane %v5987_v23, 4  ;;  %v6082_v29 = vperm.slane %v1789_v2, %v5727_v5  ;;  %v616_v2 = vrot.slane %v5978_v18, 4 }
  0xd6   : > { %v1801_v38 = vsel %vm309_vm0, %v5975_v17, %v1800_v25  ;;  %v1147_v41 = vsel %vm309_vm0, %v5981_v46, %v1146_v15  ;;  %v1799_v15 = vsel %vm309_vm0, %v1798_v32, %v5955_v9  ;;  %v6026_v49 = vperm.slane %v1745_v37, %v5727_v5 }
  0xd7   : > { %v6029_v50 = vperm.slane %v1801_v38, %v5727_v5  ;;  %v6046_v58 = vperm.slane %v1147_v41, %v5757_v20  ;;  %v6061_v34 = vperm.slane %v1799_v15, %v5727_v5  ;;  %v4821_v25 = vpack.i.bf16 %v6034_v12, %v6043_v56 }
  0xd8   : > { %v1766_v3 = vrot.slane %v6026_v49, 4  ;;  %v4826_v32 = vpack.i.bf16 %v6055_v1, %v6052_v0  ;;  %v558_v38 = vrot.slane %v6068_v13, 4  ;;  %v1144_v45 = vrot.slane %v5981_v46, 4 }
  0xd9   : > { %v1822_v6 = vrot.slane %v6029_v50, 4  ;;  %v4816_v30 = vpack.i.bf16 %v6049_v59, %v6046_v58  ;;  %v1813_v28 = vsel %vm309_vm0, %v6061_v34, %v1812_v24  ;;  %v618_v46 = vrot.slane %v5967_v8, 4 }
  0xda   : > { %v6105_v41 = vperm.slane %v1813_v28, %v5757_v20  ;;  %v559_v35 = vsel %vm309_vm0, 0.0, %v558_v38  ;;  %v564_v21 = vrot.slane %v5947_v62, 4  ;;  %v620_v24 = vrot.slane %v5950_v4, 4 }
  0xdb   : > { %4812 = vrot.lane.b32.xlu0 %v4811_v26, %s5590_s16  ;;  %v6079_v26 = vperm.slane %v5929_v48, %v5727_v5  ;;  %v1823_v37 = vsel %vm309_vm0, %v1822_v6, %v6082_v29  ;;  %v1201_v11 = vsel %vm309_vm0, %v1200_v47, %v5911_v27  ;;  %v617_v8 = vsel %vm309_vm0, 0.0, %v616_v2 }
  0xdc   : > { %4807 = vrot.lane.b32.xlu1 %v4806_v33, %s5593_s8  ;;  %4802 = vrot.lane.b32.xlu2 %v4801_v40, %s5589_s15  ;;  %v1757_v33 = vsel %vm309_vm0, %v6058_v55, %v1756_v22  ;;  %v614_v40 = vrot.slane %v6071_v19, 4  ;;  %v6111_v43 = vperm.slane %v1823_v37, %v5757_v20  ;;  %v562_v22 = vrot.slane %v5964_v57, 4 }
  0xdd   : > { %v1767_v48 = vsel %vm309_vm0, %v1766_v3, %v6079_v26  ;;  %v6102_v39 = vperm.slane %v1757_v33, %v5757_v20  ;;  %v561_v57 = vsel %vm309_vm0, 0.0, %v560_v54  ;;  %v1754_v18 = vrot.slane %v6058_v55, 4  ;;  %v6152_v55 = vpop.permute.xlu1 %430 }
  0xde   : > { %v6108_v42 = vperm.slane %v1767_v48, %v5757_v20  ;;  %v615_v15 = vsel %vm309_vm0, 0.0, %v614_v40  ;;  %v1810_v62 = vrot.slane %v6061_v34, 4  ;;  %v563_v27 = vsel %vm309_vm0, 0.0, %v562_v22  ;;  %v6150_v48 = vpop.permute.xlu2 %446  ;;  %9222 = vst [vmem:[#allocation19_spill] sm:$0xff] %v6152_v55 }
  0xdf   : > { %v4831_v52 = vpack.i.bf16 %v6105_v41, %v6102_v39  ;;  %v4841_v6 = vpack.i.bf16 %v615_v15, %v559_v35  ;;  %v621_v33 = vsel %vm309_vm0, 0.0, %v620_v24  ;;  %v4846_v28 = vpack.i.bf16 %v617_v8, %v561_v57  ;;  %9221 = vst [vmem:[#allocation18_spill] sm:$0xff] %v6150_v48 }
  0xe0   : > { %v4836_v3 = vpack.i.bf16 %v6111_v43, %v6108_v42  ;;  %v1170_v34 = vrot.slane %v6046_v58, 4  ;;  %v1226_v37 = vrot.slane %v6049_v59, 4  ;;  %v1172_v38 = vrot.slane %v6043_v56, 4  ;;  %v6167_v56 = vpop.permute.xlu0 %426 }
  0xe1   : > { %v1228_v40 = vrot.slane %v6034_v12, 4  ;;  %v1811_v58 = vsel %vm309_vm0, %v1810_v62, %v5987_v23  ;;  %9223 = vst [vmem:[#allocation20_spill] sm:$0xff] %v6167_v56  ;;  %v1768_v22 = vrot.slane %v6079_v26, 4  ;;  %v1230_v62 = vrot.slane %v6055_v1, 4 }
  0xe2   : > { %v1171_v12 = vsel %vm309_vm0, 0.0, %v1170_v34  ;;  %v1227_v59 = vsel %vm309_vm0, 0.0, %v1226_v37  ;;  %v1173_v54 = vsel %vm309_vm0, 0.0, %v1172_v38  ;;  %v1780_v26 = vrot.slane %v6102_v39, 4 }
  0xe3   : > { %4822 = vrot.lane.b32.xlu0 %v4821_v25, %s5593_s8  ;;  %v1145_v25 = vsel %vm309_vm0, %v1144_v45, %v5868_v60  ;;  %v6144_v60 = vperm.slane %v1201_v11, %v5757_v20  ;;  %v1229_v2 = vsel %vm309_vm0, 0.0, %v1228_v40  ;;  %v1231_v39 = vsel %vm309_vm0, 0.0, %v1230_v62 }
  0xe4   : > { %4817 = vrot.lane.b32.xlu1 %v4816_v30, %s5589_s15  ;;  %4827 = vrot.lane.b32.xlu2 %v4826_v32, %s5590_s16  ;;  %v6141_v4 = vperm.slane %v1145_v25, %v5757_v20  ;;  %v619_v30 = vsel %vm309_vm0, 0.0, %v618_v46  ;;  %v565_v32 = vsel %vm309_vm0, 0.0, %v564_v21  ;;  %v1824_v46 = vrot.slane %v6082_v29, 4 }
  0xe5   : > { %9220 = vst [vmem:[#allocation17_spill] sm:$0xff] %v6144_v60  ;;  %v4851_v45 = vpack.i.bf16 %v619_v30, %v563_v27  ;;  %v4856_v47 = vpack.i.bf16 %v621_v33, %v565_v32  ;;  %v1224_v15 = vrot.slane %v6144_v60, 4  ;;  %v4866_v21 = vpack.i.bf16 %v1227_v59, %v1171_v12  ;;  %v6189_v27 = vpop.permute.xlu1 %442 }
  0xe6   : > { %v1168_v35 = vrot.slane %v6141_v4, 4  ;;  %v4871_v25 = vpack.i.bf16 %v1229_v2, %v1173_v54  ;;  %v6183_v11 = vpop.permute.xlu2 %458  ;;  %9227 = vst [vmem:[#allocation24_spill] sm:$0xff] %v6189_v27  ;;  %v1836_v29 = vrot.slane %v6105_v41, 4  ;;  %v1769_v30 = vsel %vm309_vm0, %v6026_v49, %v1768_v22 }
  0xe7   : > { %9226 = vst [vmem:[#allocation23_spill] sm:$0xff] %v6183_v11  ;;  %v1781_v41 = vsel %vm309_vm0, 0.0, %v1780_v26  ;;  %v1777_v37 = vperm.slane %v1769_v30, %v5757_v20  ;;  %v4921_v62 = vpack.i.bf16 %v5975_v17, %v5973_v14 }
  0xe8   : > { %v1837_v34 = vsel %vm309_vm0, 0.0, %v1836_v29 }
  0xe9   : > { %v4886_v40 = vpack.i.bf16 %v1837_v34, %v1781_v41 }
  0xeb   : > { %4832 = vrot.lane.b32.xlu0 %v4831_v52, %s5589_s15  ;;  %v1755_v52 = vsel %vm309_vm0, %v1754_v18, %v5958_v10  ;;  %v1225_v10 = vsel %vm309_vm0, 0.0, %v1224_v15  ;;  %v1174_v18 = vrot.slane %v6052_v0, 4  ;;  %v1825_v0 = vsel %vm309_vm0, %v6029_v50, %v1824_v46 }
  0xec   : > { %4837 = vrot.lane.b32.xlu2 %v4836_v3, %s5593_s8  ;;  %4842 = vrot.lane.b32.xlu1 %v4841_v6, %s5592_s26  ;;  %v1169_v3 = vsel %vm309_vm0, 0.0, %v1168_v35  ;;  %v6176_v23 = vperm.slane %v1755_v52, %v5757_v20  ;;  %v6179_v6 = vperm.slane %v1811_v58, %v5757_v20  ;;  %v1833_v49 = vperm.slane %v1825_v0, %v5757_v20 }
  0xed   : > { %v4861_v24 = vpack.i.bf16 %v1225_v10, %v1169_v3  ;;  %v1175_v33 = vsel %vm309_vm0, 0.0, %v1174_v18  ;;  %v1784_v35 = vrot.slane %v1777_v37, 4  ;;  %v6217_v58 = vpop.permute.xlu1 %454 }
  0xee   : > { %9224 = vst [vmem:[#allocation21_spill] sm:$0xff] %v6176_v23  ;;  %v1778_v57 = vrot.slane %v6176_v23, 4  ;;  %v1834_v8 = vrot.slane %v6179_v6, 4  ;;  %v4876_v38 = vpack.i.bf16 %v1231_v39, %v1175_v33  ;;  %v1840_v15 = vrot.slane %v1833_v49, 4  ;;  %v6215_v52 = vpop.permute.xlu2 %470 }
  0xef   : > { %9225 = vst [vmem:[#allocation22_spill] sm:$0xff] %v6179_v6  ;;  %v4896_v10 = vpack.i.bf16 %v1833_v49, %v1777_v37 }
  0xf0   : > { %v1779_v1 = vsel %vm309_vm0, 0.0, %v1778_v57  ;;  %v1835_v32 = vsel %vm309_vm0, 0.0, %v1834_v8  ;;  %9229 = vst [vmem:[#allocation26_spill] sm:$0xff] %v6215_v52 }
  0xf1   : > { %v4881_v50 = vpack.i.bf16 %v1835_v32, %v1779_v1  ;;  %9230 = vst [vmem:[#allocation27_spill] sm:$0xff] %v6217_v58 }
  0xf3   : > { %4847 = vrot.lane.b32.xlu0 %v4846_v28, %s5588_s29  ;;  %v6204_v28 = vpop.permute.xlu0 %438 }
  0xf4   : > { %4852 = vrot.lane.b32.xlu2 %v4851_v45, %s5591_s17  ;;  %4857 = vrot.lane.b32.xlu1 %v4856_v47, %s5594_s28  ;;  %9228 = vst [vmem:[#allocation25_spill] sm:$0xff] %v6204_v28  ;;  %v1782_v45 = vrot.slane %v6108_v42, 4  ;;  %v1838_v47 = vrot.slane %v6111_v43, 4  ;;  %v1785_v42 = vsel %vm309_vm0, 0.0, %v1784_v35  ;;  %v1841_v43 = vsel %vm309_vm0, 0.0, %v1840_v15 }
  0xf5   : > { %v4911_v3 = vpack.i.bf16 %v1841_v43, %v1785_v42  ;;  %v6228_v46 = vpop.permute.xlu1 %466 }
  0xf6   : > { %v1783_v12 = vsel %vm309_vm0, 0.0, %v1782_v45  ;;  %v1839_v59 = vsel %vm309_vm0, 0.0, %v1838_v47  ;;  %9232 = vst [vmem:[#allocation29_spill] sm:$0xff] %v6228_v46 }
  0xf7   : > { %v4891_v2 = vpack.i.bf16 %v1839_v59, %v1783_v12 }
  0xfb   : > { %4862 = vrot.lane.b32.xlu0 %v4861_v24, %s5592_s26  ;;  %v6223_v54 = vpop.permute.xlu0 %450  ;;  %v4916_v24 = vpack.i.bf16 %v5870_v61, %v5853_v51 }
  0xfc   : > { %4867 = vrot.lane.b32.xlu2 %v4866_v21, %s5588_s29  ;;  %4872 = vrot.lane.b32.xlu1 %v4871_v25, %s5591_s17  ;;  %9231 = vst [vmem:[#allocation28_spill] sm:$0xff] %v6223_v54  ;;  %v4901_v21 = vpack.i.bf16 %v5913_v36, %v5888_v16  ;;  %v4906_v25 = vpack.i.bf16 %v5955_v9, %v5953_v7 }
 0x103   : > { %4877 = vrot.lane.b32.xlu0 %v4876_v38, %s5594_s28  ;;  %v6236_v57 = vpop.permute.xlu0 %462 }
 0x104   : > { %4882 = vrot.lane.b32.xlu2 %v4881_v50, %s5592_s26  ;;  %4887 = vrot.lane.b32.xlu1 %v4886_v40, %s5588_s29  ;;  %9233 = vst [vmem:[#allocation30_spill] sm:$0xff] %v6236_v57 }
 0x10b   : > { %4892 = vrot.lane.b32.xlu0 %v4891_v2, %s5591_s17  ;;  %v6246_v9 = vpop.permute.xlu0 %474 }
 0x10c   : > { %4912 = vrot.lane.b32.xlu2 %v4911_v3, %s5594_s28  ;;  %4897 = vrot.lane.b32.xlu1 %v4896_v10, %s5590_s16  ;;  %9234 = vst [vmem:[#allocation31_spill] sm:$0xff] %v6246_v9 }
 0x10d   : > { %v4733_v18 = vpop.permute.xlu1 %4732 }
 0x10e   : > { %v4723_v22 = vpop.permute.xlu2 %4722  ;;  %v4735_v36 = vunpack.i.h.bf16 %v4733_v18  ;;  %v4734_v51 = vunpack.i.l.bf16 %v4733_v18 }
 0x10f   : > { %v4724_v61 = vunpack.i.l.bf16 %v4723_v22  ;;  %v4725_v7 = vunpack.i.h.bf16 %v4723_v22 }
 0x110   : > { %v780_v29 = vrot.slane %v4735_v36, 4  ;;  %v724_v30 = vrot.slane %v4734_v51, 4 }
 0x111   : > { %v726_v0 = vrot.slane %v4724_v61, 4  ;;  %v782_v1 = vrot.slane %v4725_v7, 4 }
 0x112   : > { %v781_v14 = vsel %vm309_vm0, %v780_v29, %v4725_v7  ;;  %v725_v17 = vsel %vm309_vm0, %v724_v30, %v4724_v61 }
 0x113   : > { %4902 = vrot.lane.b32.xlu0 %v4901_v21, %s5595_s9  ;;  %v727_v39 = vsel %vm309_vm0, %v4734_v51, %v726_v0  ;;  %v783_v41 = vsel %vm309_vm0, %v4735_v36, %v782_v1  ;;  %v6257_v40 = vperm.slane %v781_v14, %v5727_v5  ;;  %v6260_v45 = vperm.slane %v725_v17, %v5727_v5 }
 0x114   : > { %4917 = vrot.lane.b32.xlu2 %v4916_v24, %s5595_s9  ;;  %4907 = vrot.lane.b32.xlu1 %v4906_v25, %s5595_s9  ;;  %v6263_v47 = vperm.slane %v727_v39, %v5727_v5  ;;  %v6270_v43 = vperm.slane %v783_v41, %v5727_v5 }
 0x115   : > { %v750_v24 = vrot.slane %v6260_v45, 4 }
 0x116   : > { %v4738_v8 = vpop.permute.xlu2 %4737  ;;  %v762_v61 = vrot.slane %v6263_v47, 4  ;;  %v818_v0 = vrot.slane %v6270_v43, 4 }
 0x117   : > { %v4740_v32 = vunpack.i.h.bf16 %v4738_v8  ;;  %v4739_v33 = vunpack.i.l.bf16 %v4738_v8 }
 0x119   : > { %v792_v34 = vrot.slane %v4740_v32, 4  ;;  %v736_v37 = vrot.slane %v4739_v33, 4 }
 0x11b   : > { %4922 = vrot.lane.b32.xlu0 %v4921_v62, %s5595_s9  ;;  %v806_v62 = vrot.slane %v6257_v40, 4 }
 0x11c   : > { %2126 = vrot.lane.b32.xlu2 %v5888_v16, %s5596_s10 }
 0x11e   : > { %v6248_v26 = vpop.permute.xlu2 %4747 }
 0x11f   : > { %v4750_v36 = vunpack.i.h.bf16 %v6248_v26  ;;  %v4749_v51 = vunpack.i.l.bf16 %v6248_v26 }
 0x125   : > { %v4728_v16 = vpop.permute.xlu0 %4727 }
 0x126   : > { %v4730_v49 = vunpack.i.h.bf16 %v4728_v16  ;;  %v4729_v38 = vunpack.i.l.bf16 %v4728_v16  ;;  %v6254_v50 = vpop.permute.xlu1 %4742  ;;  %v6267_v42 = vpop.permute.xlu2 %4767 }
 0x127   : > { %v4745_v3 = vunpack.i.h.bf16 %v6254_v50  ;;  %v4744_v18 = vunpack.i.l.bf16 %v6254_v50 }
 0x128   : > { %v794_v35 = vrot.slane %v4730_v49, 4  ;;  %v737_v15 = vsel %vm309_vm0, %v736_v37, %v4729_v38  ;;  %v738_v12 = vrot.slane %v4729_v38, 4  ;;  %v793_v59 = vsel %vm309_vm0, %v792_v34, %v4730_v49 }
 0x129   : > { %v6273_v2 = vperm.slane %v737_v15, %v5727_v5  ;;  %v6279_v21 = vperm.slane %v793_v59, %v5727_v5  ;;  %v988_v7 = vrot.slane %v4745_v3, 4  ;;  %v932_v39 = vrot.slane %v4744_v18, 4 }
 0x12a   : > { %v739_v10 = vsel %vm309_vm0, %v4739_v33, %v738_v12  ;;  %v795_v22 = vsel %vm309_vm0, %v4740_v32, %v794_v35  ;;  %v1000_v34 = vrot.slane %v4750_v36, 4  ;;  %v944_v37 = vrot.slane %v4749_v51, 4 }
 0x12b   : > { %v747_v25 = vperm.slane %v739_v10, %v5727_v5  ;;  %v803_v8 = vperm.slane %v795_v22, %v5727_v5  ;;  %v751_v30 = vsel %vm309_vm0, %v6273_v2, %v750_v24  ;;  %v807_v14 = vsel %vm309_vm0, %v6279_v21, %v806_v62 }
 0x12c   : > { %v9132_v49 = vunpack.i.l.bf16 %v6267_v42  ;;  %v6298_v38 = vperm.slane %v751_v30, %v5757_v20  ;;  %v6303_v15 = vperm.slane %v807_v14, %v5757_v20 }
 0x12d   : > { %v4753_v29 = vpop.permute.xlu0 %4752  ;;  %v763_v17 = vsel %vm309_vm0, %v747_v25, %v762_v61  ;;  %v819_v16 = vsel %vm309_vm0, %v803_v8, %v818_v0 }
 0x12e   : > { %v4755_v1 = vunpack.i.h.bf16 %v4753_v29  ;;  %v4754_v32 = vunpack.i.l.bf16 %v4753_v29  ;;  %v4758_v33 = vpop.permute.xlu1 %4757  ;;  %v6306_v12 = vperm.slane %v763_v17, %v5757_v20  ;;  %v6310_v24 = vpop.permute.xlu2 %4792  ;;  %v6313_v62 = vperm.slane %v819_v16, %v5757_v20 }
 0x12f   : > { %v4760_v41 = vunpack.i.h.bf16 %v4758_v33  ;;  %v4759_v26 = vunpack.i.l.bf16 %v4758_v33  ;;  %v6322_v33 = vrot.slane %v9132_v49, 4  ;;  %v816_v49 = vrot.slane %v803_v8, 4 }
 0x130   : > { %v933_v50 = vsel %vm309_vm0, %v4754_v32, %v932_v39  ;;  %v989_v35 = vsel %vm309_vm0, %v4755_v1, %v988_v7  ;;  %v930_v59 = vrot.slane %v4754_v32, 4  ;;  %v986_v61 = vrot.slane %v4755_v1, 4 }
 0x131   : > { %v945_v10 = vsel %vm309_vm0, %v4759_v26, %v944_v37  ;;  %v1001_v22 = vsel %vm309_vm0, %v4760_v41, %v1000_v34  ;;  %v941_v29 = vperm.slane %v933_v50, %v5727_v5  ;;  %v997_v7 = vperm.slane %v989_v35, %v5727_v5 }
 0x132   : > { %v953_v30 = vperm.slane %v945_v10, %v5727_v5  ;;  %v1009_v0 = vperm.slane %v1001_v22, %v5727_v5  ;;  %v942_v14 = vrot.slane %v4759_v26, 4  ;;  %v931_v1 = vsel %vm309_vm0, %v930_v59, %v4744_v18 }
 0x133   : > { %v998_v16 = vrot.slane %v4760_v41, 4  ;;  %v4926_v34 = vpack.i.bf16 %v6303_v15, %v6298_v38  ;;  %v4936_v37 = vpack.i.bf16 %v6313_v62, %v6306_v12  ;;  %v760_v22 = vrot.slane %v747_v25, 4 }
 0x134   : > { %v966_v35 = vrot.slane %v953_v30, 4  ;;  %v1022_v10 = vrot.slane %v1009_v0, 4  ;;  %v968_v32 = vrot.slane %v941_v29, 4  ;;  %v987_v26 = vsel %vm309_vm0, %v986_v61, %v4745_v3 }
 0x135   : > { %v6325_v39 = vpop.permute.xlu0 %4772  ;;  %v1024_v17 = vrot.slane %v997_v7, 4  ;;  %4927 = vrot.lane.b32.xlu1 %v4926_v34, %s5589_s15  ;;  %4937 = vrot.lane.b32.xlu2 %v4936_v37, %s5590_s16  ;;  %v943_v41 = vsel %vm309_vm0, %v942_v14, %v4749_v51  ;;  %v761_v59 = vsel %vm309_vm0, %v760_v22, %v6263_v47  ;;  %v817_v48 = vsel %vm309_vm0, %v816_v49, %v6270_v43 }
 0x136   : > { %v4763_v50 = vpop.permute.xlu1 %4762  ;;  %v4775_v18 = vunpack.i.h.bf16 %v6325_v39  ;;  %v4774_v25 = vunpack.i.l.bf16 %v6325_v39  ;;  %v999_v8 = vsel %vm309_vm0, %v998_v16, %v4750_v36  ;;  %v6344_v3 = vperm.slane %v761_v59, %v5757_v20 }
 0x137   : > { %v6347_v61 = vperm.slane %v817_v48, %v5757_v20  ;;  %v4765_v34 = vunpack.i.h.bf16 %v4763_v50  ;;  %v4764_v9 = vunpack.i.l.bf16 %v4763_v50  ;;  %v967_v51 = vsel %vm309_vm0, %v966_v35, %v941_v29 }
 0x138   : > { %v1390_v37 = vrot.slane %v4775_v18, 4  ;;  %v1023_v47 = vsel %vm309_vm0, %v1022_v10, %v997_v7  ;;  %v6352_v14 = vperm.slane %v931_v1, %v5727_v5  ;;  %v6355_v43 = vperm.slane %v987_v26, %v5727_v5  ;;  %v6369_v1 = vpop.permute.xlu2 %4802 }
 0x139   : > { %v4931_v36 = vpack.i.bf16 %v6347_v61, %v6344_v3  ;;  %v6360_v49 = vperm.slane %v967_v51, %v5757_v20  ;;  %v6363_v48 = vperm.slane %v943_v41, %v5727_v5  ;;  %v6366_v39 = vperm.slane %v999_v8, %v5727_v5 }
 0x13a   : > { %v4795_v29 = vunpack.i.h.bf16 %v6310_v24  ;;  %v1334_v7 = vrot.slane %v4774_v25, 4  ;;  %v9235_v50 = vunpack.i.l.bf16 %v6310_v24  ;;  %v1392_v10 = vrot.slane %v4765_v34, 4 }
 0x13b   : > { %4932 = vrot.lane.b32.xlu0 %v4931_v36, %s5593_s8  ;;  %v6375_v22 = vperm.slane %v1023_v47, %v5757_v20  ;;  %v969_v26 = vsel %vm309_vm0, %v953_v30, %v968_v32  ;;  %v1391_v59 = vsel %vm309_vm0, %v1390_v37, %v4765_v34  ;;  %v1336_v8 = vrot.slane %v4764_v9, 4 }
 0x13c   : > { %v1540_v35 = vrot.slane %v9235_v50, 4  ;;  %v6380_v51 = vperm.slane %v969_v26, %v5757_v20  ;;  %v1025_v27 = vsel %vm309_vm0, %v1009_v0, %v1024_v17  ;;  %v956_v47 = vrot.slane %v6352_v14, 4 }
 0x13d   : > { %v4783_v16 = vpop.permute.xlu0 %4782  ;;  %v4946_v50 = vpack.i.bf16 %v6375_v22, %v6360_v49  ;;  %v6386_v36 = vperm.slane %v1025_v27, %v5757_v20  ;;  %v1012_v52 = vrot.slane %v6355_v43, 4  ;;  %v1335_v30 = vsel %vm309_vm0, %v1334_v7, %v4764_v9 }
 0x13e   : > { %v4778_v41 = vpop.permute.xlu1 %4777  ;;  %v4785_v32 = vunpack.i.h.bf16 %v4783_v16  ;;  %v4784_v34 = vunpack.i.l.bf16 %v4783_v16  ;;  %v1393_v26 = vsel %vm309_vm0, %v4775_v18, %v1392_v10  ;;  %v957_v27 = vsel %vm309_vm0, %v6363_v48, %v956_v47 }
 0x13f   : > { %v4779_v37 = vunpack.i.l.bf16 %v4778_v41  ;;  %4947 = vrot.lane.b32.xlu2 %v4946_v50, %s5593_s8  ;;  %v4951_v0 = vpack.i.bf16 %v6386_v36, %v6380_v51  ;;  %v1013_v17 = vsel %vm309_vm0, %v6366_v39, %v1012_v52  ;;  %v1337_v28 = vsel %vm309_vm0, %v4774_v25, %v1336_v8 }
 0x140   : > { %v6401_v9 = vperm.slane %v957_v27, %v5757_v20  ;;  %v6404_v7 = vperm.slane %v1013_v17, %v5757_v20  ;;  %v4780_v18 = vunpack.i.h.bf16 %v4778_v41  ;;  %v6407_v16 = vperm.slane %v1391_v59, %v5727_v5  ;;  %v6428_v11 = vpop.permute.xlu2 %4827 }
 0x141   : > { %v6410_v10 = vperm.slane %v1335_v30, %v5727_v5  ;;  %4952 = vrot.lane.b32.xlu1 %v4951_v0, %s5590_s16  ;;  %v1598_v50 = vrot.slane %v4785_v32, 4  ;;  %v1541_v52 = vsel %vm309_vm0, %v1540_v35, %v4784_v34  ;;  %v9236_v25 = vunpack.i.h.bf16 %v6267_v42 }
 0x142   : > { %v1596_v47 = vrot.slane %v4795_v29, 4  ;;  %v4941_v27 = vpack.i.bf16 %v6404_v7, %v6401_v9  ;;  %v1346_v17 = vrot.slane %v4779_v37, 4  ;;  %v1401_v59 = vperm.slane %v1393_v26, %v5727_v5 }
 0x143   : > { %v1404_v8 = vrot.slane %v9236_v25, 4  ;;  %v1345_v46 = vperm.slane %v1337_v28, %v5727_v5  ;;  %v1542_v30 = vrot.slane %v4784_v34, 4  ;;  %v1349_v0 = vsel %vm309_vm0, %v4779_v37, %v6322_v33 }
 0x144   : > { %4942 = vrot.lane.b32.xlu0 %v4941_v27, %s5589_s15  ;;  %v6424_v35 = vperm.slane %v1541_v52, %v5727_v5  ;;  %v1597_v25 = vsel %vm309_vm0, %v1596_v47, %v4785_v32  ;;  %v1402_v57 = vrot.slane %v4780_v18, 4  ;;  %v1357_v55 = vperm.slane %v1349_v0, %v5727_v5 }
 0x145   : > { %v4798_v41 = vpop.permute.xlu0 %4797  ;;  %v1416_v26 = vrot.slane %v6407_v16, 4  ;;  %v1360_v28 = vrot.slane %v6410_v10, 4  ;;  %v1599_v34 = vsel %vm309_vm0, %v4795_v29, %v1598_v50  ;;  %v1405_v33 = vsel %vm309_vm0, %v4780_v18, %v1404_v8 }
 0x146   : > { %v4788_v44 = vpop.permute.xlu1 %4787  ;;  %v9237_v37 = vunpack.i.l.bf16 %v6267_v42  ;;  %v1370_v27 = vrot.slane %v1357_v55, 4  ;;  %v1413_v32 = vperm.slane %v1405_v33, %v5727_v5  ;;  %v4800_v47 = vunpack.i.h.bf16 %v4798_v41 }
 0x147   : > { %v6439_v0 = vperm.slane %v1597_v25, %v5727_v5  ;;  %v4799_v56 = vunpack.i.l.bf16 %v4798_v41  ;;  %v4790_v58 = vunpack.i.h.bf16 %v4788_v44  ;;  %v4789_v53 = vunpack.i.l.bf16 %v4788_v44 }
 0x148   : > { %v1347_v52 = vsel %vm309_vm0, %v1346_v17, %v9237_v37  ;;  %v9238_v31 = vunpack.i.l.bf16 %v6310_v24  ;;  %v1566_v18 = vrot.slane %v6424_v35, 4  ;;  %v9239_v50 = vunpack.i.h.bf16 %v6267_v42 }
 0x149   : > { %v1608_v17 = vrot.slane %v4800_v47, 4  ;;  %v6449_v33 = vperm.slane %v1347_v52, %v5727_v5  ;;  %v1552_v37 = vrot.slane %v4799_v56, 4  ;;  %v1610_v25 = vrot.slane %v4790_v58, 4 }
 0x14a   : > { %v1543_v29 = vsel %vm309_vm0, %v9238_v31, %v1542_v30  ;;  %v1403_v8 = vsel %vm309_vm0, %v1402_v57, %v9239_v50  ;;  %v1554_v63 = vrot.slane %v4789_v53, 4  ;;  %v1426_v41 = vrot.slane %v1413_v32, 4 }
 0x14b   : > { %v1609_v44 = vsel %vm309_vm0, %v1608_v17, %v4790_v58  ;;  %v1372_v54 = vrot.slane %v1345_v46, 4  ;;  %v1371_v24 = vsel %vm309_vm0, %v1370_v27, %v1345_v46  ;;  %v1607_v30 = vperm.slane %v1599_v34, %v5727_v5 }
 0x14c   : > { %v6457_v42 = vperm.slane %v1403_v8, %v5727_v5  ;;  %v1553_v57 = vsel %vm309_vm0, %v1552_v37, %v4789_v53  ;;  %v1428_v52 = vrot.slane %v1401_v59, 4  ;;  %v1551_v23 = vperm.slane %v1543_v29, %v5727_v5  ;;  %v6479_v29 = vpop.permute.xlu2 %4837 }
 0x14d   : > { %v6453_v31 = vpop.permute.xlu0 %4812  ;;  %v1611_v6 = vsel %vm309_vm0, %v4800_v47, %v1610_v25  ;;  %v1555_v58 = vsel %vm309_vm0, %v4799_v56, %v1554_v63  ;;  %v1373_v46 = vsel %vm309_vm0, %v1357_v55, %v1372_v54  ;;  %v6467_v27 = vperm.slane %v1609_v44, %v5727_v5  ;;  %9242 = vst [vmem:[#allocation34_spill] sm:$0xff] %v6479_v29 }
 0x14e   : > { %9240 = vst [vmem:[#allocation32_spill] sm:$0xff] %v6453_v31  ;;  %v6460_v50 = vpop.permute.xlu1 %4807  ;;  %v6470_v34 = vperm.slane %v1373_v46, %v5757_v20  ;;  %v1429_v8 = vsel %vm309_vm0, %v1413_v32, %v1428_v52  ;;  %v6474_v53 = vperm.slane %v1371_v24, %v5757_v20  ;;  %v6477_v17 = vperm.slane %v1553_v57, %v5727_v5 }
 0x14f   : > { %9241 = vst [vmem:[#allocation33_spill] sm:$0xff] %v6460_v50  ;;  %v6482_v63 = vperm.slane %v1429_v8, %v5757_v20  ;;  %v1427_v55 = vsel %vm309_vm0, %v1426_v41, %v1401_v59  ;;  %v1361_v56 = vsel %vm309_vm0, %v6449_v33, %v1360_v28  ;;  %v1563_v54 = vperm.slane %v1555_v58, %v5727_v5 }
 0x150   : > { %v6489_v32 = vperm.slane %v1427_v55, %v5757_v20  ;;  %v6492_v47 = vperm.slane %v1361_v56, %v5757_v20  ;;  %v1417_v37 = vsel %vm309_vm0, %v6457_v42, %v1416_v26  ;;  %v1622_v25 = vrot.slane %v6439_v0, 4 }
 0x151   : > { %v1619_v44 = vperm.slane %v1611_v6, %v5727_v5  ;;  %v4966_v59 = vpack.i.bf16 %v6482_v63, %v6470_v34  ;;  %v6501_v28 = vperm.slane %v1417_v37, %v5757_v20  ;;  %v1567_v26 = vsel %vm309_vm0, %v6477_v17, %v1566_v18 }
 0x152   : > { %v4961_v41 = vpack.i.bf16 %v6489_v32, %v6474_v53  ;;  %v1623_v6 = vsel %vm309_vm0, %v6467_v27, %v1622_v25  ;;  %v1578_v57 = vrot.slane %v1551_v23, 4  ;;  %v6516_v58 = vperm.slane %v1567_v26, %v5757_v20 }
 0x153   : > { %4967 = vrot.lane.b32.xlu1 %v4966_v59, %s5590_s16  ;;  %v4956_v24 = vpack.i.bf16 %v6501_v28, %v6492_v47  ;;  %v6519_v46 = vperm.slane %v1623_v6, %v5757_v20  ;;  %v1634_v8 = vrot.slane %v1607_v30, 4  ;;  %v1576_v55 = vrot.slane %v1563_v54, 4 }
 0x154   : > { %4962 = vrot.lane.b32.xlu2 %v4961_v41, %s5593_s8  ;;  %v1579_v18 = vsel %vm309_vm0, %v1563_v54, %v1578_v57  ;;  %v1632_v37 = vrot.slane %v1619_v44, 4  ;;  %v6542_v57 = vpop.permute.xlu2 %4852 }
 0x155   : > { %v6512_v52 = vpop.permute.xlu0 %4822  ;;  %4957 = vrot.lane.b32.xlu0 %v4956_v24, %s5589_s15  ;;  %v6526_v25 = vperm.slane %v1579_v18, %v5757_v20  ;;  %v1635_v59 = vsel %vm309_vm0, %v1619_v44, %v1634_v8  ;;  %v1577_v41 = vsel %vm309_vm0, %v1576_v55, %v1551_v23  ;;  %v4971_v24 = vpack.i.bf16 %v6519_v46, %v6516_v58 }
 0x156   : > { %9243 = vst [vmem:[#allocation35_spill] sm:$0xff] %v6512_v52  ;;  %v6521_v56 = vpop.permute.xlu1 %4817  ;;  %v6531_v26 = vperm.slane %v1635_v59, %v5757_v20  ;;  %v6534_v6 = vperm.slane %v1577_v41, %v5757_v20  ;;  %v1633_v52 = vsel %vm309_vm0, %v1632_v37, %v1607_v30  ;;  %v776_v8 = vrot.slane %v6344_v3, 4 }
 0x157   : > { %v6540_v54 = vperm.slane %v1633_v52, %v5757_v20  ;;  %9244 = vst [vmem:[#allocation36_spill] sm:$0xff] %v6542_v57  ;;  %v832_v55 = vrot.slane %v6347_v61, 4  ;;  %v774_v30 = vrot.slane %v6298_v38, 4  ;;  %v830_v37 = vrot.slane %v6303_v15, 4 }
 0x158   : > { %v4981_v44 = vpack.i.bf16 %v6531_v26, %v6526_v25  ;;  %v6560_v59 = vsel %vm309_vm0, 0.0, %v776_v8  ;;  %v954_v61 = vrot.slane %v6363_v48, 4  ;;  %v1010_v38 = vrot.slane %v6366_v39, 4 }
 0x159   : > { %v4976_v23 = vpack.i.bf16 %v6540_v54, %v6534_v6  ;;  %v6563_v3 = vsel %vm309_vm0, 0.0, %v832_v55  ;;  %v6568_v41 = vsel %vm309_vm0, 0.0, %v774_v30  ;;  %v6574_v15 = vsel %vm309_vm0, 0.0, %v830_v37 }
 0x15a   : > { %v834_v8 = vrot.slane %v6313_v62, 4  ;;  %v980_v48 = vrot.slane %v6401_v9, 4  ;;  %v1036_v39 = vrot.slane %v6404_v7, 4  ;;  %v6590_v37 = vsel %vm309_vm0, %v954_v61, %v6352_v14 }
 0x15b   : > { %4977 = vrot.lane.b32.xlu1 %v4976_v23, %s5593_s8  ;;  %v6594_v23 = vsel %vm309_vm0, %v1010_v38, %v6355_v43  ;;  %v982_v62 = vrot.slane %v6360_v49, 4 }
 0x15c   : > { %4972 = vrot.lane.b32.xlu2 %v4971_v24, %s5589_s15  ;;  %v778_v24 = vrot.slane %v6306_v12, 4  ;;  %v6581_v55 = vpop.permute.xlu2 %4867  ;;  %v6600_v7 = vsel %vm309_vm0, 0.0, %v834_v8  ;;  %v6609_v61 = vsel %vm309_vm0, 0.0, %v1036_v39  ;;  %v1384_v8 = vrot.slane %v6492_v47, 4 }
 0x15d   : > { %v6550_v18 = vpop.permute.xlu0 %4832  ;;  %4982 = vrot.lane.b32.xlu0 %v4981_v44, %s5590_s16  ;;  %9246 = vst [vmem:[#allocation38_spill] sm:$0xff] %v6581_v55  ;;  %v6603_v44 = vsel %vm309_vm0, 0.0, %v980_v48  ;;  %v6614_v49 = vsel %vm309_vm0, 0.0, %v982_v62  ;;  %v1440_v48 = vrot.slane %v6501_v28, 4  ;;  %v1040_v39 = vrot.slane %v6386_v36, 4 }
 0x15e   : > { %9245 = vst [vmem:[#allocation37_spill] sm:$0xff] %v6550_v18  ;;  %v6555_v52 = vpop.permute.xlu1 %4842  ;;  %v6586_v12 = vsel %vm309_vm0, 0.0, %v778_v24  ;;  %v1038_v24 = vrot.slane %v6375_v22, 4  ;;  %v984_v22 = vrot.slane %v6380_v51, 4  ;;  %v1386_v47 = vrot.slane %v6474_v53, 4 }
 0x15f   : > { %v6629_v62 = vsel %vm309_vm0, 0.0, %v1440_v48  ;;  %v6640_v28 = vsel %vm309_vm0, 0.0, %v1040_v39  ;;  %v1564_v36 = vrot.slane %v6477_v17, 4  ;;  %v1620_v53 = vrot.slane %v6467_v27, 4 }
 0x160   : > { %v6617_v38 = vsel %vm309_vm0, 0.0, %v1038_v24  ;;  %v6632_v24 = vsel %vm309_vm0, 0.0, %v984_v22  ;;  %v1358_v22 = vrot.slane %v6449_v33, 4  ;;  %v6652_v57 = vsel %vm309_vm0, 0.0, %v1386_v47 }
 0x161   : > { %v1442_v51 = vrot.slane %v6489_v32, 4  ;;  %v1414_v39 = vrot.slane %v6457_v42, 4  ;;  %v6667_v33 = vsel %vm309_vm0, %v1620_v53, %v6439_v0  ;;  %v1646_v0 = vrot.slane %v6519_v46, 4 }
 0x162   : > { %v6671_v27 = vsel %vm309_vm0, %v1358_v22, %v6410_v10  ;;  %v1594_v10 = vrot.slane %v6526_v25, 4  ;;  %v1650_v22 = vrot.slane %v6531_v26, 4  ;;  %v1444_v46 = vrot.slane %v6482_v63, 4 }
 0x163   : > { %v6657_v17 = vsel %vm309_vm0, 0.0, %v1442_v51  ;;  %v6677_v42 = vsel %vm309_vm0, %v1414_v39, %v6407_v16  ;;  %v6691_v53 = vsel %vm309_vm0, 0.0, %v1646_v0  ;;  %v1592_v26 = vrot.slane %v6534_v6, 4 }
 0x164   : > { %v6647_v14 = vpop.permute.xlu2 %4882  ;;  %v6694_v16 = vsel %vm309_vm0, 0.0, %v1594_v10  ;;  %v6699_v39 = vsel %vm309_vm0, 0.0, %v1650_v22  ;;  %v1648_v0 = vrot.slane %v6540_v54, 4  ;;  %v6715_v22 = vsel %vm309_vm0, 0.0, %v1444_v46 }
 0x165   : > { %v6583_v30 = vpop.permute.xlu0 %4847  ;;  %9250 = vst [vmem:[#allocation42_spill] sm:$0xff] %v6647_v14  ;;  %v6720_v63 = vsel %vm309_vm0, 0.0, %v1592_v26 }
 0x166   : > { %9247 = vst [vmem:[#allocation39_spill] sm:$0xff] %v6583_v30  ;;  %v6597_v9 = vpop.permute.xlu1 %4857  ;;  %v6723_v25 = vsel %vm309_vm0, 0.0, %v1648_v0  ;;  %v804_v0 = vrot.slane %v6279_v21, 4 }
 0x167   : > { %9248 = vst [vmem:[#allocation40_spill] sm:$0xff] %v6597_v9  ;;  %v6626_v9 = vsel %vm309_vm0, 0.0, %v1384_v8 }
 0x16c   : > { %v6682_v51 = vpop.permute.xlu2 %4912 }
 0x16d   : > { %v6635_v43 = vpop.permute.xlu0 %4862  ;;  %9253 = vst [vmem:[#allocation45_spill] sm:$0xff] %v6682_v51 }
 0x16e   : > { %v6643_v8 = vpop.permute.xlu1 %4872 }
 0x16f   : > { %9249 = vst [vmem:[#allocation41_spill] sm:$0xff] %v6643_v8  ;;  %v6661_v8 = vsel %vm309_vm0, %v1564_v36, %v6424_v35  ;;  %v1590_v35 = vrot.slane %v6516_v58, 4 }
 0x171   : > { %v6685_v36 = vsel %vm309_vm0, 0.0, %v1590_v35  ;;  %v1388_v35 = vrot.slane %v6470_v34, 4  ;;  %v748_v34 = vrot.slane %v6273_v2, 4 }
 0x173   : > { %v6712_v58 = vsel %vm309_vm0, 0.0, %v1388_v35  ;;  %v749_v2 = vsel %vm309_vm0, %v748_v34, %v6260_v45 }
 0x174   : > { %v4918_v54 = vpop.permute.xlu2 %4917 }
 0x175   : > { %v6673_v32 = vpop.permute.xlu0 %4877  ;;  %v4920_v46 = vunpack.i.h.bf16 %v4918_v54 }
 0x176   : > { %9251 = vst [vmem:[#allocation43_spill] sm:$0xff] %v6673_v32  ;;  %v6679_v47 = vpop.permute.xlu1 %4887  ;;  %v4919_v32 = vunpack.i.l.bf16 %v4918_v54 }
 0x177   : > { %9252 = vst [vmem:[#allocation44_spill] sm:$0xff] %v6679_v47  ;;  %v2000_v50 = vrot.slane %v4920_v46, 4 }
 0x178   : > { %v1944_v55 = vrot.slane %v4919_v32, 4 }
 0x17d   : > { %v6703_v48 = vpop.permute.xlu0 %4892 }
 0x17e   : > { %9254 = vst [vmem:[#allocation46_spill] sm:$0xff] %v6703_v48  ;;  %v6709_v10 = vpop.permute.xlu1 %4897 }
 0x17f   : > { %9255 = vst [vmem:[#allocation47_spill] sm:$0xff] %v6709_v10 }
 0x185   : > { %v4903_v10 = vpop.permute.xlu0 %4902 }
 0x186   : > { %v4905_v35 = vunpack.i.h.bf16 %v4903_v10  ;;  %v4904_v48 = vunpack.i.l.bf16 %v4903_v10  ;;  %v4908_v51 = vpop.permute.xlu1 %4907 }
 0x187   : > { %v4910_v18 = vunpack.i.h.bf16 %v4908_v51  ;;  %v4909_v26 = vunpack.i.l.bf16 %v4908_v51 }
 0x188   : > { %v2002_v47 = vrot.slane %v4905_v35, 4  ;;  %v1946_v19 = vrot.slane %v4904_v48, 4  ;;  %v1945_v14 = vsel %vm309_vm0, %v1944_v55, %v4904_v48  ;;  %v2001_v10 = vsel %vm309_vm0, %v2000_v50, %v4905_v35 }
 0x189   : > { %v2014_v29 = vrot.slane %v4910_v18, 4  ;;  %v1958_v54 = vrot.slane %v4909_v26, 4  ;;  %v6745_v45 = vperm.slane %v2001_v10, %v5727_v5 }
 0x18a   : > { %v2003_v31 = vsel %vm309_vm0, %v4920_v46, %v2002_v47  ;;  %v1947_v6 = vsel %vm309_vm0, %v4919_v32, %v1946_v19  ;;  %v6738_v47 = vperm.slane %v1945_v14, %v5727_v5  ;;  %v805_v19 = vsel %vm309_vm0, %v804_v0, %v6257_v40 }
 0x18b   : > { %v2011_v51 = vperm.slane %v2003_v31, %v5727_v5  ;;  %v1955_v30 = vperm.slane %v1947_v6, %v5727_v5  ;;  %v6759_v0 = vperm.slane %v805_v19, %v5757_v20 }
 0x18d   : > { %v4923_v60 = vpop.permute.xlu0 %4922  ;;  %v1982_v6 = vrot.slane %v1955_v30, 4  ;;  %v2038_v35 = vrot.slane %v2011_v51, 4  ;;  %9256 = vst [vmem:[#allocation48_spill] sm:$0xff] %v6759_v0 }
 0x18e   : > { %v4925_v21 = vunpack.i.h.bf16 %v4923_v60  ;;  %v4924_v13 = vunpack.i.l.bf16 %v4923_v60  ;;  %v6750_v60 = vperm.slane %v749_v2, %v5757_v20 }
 0x190   : > { %v2012_v55 = vrot.slane %v4925_v21, 4  ;;  %v1956_v50 = vrot.slane %v4924_v13, 4  ;;  %v1959_v48 = vsel %vm309_vm0, %v4924_v13, %v1958_v54  ;;  %v2015_v32 = vsel %vm309_vm0, %v4925_v21, %v2014_v29 }
 0x191   : > { %v1967_v31 = vperm.slane %v1959_v48, %v5727_v5  ;;  %v2023_v34 = vperm.slane %v2015_v32, %v5727_v5  ;;  %v1970_v13 = vrot.slane %v6738_v47, 4 }
 0x192   : > { %v1957_v14 = vsel %vm309_vm0, %v1956_v50, %v4909_v26  ;;  %v2013_v40 = vsel %vm309_vm0, %v2012_v55, %v4910_v18  ;;  %v2026_v18 = vrot.slane %v6745_v45, 4 }
 0x193   : > { %v6756_v29 = vperm.slane %v1957_v14, %v5727_v5  ;;  %v1980_v46 = vrot.slane %v1967_v31, 4  ;;  %v6762_v10 = vperm.slane %v2013_v40, %v5727_v5  ;;  %v2036_v54 = vrot.slane %v2023_v34, 4 }
 0x194   : > { %v1983_v2 = vsel %vm309_vm0, %v1967_v31, %v1982_v6  ;;  %v2039_v26 = vsel %vm309_vm0, %v2023_v34, %v2038_v35  ;;  %v772_v6 = vrot.slane %v6750_v60, 4 }
 0x195   : > { %v6768_v21 = vperm.slane %v1983_v2, %v5757_v20  ;;  %v6771_v55 = vperm.slane %v2039_v26, %v5757_v20  ;;  %v1981_v50 = vsel %vm309_vm0, %v1980_v46, %v1955_v30  ;;  %v2037_v48 = vsel %vm309_vm0, %v2036_v54, %v2011_v51 }
 0x196   : > { %v6775_v19 = vperm.slane %v1981_v50, %v5757_v20  ;;  %v1971_v32 = vsel %vm309_vm0, %v6756_v29, %v1970_v13  ;;  %v6783_v34 = vperm.slane %v2037_v48, %v5757_v20  ;;  %v2027_v40 = vsel %vm309_vm0, %v6762_v10, %v2026_v18 }
 0x197   : > { %v4996_v31 = vpack.i.bf16 %v6771_v55, %v6768_v21  ;;  %v1979_v14 = vperm.slane %v1971_v32, %v5757_v20  ;;  %v2035_v30 = vperm.slane %v2027_v40, %v5757_v20  ;;  %v828_v51 = vrot.slane %v6759_v0, 4 }
 0x198   : > { %v4991_v35 = vpack.i.bf16 %v6783_v34, %v6775_v19  ;;  %v773_v46 = vsel %vm309_vm0, 0.0, %v772_v6  ;;  %v6800_v26 = vperm.slane %v6590_v37, %v5757_v20  ;;  %v6804_v18 = vperm.slane %v6594_v23, %v5757_v20 }
 0x199   : > { %4997 = vrot.lane.b32.xlu0 %v4996_v31, %s5590_s16  ;;  %v4986_v13 = vpack.i.bf16 %v2035_v30, %v1979_v14  ;;  %v829_v54 = vsel %vm309_vm0, 0.0, %v828_v51  ;;  %v9258_v50 = vpack.i.bf16 %v6563_v3, %v6560_v59  ;;  %v9259_v37 = vpack.i.bf16 %v6574_v15, %v6568_v41 }
 0x19a   : > { %4992 = vrot.lane.b32.xlu1 %v4991_v35, %s5593_s8  ;;  %v5001_v2 = vpack.i.bf16 %v829_v54, %v773_v46  ;;  %9257 = vst [vmem:[#allocation49_spill] sm:$0xff] %v6804_v18  ;;  %v978_v48 = vrot.slane %v6800_v26, 4  ;;  %v1034_v32 = vrot.slane %v6804_v18, 4  ;;  %v9260_v40 = vpack.i.bf16 %v6600_v7, %v6586_v12 }
 0x19b   : > { %4987 = vrot.lane.b32.xlu2 %v4986_v13, %s5589_s15  ;;  %v9261_v3 = vpack.i.bf16 %v6609_v61, %v6603_v44  ;;  %v6830_v41 = vperm.slane %v6661_v8, %v5757_v20  ;;  %v6834_v15 = vperm.slane %v6667_v33, %v5757_v20  ;;  %v6838_v12 = vperm.slane %v6671_v27, %v5757_v20 }
 0x19c   : > { %v979_v31 = vsel %vm309_vm0, 0.0, %v978_v48  ;;  %v1035_v23 = vsel %vm309_vm0, 0.0, %v1034_v32  ;;  %v6842_v7 = vperm.slane %v6677_v42, %v5757_v20  ;;  %v9264_v44 = vpack.i.bf16 %v6617_v38, %v6614_v49 }
 0x19d   : > { %v5021_v59 = vpack.i.bf16 %v1035_v23, %v979_v31  ;;  %9262 = vst [vmem:[#allocation50_spill] sm:$0xff] %v6834_v15  ;;  %v1588_v61 = vrot.slane %v6830_v41, 4  ;;  %v1644_v8 = vrot.slane %v6834_v15, 4  ;;  %v9265_v33 = vpack.i.bf16 %v6629_v62, %v6626_v9  ;;  %v6901_v31 = vpop.permute.xlu2 %2126 }
 0x19e   : > { %9263 = vst [vmem:[#allocation51_spill] sm:$0xff] %v6842_v7  ;;  %v1382_v27 = vrot.slane %v6838_v12, 4  ;;  %v1438_v6 = vrot.slane %v6842_v7, 4  ;;  %v9266_v42 = vpack.i.bf16 %v6640_v28, %v6632_v24  ;;  %v1968_v51 = vrot.slane %v6756_v29, 4 }
 0x19f   : > { %v1589_v49 = vsel %vm309_vm0, 0.0, %v1588_v61  ;;  %v1645_v38 = vsel %vm309_vm0, 0.0, %v1644_v8  ;;  %v2024_v35 = vrot.slane %v6762_v10, 4  ;;  %v9267_v13 = vpack.i.bf16 %v6657_v17, %v6652_v57  ;;  %v5480_v8 = vld [vmem:[#allocation2 + $0x22] sm:$0xff] }
 0x1a0   : > { %v1383_v9 = vsel %vm309_vm0, 0.0, %v1382_v27  ;;  %v1439_v62 = vsel %vm309_vm0, 0.0, %v1438_v6  ;;  %v5061_v46 = vpack.i.bf16 %v1645_v38, %v1589_v49  ;;  %v1969_v28 = vsel %vm309_vm0, %v1968_v51, %v6738_v47  ;;  %v5482_v27 = vld [vmem:[#allocation2 + $0x3a] sm:$0xff] }
 0x1a1   : > { %5002 = vrot.lane.b32.xlu0 %v5001_v2, %s5592_s26  ;;  %v5041_v24 = vpack.i.bf16 %v1439_v62, %v1383_v9  ;;  %v2025_v29 = vsel %vm309_vm0, %v2024_v35, %v6745_v45  ;;  %v6877_v10 = vperm.slane %v1969_v28, %v5757_v20  ;;  %v1994_v57 = vrot.slane %v1979_v14, 4 }
 0x1a2   : > { %5012 = vrot.lane.b32.xlu1 %v9258_v50, %s5591_s17  ;;  %v6880_v54 = vperm.slane %v2025_v29, %v5757_v20  ;;  %v2050_v17 = vrot.slane %v2035_v30, 4  ;;  %v9268_v2 = vpack.i.bf16 %v6691_v53, %v6685_v36  ;;  %v9269_v45 = vpack.i.bf16 %v6699_v39, %v6694_v16 }
 0x1a3   : > { %5007 = vrot.lane.b32.xlu2 %v9259_v37, %s5588_s29  ;;  %v1992_v47 = vrot.slane %v6877_v10, 4  ;;  %v9270_v48 = vpack.i.bf16 %v6715_v22, %v6712_v58  ;;  %v1995_v14 = vsel %vm309_vm0, 0.0, %v1994_v57  ;;  %v1998_v16 = vrot.slane %v6768_v21, 4 }
 0x1a4   : > { %v2048_v50 = vrot.slane %v6880_v54, 4  ;;  %v2051_v30 = vsel %vm309_vm0, 0.0, %v2050_v17  ;;  %v2054_v39 = vrot.slane %v6771_v55, 4  ;;  %v1996_v58 = vrot.slane %v6775_v19, 4  ;;  %v5477_v55 = vld [vmem:[#allocation2 + $0xa] sm:$0xff] }
 0x1a5   : > { %v1993_v36 = vsel %vm309_vm0, 0.0, %v1992_v47  ;;  %v5086_v32 = vpack.i.bf16 %v2051_v30, %v1995_v14  ;;  %v2052_v22 = vrot.slane %v6783_v34, 4  ;;  %v9271_v23 = vpack.i.bf16 %v6723_v25, %v6720_v63  ;;  %v6917_v19 = vpop.permute.xlu2 %4937  ;;  %v5478_v25 = vld [vmem:[#allocation2 + $0x32] sm:$0xff]  ;;  %v5479_v63 = vld [vmem:[#allocation2 + $0x1a] sm:$0xff] }
 0x1a6   : > { %v2049_v53 = vsel %vm309_vm0, 0.0, %v2048_v50 }
 0x1a7   : > { %v5081_v37 = vpack.i.bf16 %v2049_v53, %v1993_v36  ;;  %v2053_v21 = vsel %vm309_vm0, 0.0, %v2052_v22  ;;  %v6933_v38 = vpop.permute.xlu1 %4927 }
 0x1a9   : > { %5017 = vrot.lane.b32.xlu0 %v9260_v40, %s5594_s28  ;;  %v1999_v40 = vsel %vm309_vm0, 0.0, %v1998_v16 }
 0x1aa   : > { %5027 = vrot.lane.b32.xlu1 %v9261_v3, %s5588_s29  ;;  %v1997_v3 = vsel %vm309_vm0, 0.0, %v1996_v58 }
 0x1ab   : > { %5022 = vrot.lane.b32.xlu2 %v5021_v59, %s5592_s26  ;;  %v2055_v59 = vsel %vm309_vm0, 0.0, %v2054_v39  ;;  %v5091_v34 = vpack.i.bf16 %v2053_v21, %v1997_v3 }
 0x1ad   : > { %v6923_v61 = vpop.permute.xlu2 %4947  ;;  %v6931_v49 = vpop.permute.xlu0 %4932 }
 0x1b1   : > { %5032 = vrot.lane.b32.xlu0 %v9264_v44, %s5591_s17  ;;  %v5096_v44 = vpack.i.bf16 %v2055_v59, %v1999_v40 }
 0x1b2   : > { %5047 = vrot.lane.b32.xlu1 %v9265_v33, %s5588_s29  ;;  %v5481_v33 = vld [vmem:[#allocation2 + $0x52] sm:$0xff] }
 0x1b3   : > { %5037 = vrot.lane.b32.xlu2 %v9266_v42, %s5594_s28  ;;  %v5483_v42 = vld [vmem:[#allocation2 + $0x4a] sm:$0xff]  ;;  %v6939_v9 = vpop.permute.xlu1 %4952 }
 0x1b5   : > { %v6928_v6 = vpop.permute.xlu2 %4962 }
 0x1b6   : > { %v6937_v35 = vpop.permute.xlu0 %4942 }
 0x1b9   : > { %5052 = vrot.lane.b32.xlu0 %v9267_v13, %s5591_s17 }
 0x1ba   : > { %5062 = vrot.lane.b32.xlu1 %v5061_v46, %s5592_s26 }
 0x1bb   : > { %5042 = vrot.lane.b32.xlu2 %v5041_v24, %s5592_s26 }
 0x1bd   : > { %v6935_v51 = vpop.permute.xlu2 %4972 }
 0x1c1   : > { %5067 = vrot.lane.b32.xlu0 %v9268_v2, %s5588_s29 }
 0x1c2   : > { %5077 = vrot.lane.b32.xlu1 %v9269_v45, %s5594_s28 }
 0x1c3   : > { %5057 = vrot.lane.b32.xlu2 %v9270_v48, %s5594_s28 }
 0x1c5   : > { %v6945_v46 = vpop.permute.xlu1 %4967 }
 0x1c6   : > { %9272 = vst [vmem:[#allocation52_spill] sm:$0xff] %v6945_v46 }
 0x1c7   : > { %v6943_v13 = vpop.permute.xlu0 %4957 }
 0x1c9   : > { %5087 = vrot.lane.b32.xlu0 %v5086_v32, %s5588_s29 }
 0x1ca   : > { %5082 = vrot.lane.b32.xlu1 %v5081_v37, %s5592_s26 }
 0x1cb   : > { %5072 = vrot.lane.b32.xlu2 %v9271_v23, %s5591_s17 }
 0x1cd   : > { %v6951_v29 = vpop.permute.xlu1 %4977 }
 0x1cf   : > { %v6949_v28 = vpop.permute.xlu0 %4982 }
 0x1d1   : > { %2128 = vrot.lane.b32.xlu0 %v5477_v55, %s5596_s10 }
 0x1d2   : > { %5097 = vrot.lane.b32.xlu1 %v5096_v44, %s5594_s28 }
 0x1d3   : > { %5092 = vrot.lane.b32.xlu2 %v5091_v34, %s5591_s17 }
 0x1d9   : > { %2134 = vrot.lane.b32.xlu0 %v5478_v25, %s5596_s10 }
 0x1da   : > { %2130 = vrot.lane.b32.xlu1 %v5479_v63, %s5596_s10 }
 0x1db   : > { %2132 = vrot.lane.b32.xlu2 %v5480_v8, %s5596_s10  ;;  %v2152_v8 = vrot.slane %v6901_v31, 4 }
 0x1e1   : > { %2140 = vrot.lane.b32.xlu0 %v5481_v33, %s5596_s10 }
 0x1e2   : > { %2136 = vrot.lane.b32.xlu1 %v5482_v27, %s5596_s10 }
 0x1e3   : > { %2138 = vrot.lane.b32.xlu2 %v5483_v42, %s5596_s10 }
 0x1f5   : > { %v6941_v62 = vpop.permute.xlu2 %4987 }
 0x1fd   : > { %v6947_v24 = vpop.permute.xlu2 %5007 }
 0x205   : > { %v6953_v57 = vpop.permute.xlu2 %5022 }
 0x20b   : > { %v6955_v17 = vpop.permute.xlu0 %4997 }
 0x20c   : > { %v6957_v2 = vpop.permute.xlu1 %4992 }
 0x20d   : > { %v6959_v47 = vpop.permute.xlu2 %5037 }
 0x20e   : > { %9273 = vst [vmem:[#allocation53_spill] sm:$0xff] %v6959_v47  ;;  %v4990_v47 = vunpack.i.h.bf16 %v6941_v62 }
 0x213   : > { %v6961_v50 = vpop.permute.xlu0 %5002 }
 0x214   : > { %v6963_v45 = vpop.permute.xlu1 %5012 }
 0x215   : > { %9274 = vst [vmem:[#allocation54_spill] sm:$0xff] %v6963_v45  ;;  %v6965_v48 = vpop.permute.xlu2 %5042 }
 0x21b   : > { %v6967_v14 = vpop.permute.xlu0 %5017 }
 0x21c   : > { %9275 = vst [vmem:[#allocation55_spill] sm:$0xff] %v6967_v14  ;;  %v6969_v30 = vpop.permute.xlu1 %5027 }
 0x21d   : > { %v6971_v36 = vpop.permute.xlu2 %5057 }
 0x21e   : > { %9276 = vst [vmem:[#allocation56_spill] sm:$0xff] %v6971_v36 }
 0x223   : > { %v6973_v53 = vpop.permute.xlu0 %5032 }
 0x224   : > { %9277 = vst [vmem:[#allocation57_spill] sm:$0xff] %v6973_v53  ;;  %v6975_v32 = vpop.permute.xlu1 %5047 }
 0x225   : > { %v6977_v37 = vpop.permute.xlu2 %5072 }
 0x22b   : > { %v6979_v16 = vpop.permute.xlu0 %5052 }
 0x22c   : > { %9278 = vst [vmem:[#allocation58_spill] sm:$0xff] %v6979_v16  ;;  %v6981_v39 = vpop.permute.xlu1 %5062 }
 0x22d   : > { %v6985_v22 = vpop.permute.xlu2 %5092 }
 0x233   : > { %v6983_v58 = vpop.permute.xlu0 %5067 }
 0x234   : > { %v6987_v23 = vpop.permute.xlu1 %5077 }
 0x235   : > { %9279 = vst [vmem:[#allocation59_spill] sm:$0xff] %v6987_v23  ;;  %v6989_v3 = vpop.permute.xlu2 %2132 }
 0x23b   : > { %v5088_v40 = vpop.permute.xlu0 %5087 }
 0x23c   : > { %v5083_v59 = vpop.permute.xlu1 %5082 }
 0x23d   : > { %v2139_v44 = vpop.permute.xlu2 %2138  ;;  %v5084_v33 = vunpack.i.l.bf16 %v5083_v59  ;;  %v5085_v42 = vunpack.i.h.bf16 %v5083_v59 }
 0x23e   : > { %v2162_v25 = vrot.slane %v2139_v44, 4 }
 0x23f   : > { %v2119_v46 = vsel %vm477_vm4, %v6880_v54, %v5085_v42  ;;  %v5094_v54 = vunpack.i.l.bf16 %v6985_v22  ;;  %v5089_v42 = vunpack.i.l.bf16 %v5088_v40 }
 0x243   : > { %v6991_v21 = vpop.permute.xlu0 %2128 }
 0x244   : > { %v6993_v55 = vpop.permute.xlu1 %5097 }
 0x24b   : > { %v2135_v34 = vpop.permute.xlu0 %2134 }
 0x24c   : > { %v2150_v63 = vrot.slane %v2135_v34, 4  ;;  %v2131_v27 = vpop.permute.xlu1 %2130  ;;  %v2153_v14 = vsel %vm309_vm0, %v2135_v34, %v2152_v8 }
 0x24d   : > { %v2163_v18 = vsel %vm309_vm0, %v2162_v25, %v2131_v27  ;;  %v2164_v36 = vrot.slane %v2131_v27, 4  ;;  %v4989_v27 = vunpack.i.l.bf16 %v6941_v62 }
 0x24e   : > { %v2151_v7 = vsel %vm309_vm0, %v2150_v63, %v6901_v31  ;;  %v2169_v15 = vperm.slane %v2163_v18, %v5727_v5  ;;  %v2112_v31 = vsel %vm477_vm4, %v6877_v10, %v5084_v33  ;;  %v4994_v18 = vunpack.i.l.bf16 %v6957_v2 }
 0x24f   : > { %v2157_v0 = vperm.slane %v2151_v7, %v5727_v5  ;;  %v2165_v23 = vsel %vm309_vm0, %v2139_v44, %v2164_v36  ;;  %v4999_v7 = vunpack.i.l.bf16 %v6955_v17  ;;  %v2161_v36 = vperm.slane %v2153_v14, %v5727_v5 }
 0x250   : > { %v2173_v25 = vperm.slane %v2165_v23, %v5727_v5  ;;  %v2174_v63 = vrot.slane %v2169_v15, 4  ;;  %v2113_v23 = vsel %vm479_vm5, %v2112_v31, %v4989_v27  ;;  %v2120_v14 = vsel %vm479_vm5, %v2119_v46, %v4990_v47 }
 0x251   : > { %v2176_v59 = vrot.slane %v2157_v0, 4  ;;  %v2220_v27 = vrot.slane %v6989_v3, 4 }
 0x252   : > { %v2186_v44 = vrot.slane %v2173_v25, 4  ;;  %v2175_v8 = vsel %vm309_vm0, %v2174_v63, %v2157_v0 }
 0x253   : > { %v2141_v34 = vpop.permute.xlu0 %2140  ;;  %v2177_v10 = vsel %vm309_vm0, %v2169_v15, %v2176_v59  ;;  %v7018_v45 = vperm.slane %v2175_v8, %v5757_v20  ;;  %v5090_v59 = vunpack.i.h.bf16 %v5088_v40 }
 0x254   : > { %v2218_v62 = vrot.slane %v2141_v34, 4  ;;  %v2185_v33 = vperm.slane %v2177_v10, %v5757_v20  ;;  %v2137_v16 = vpop.permute.xlu1 %2136  ;;  %v2187_v15 = vsel %vm309_vm0, %v2186_v44, %v2161_v36  ;;  %v2114_v10 = vsel %vm481_vm6, %v2113_v23, %v5089_v42 }
 0x255   : > { %v2206_v31 = vrot.slane %v2137_v16, 4  ;;  %v2198_v53 = vrot.slane %v7018_v45, 4  ;;  %v2121_v46 = vsel %vm481_vm6, %v2120_v14, %v5090_v59  ;;  %v2193_v44 = vperm.slane %v2187_v15, %v5757_v20 }
 0x256   : > { %v2219_v0 = vsel %vm309_vm0, %v2218_v62, %v6989_v3  ;;  %2267 = vrot.lane.b32.xlu2 %v2185_v33, %s5589_s15  ;;  %v2200_v63 = vrot.slane %v2185_v33, 4  ;;  %v2221_v62 = vsel %vm309_vm0, %v2141_v34, %v2220_v27  ;;  %v5099_v42 = vunpack.i.l.bf16 %v6993_v55 }
 0x257   : > { %v2225_v8 = vperm.slane %v2219_v0, %v5727_v5  ;;  %v2207_v47 = vsel %vm309_vm0, %v2206_v31, %v6991_v21  ;;  %v2199_v23 = vsel %vm309_vm0, 0.0, %v2198_v53  ;;  %v2188_v0 = vrot.slane %v2161_v36, 4 }
 0x258   : > { %v2201_v40 = vsel %vm309_vm0, 0.0, %v2200_v63  ;;  %v2213_v3 = vperm.slane %v2207_v47, %v5727_v5  ;;  %2263 = vrot.lane.b32.xlu1 %v2199_v23, %s5592_s26  ;;  %v2202_v14 = vrot.slane %v2193_v44, 4  ;;  %v2115_v59 = vsel %vm483_vm7, %v2114_v10, %v4994_v18 }
 0x259   : > { %v2230_v33 = vrot.slane %v2225_v8, 4  ;;  %2271 = vrot.lane.b32.xlu0 %v2201_v40, %s5588_s29  ;;  %v4995_v31 = vunpack.i.h.bf16 %v6957_v2  ;;  %v5095_v15 = vunpack.i.h.bf16 %v6985_v22  ;;  %v2208_v34 = vrot.slane %v6991_v21, 4 }
 0x25a   : > { %v5100_v27 = vunpack.i.h.bf16 %v6993_v55  ;;  %v2229_v53 = vperm.slane %v2221_v62, %v5727_v5  ;;  %v2189_v47 = vsel %vm309_vm0, %v2173_v25, %v2188_v0  ;;  %v2116_v36 = vsel %vm485_vm8, %v2115_v59, %v5094_v54 }
 0x25b   : > { %v2231_v63 = vsel %vm309_vm0, %v2230_v33, %v2213_v3  ;;  %v2203_v40 = vsel %vm309_vm0, 0.0, %v2202_v14  ;;  %v2117_v2 = vsel %vm487_vm9, %v2116_v36, %v4999_v7  ;;  %v2122_v22 = vsel %vm483_vm7, %v2121_v46, %v4995_v31 }
 0x25c   : > { %v7052_v18 = vperm.slane %v2231_v63, %v5757_v20  ;;  %v5000_v21 = vunpack.i.h.bf16 %v6955_v17  ;;  %v2209_v10 = vsel %vm309_vm0, %v2137_v16, %v2208_v34  ;;  %v7060_v55 = vsel %vm489_vm10, %v2117_v2, %v5099_v42 }
 0x25d   : > { %v2197_v25 = vperm.slane %v2189_v47, %v5757_v20  ;;  %v2123_v54 = vsel %vm485_vm8, %v2122_v22, %v5095_v15  ;;  %v2232_v62 = vrot.slane %v2213_v3, 4  ;;  %v2242_v23 = vrot.slane %v2229_v53, 4 }
 0x25e   : > { %2279 = vrot.lane.b32.xlu2 %v2203_v40, %s5591_s17  ;;  %v2124_v33 = vsel %vm487_vm9, %v2123_v54, %v5000_v21  ;;  %v2217_v7 = vperm.slane %v2209_v10, %v5727_v5  ;;  %v2254_v17 = vrot.slane %v7052_v18, 4  ;;  %v4844_v2 = vunpack.i.l.bf16 %v6555_v52 }
 0x25f   : > { %v7069_v16 = vsel %vm489_vm10, %v2124_v33, %v5100_v27  ;;  %v2233_v46 = vsel %vm309_vm0, %v2225_v8, %v2232_v62  ;;  %v2204_v0 = vrot.slane %v2197_v25, 4  ;;  %v4865_v22 = vunpack.i.h.bf16 %v6635_v43 }
 0x260   : > { %9280 = vst [vmem:[#allocation60_spill] sm:$0xff] %v7069_v16  ;;  %2275 = vrot.lane.b32.xlu1 %v2193_v44, %s5593_s8  ;;  %v2255_v42 = vsel %vm309_vm0, 0.0, %v2254_v17  ;;  %v2243_v3 = vsel %vm309_vm0, %v2242_v23, %v2217_v7  ;;  %v2244_v14 = vrot.slane %v2217_v7, 4  ;;  %v2241_v59 = vperm.slane %v2233_v46, %v5757_v20  ;;  %v9281_v7 = vld [vmem:[#allocation14_spill] sm:$0xff]  ;;  %v9282_v46 = vld [vmem:[#allocation39_spill] sm:$0xff] }
 0x261   : > { %2283 = vrot.lane.b32.xlu0 %v2197_v25, %s5590_s16  ;;  %v2249_v31 = vperm.slane %v2243_v3, %v5757_v20  ;;  %v2205_v15 = vsel %vm309_vm0, 0.0, %v2204_v0  ;;  %v4805_v21 = vunpack.i.h.bf16 %v6369_v1  ;;  %v4804_v10 = vunpack.i.l.bf16 %v6369_v1  ;;  %v9284_v1 = vld [vmem:[#allocation34_spill] sm:$0xff]  ;;  %v9292_v3 = vld [vmem:[#allocation21_spill] sm:$0xff] }
 0x262   : > { %v2245_v8 = vsel %vm309_vm0, %v2229_v53, %v2244_v14  ;;  %v2256_v34 = vrot.slane %v2241_v59, 4  ;;  %v4864_v53 = vunpack.i.l.bf16 %v6635_v43  ;;  %v4819_v62 = vunpack.i.l.bf16 %v6521_v56 }
 0x263   : > { %v2258_v44 = vrot.slane %v2249_v31, 4  ;;  %v2253_v63 = vperm.slane %v2245_v8, %v5757_v20  ;;  %v4845_v23 = vunpack.i.h.bf16 %v6555_v52  ;;  %v678_v17 = vsel %vm477_vm4, %v9281_v7, %v4844_v2  ;;  %v9286_v8 = vld [vmem:[#allocation32_spill] sm:$0xff]  ;;  %v9290_v7 = vld [vmem:[#allocation15_spill] sm:$0xff] }
 0x264   : > { %v2257_v47 = vsel %vm309_vm0, 0.0, %v2256_v34  ;;  %v1288_v33 = vsel %vm477_vm4, %v6141_v4, %v4864_v53  ;;  %v4849_v43 = vunpack.i.l.bf16 %v9282_v46  ;;  %v4820_v14 = vunpack.i.h.bf16 %v6521_v56  ;;  %v9289_v53 = vld [vmem:[#allocation37_spill] sm:$0xff]  ;;  %v9295_v20 = vld [vmem:[#allocation44_spill] sm:$0xff] }
 0x265   : > { %v2259_v27 = vsel %vm309_vm0, 0.0, %v2258_v44  ;;  %v2260_v36 = vrot.slane %v2253_v63, 4  ;;  %v4839_v4 = vunpack.i.l.bf16 %v9284_v1  ;;  %v4814_v52 = vunpack.i.l.bf16 %v9286_v8  ;;  %v9287_v44 = vld [vmem:[#allocation33_spill] sm:$0xff] }
 0x266   : > { %2291 = vrot.lane.b32.xlu2 %v2255_v42, %s5592_s26  ;;  %v9283_v42 = vld [vmem:[#allocation17_spill] sm:$0xff]  ;;  %v4810_v34 = vunpack.i.h.bf16 %v9287_v44  ;;  %v4835_v2 = vunpack.i.h.bf16 %v9289_v53  ;;  %v4809_v25 = vunpack.i.l.bf16 %v9287_v44 }
 0x267   : > { %v2261_v40 = vsel %vm309_vm0, 0.0, %v2260_v36  ;;  %v1295_v0 = vsel %vm477_vm4, %v9283_v42, %v4865_v22  ;;  %v4834_v22 = vunpack.i.l.bf16 %v9289_v53  ;;  %v685_v42 = vsel %vm477_vm4, %v9290_v7, %v4845_v23  ;;  %v9296_v7 = vld [vmem:[#allocation45_spill] sm:$0xff] }
 0x268   : > { %2287 = vrot.lane.b32.xlu1 %v2205_v15, %s5594_s28  ;;  %v1296_v56 = vsel %vm479_vm5, %v1295_v0, %v4820_v14  ;;  %v9294_v14 = vld [vmem:[#allocation35_spill] sm:$0xff]  ;;  %v4889_v23 = vunpack.i.l.bf16 %v9295_v20 }
 0x269   : > { %2295 = vrot.lane.b32.xlu0 %v2241_v59, %s5589_s15  ;;  %v9285_v59 = vld [vmem:[#allocation42_spill] sm:$0xff]  ;;  %v4824_v54 = vunpack.i.l.bf16 %v9294_v14  ;;  %v4825_v44 = vunpack.i.h.bf16 %v9294_v14 }
 0x26a   : > { %v4884_v15 = vunpack.i.l.bf16 %v9285_v59 }
 0x26e   : > { %2303 = vrot.lane.b32.xlu2 %v2249_v31, %s5593_s8  ;;  %v4885_v31 = vunpack.i.h.bf16 %v9285_v59 }
 0x270   : > { %2299 = vrot.lane.b32.xlu1 %v2257_v47, %s5588_s29 }
 0x271   : > { %2307 = vrot.lane.b32.xlu0 %v2259_v27, %s5591_s17  ;;  %v9288_v27 = vld [vmem:[#allocation38_spill] sm:$0xff] }
 0x272   : > { %v4870_v47 = vunpack.i.h.bf16 %v9288_v27  ;;  %v4869_v36 = vunpack.i.l.bf16 %v9288_v27  ;;  %v1898_v27 = vsel %vm477_vm4, %v9292_v3, %v4884_v15  ;;  %v4850_v3 = vunpack.i.h.bf16 %v9282_v46 }
 0x273   : > { %v5064_v46 = vunpack.i.l.bf16 %v6981_v39 }
 0x274   : > { %v1297_v53 = vsel %vm481_vm6, %v1296_v56, %v4870_v47  ;;  %v5069_v47 = vunpack.i.l.bf16 %v6983_v58 }
 0x275   : > { %v1298_v56 = vsel %vm483_vm7, %v1297_v53, %v4825_v44  ;;  %v9300_v44 = vld [vmem:[#allocation40_spill] sm:$0xff] }
 0x276   : > { %2315 = vrot.lane.b32.xlu2 %v2261_v40, %s5594_s28  ;;  %v679_v40 = vsel %vm479_vm5, %v678_v17, %v4804_v10  ;;  %v9293_v17 = vld [vmem:[#allocation36_spill] sm:$0xff] }
 0x277   : > { %v680_v59 = vsel %vm481_vm6, %v679_v40, %v4849_v43  ;;  %v4854_v43 = vunpack.i.l.bf16 %v9293_v17  ;;  %v686_v40 = vsel %vm479_vm5, %v685_v42, %v4805_v21 }
 0x278   : > { %2311 = vrot.lane.b32.xlu1 %v2253_v63, %s5590_s16  ;;  %v1289_v63 = vsel %vm479_vm5, %v1288_v33, %v4819_v62  ;;  %v9291_v62 = vld [vmem:[#allocation22_spill] sm:$0xff]  ;;  %v687_v53 = vsel %vm481_vm6, %v686_v40, %v4850_v3  ;;  %v9302_v3 = vunpack.i.l.bf16 %v6428_v11 }
 0x279   : > { %v1905_v33 = vsel %vm477_vm4, %v9291_v62, %v4885_v31  ;;  %v1290_v10 = vsel %vm481_vm6, %v1289_v63, %v4869_v36  ;;  %v681_v31 = vsel %vm483_vm7, %v680_v59, %v4809_v25  ;;  %v1899_v63 = vsel %vm479_vm5, %v1898_v27, %v4834_v22  ;;  %v9297_v62 = vld [vmem:[#allocation41_spill] sm:$0xff]  ;;  %v9298_v25 = vld [vmem:[#allocation46_spill] sm:$0xff] }
 0x27a   : > { %v1291_v15 = vsel %vm483_vm7, %v1290_v10, %v4824_v54  ;;  %v1906_v36 = vsel %vm479_vm5, %v1905_v33, %v4835_v2  ;;  %v4875_v0 = vunpack.i.h.bf16 %v9297_v62  ;;  %v4874_v14 = vunpack.i.l.bf16 %v9297_v62  ;;  %v9299_v2 = vld [vmem:[#allocation43_spill] sm:$0xff] }
 0x27b   : > { %v1900_v21 = vsel %vm481_vm6, %v1899_v63, %v4889_v23  ;;  %v4894_v42 = vunpack.i.l.bf16 %v9298_v25  ;;  %v682_v54 = vsel %vm485_vm8, %v681_v31, %v4854_v43  ;;  %v4879_v59 = vunpack.i.l.bf16 %v9299_v2  ;;  %v9301_v43 = vld [vmem:[#allocation47_spill] sm:$0xff] }
 0x27c   : > { %v1292_v22 = vsel %vm485_vm8, %v1291_v15, %v4874_v14  ;;  %v4890_v33 = vunpack.i.h.bf16 %v9295_v20  ;;  %v5004_v27 = vunpack.i.l.bf16 %v6961_v50  ;;  %v4914_v10 = vunpack.i.l.bf16 %v9296_v7  ;;  %v9305_v7 = vld [vmem:[#allocation58_spill] sm:$0xff] }
 0x27d   : > { %v4859_v23 = vunpack.i.l.bf16 %v9300_v44  ;;  %v7158_v63 = vsel %vm485_vm8, %v1298_v56, %v4875_v0  ;;  %v4899_v31 = vunpack.i.l.bf16 %v9301_v43  ;;  %v1901_v15 = vsel %vm483_vm7, %v1900_v21, %v4839_v4 }
 0x27e   : > { %v683_v14 = vsel %vm487_vm9, %v682_v54, %v4814_v52  ;;  %v1708_v20 = vsel %vm477_vm4, %v6830_v41, %v5064_v46  ;;  %v1902_v40 = vsel %vm485_vm8, %v1901_v15, %v4894_v42  ;;  %v1293_v0 = vsel %vm487_vm9, %v1292_v22, %v9302_v3  ;;  %v9304_v41 = vld [vmem:[#allocation57_spill] sm:$0xff] }
 0x27f   : > { %v7172_v56 = vsel %vm481_vm6, %v1906_v36, %v4890_v33  ;;  %v4974_v62 = vunpack.i.l.bf16 %v6935_v51  ;;  %v892_v4 = vsel %vm477_vm4, %v6750_v60, %v5004_v27  ;;  %v7178_v52 = vsel %vm489_vm10, %v1293_v0, %v4879_v59 }
 0x280   : > { %v4929_v42 = vunpack.i.l.bf16 %v6933_v38  ;;  %v7184_v54 = vsel %vm483_vm7, %v687_v53, %v4810_v34  ;;  %v5024_v36 = vunpack.i.l.bf16 %v6953_v57  ;;  %v1903_v60 = vsel %vm487_vm9, %v1902_v40, %v4899_v31 }
 0x281   : > { %9303 = vst [vmem:[#allocation14_spill] sm:$0xff] %v7184_v54  ;;  %v1709_v22 = vsel %vm479_vm5, %v1708_v20, %v4974_v62  ;;  %v7190_v59 = vsel %vm489_vm10, %v683_v14, %v4859_v23  ;;  %v5044_v15 = vunpack.i.l.bf16 %v6965_v48  ;;  %v4979_v34 = vunpack.i.l.bf16 %v6951_v29 }
 0x282   : > { %v893_v27 = vsel %vm479_vm5, %v892_v4, %v4929_v42  ;;  %v1710_v3 = vsel %vm481_vm6, %v1709_v22, %v5069_v47  ;;  %v5009_v53 = vunpack.i.l.bf16 %v6947_v24  ;;  %v4939_v31 = vunpack.i.l.bf16 %v6917_v19 }
 0x283   : > { %v4949_v23 = vunpack.i.l.bf16 %v6923_v61  ;;  %v4944_v14 = vunpack.i.l.bf16 %v6937_v35  ;;  %v7204_v20 = vsel %vm489_vm10, %v1903_v60, %v4914_v10  ;;  %v5597_v47 = vmov 0  }
 0x284   : > { %5101 = vset.pattern.permute.xlu0 %v5597_v47  ;;  %v1098_v40 = vsel %vm477_vm4, %v6800_v26, %v5024_v36  ;;  %v894_v4 = vsel %vm481_vm6, %v893_v27, %v5009_v53  ;;  %v5029_v42 = vunpack.i.l.bf16 %v6969_v30  ;;  %v1502_v22 = vsel %vm477_vm4, %v6838_v12, %v5044_v15 }
 0x285   : > { %v5049_v10 = vunpack.i.l.bf16 %v6975_v32  ;;  %v5074_v60 = vunpack.i.l.bf16 %v6977_v37  ;;  %v4930_v26 = vunpack.i.h.bf16 %v6933_v38  ;;  %v4964_v36 = vunpack.i.l.bf16 %v6928_v6 }
 0x286   : > { %v4934_v27 = vunpack.i.l.bf16 %v6931_v49  ;;  %v4984_v53 = vunpack.i.l.bf16 %v6949_v28  ;;  %v1099_v12 = vsel %vm479_vm5, %v1098_v40, %v4944_v14  ;;  %v5034_v44 = vunpack.i.l.bf16 %v9304_v41  ;;  %v9306_v40 = vld [vmem:[#allocation54_spill] sm:$0xff] }
 0x287   : > { %v5054_v54 = vunpack.i.l.bf16 %v9305_v7  ;;  %v4975_v14 = vunpack.i.h.bf16 %v6935_v51 }
 0x2b0   : > { %v2268_v5 = vpop.permute.xlu2 %2267 }
 0x2b8   : > { %v2280_v21 = vpop.permute.xlu2 %2279 }
 0x2ca   : > { %v2264_v46 = vpop.permute.xlu1 %2263 }
 0x2cb   : > { %v2272_v33 = vpop.permute.xlu0 %2271  ;;  %v2318_v62 = vsel %vm477_vm4, %v7018_v45, %v2264_v46  ;;  %v1711_v45 = vsel %vm483_vm7, %v1710_v3, %v4979_v34  ;;  %v500_v46 = vld [vmem:[%s9128_s2] sm:$0xf]  ;;  %v4959_v3 = vunpack.i.l.bf16 %v6943_v13  ;;  %v4954_v34 = vunpack.i.l.bf16 %v6939_v9 }
 0x2cc   : > { %v2319_v47 = vsel %vm479_vm5, %v2318_v62, %v2268_v5  ;;  %2367 = vperm.xlu0 %5101, %v500_v46   ;;  %v1712_v0 = vsel %vm485_vm8, %v1711_v45, %v5074_v60  ;;  %v895_v5 = vsel %vm483_vm7, %v894_v4, %v4934_v27  ;;  %v1100_v62 = vsel %vm481_vm6, %v1099_v12, %v5029_v42 }
 0x2cd   : > { %v1503_v38 = vsel %vm479_vm5, %v1502_v22, %v4959_v3  ;;  %v2320_v46 = vsel %vm481_vm6, %v2319_v47, %v2272_v33  ;;  %v5014_v45 = vunpack.i.l.bf16 %v9306_v40  ;;  %v5065_v4 = vunpack.i.h.bf16 %v6981_v39  ;;  %v9307_v22 = vld [vmem:[#allocation52_spill] sm:$0xff] }
 0x2ce   : > { %v1504_v8 = vsel %vm481_vm6, %v1503_v38, %v5049_v10  ;;  %v1713_v42 = vsel %vm487_vm9, %v1712_v0, %v4984_v53  ;;  %v4969_v27 = vunpack.i.l.bf16 %v9307_v22  ;;  %v5025_v33 = vunpack.i.h.bf16 %v6953_v57  ;;  %v9308_v10 = vld [vmem:[#allocation59_spill] sm:$0xff]  ;;  %v9311_v22 = vld [vmem:[#allocation50_spill] sm:$0xff] }
 0x2cf   : > { %v5005_v47 = vunpack.i.h.bf16 %v6961_v50  ;;  %v5079_v3 = vunpack.i.l.bf16 %v9308_v10  ;;  %v896_v12 = vsel %vm485_vm8, %v895_v5, %v5014_v45  ;;  %v1505_v38 = vsel %vm483_vm7, %v1504_v8, %v4964_v36  ;;  %v9310_v50 = vld [vmem:[#allocation53_spill] sm:$0xff]  ;;  %v9312_v8 = vld [vmem:[#allocation48_spill] sm:$0xff] }
 0x2d0   : > { %v1101_v39 = vsel %vm483_vm7, %v1100_v62, %v4949_v23  ;;  %v1506_v0 = vsel %vm485_vm8, %v1505_v38, %v5054_v54  ;;  %v5039_v16 = vunpack.i.l.bf16 %v9310_v50  ;;  %v1715_v5 = vsel %vm477_vm4, %v9311_v22, %v5065_v4  ;;  %v9313_v22 = vld [vmem:[#allocation56_spill] sm:$0xff] }
 0x2d1   : > { %v1714_v53 = vsel %vm489_vm10, %v1713_v42, %v5079_v3  ;;  %v1102_v57 = vsel %vm485_vm8, %v1101_v39, %v5034_v44  ;;  %v5070_v45 = vunpack.i.h.bf16 %v6983_v58  ;;  %v897_v54 = vsel %vm487_vm9, %v896_v12, %v4939_v31 }
 0x2d2   : > { %v2276_v15 = vpop.permute.xlu1 %2275  ;;  %v1507_v62 = vsel %vm487_vm9, %v1506_v0, %v4969_v27  ;;  %v2346_v42 = vrot.slane %v1714_v53, 4  ;;  %v1103_v4 = vsel %vm487_vm9, %v1102_v57, %v4954_v34  ;;  %v5045_v58 = vunpack.i.h.bf16 %v6965_v48  ;;  %v9317_v53 = vld [vmem:[#allocation51_spill] sm:$0xff] }
 0x2d3   : > { %v2321_v17 = vsel %vm483_vm7, %v2320_v46, %v2276_v15  ;;  %v2284_v60 = vpop.permute.xlu0 %2283  ;;  %v2292_v15 = vpop.permute.xlu2 %2291  ;;  %v9309_v46 = vld [vmem:[#allocation55_spill] sm:$0xff]  ;;  %v1716_v3 = vsel %vm479_vm5, %v1715_v5, %v4975_v14  ;;  %v9314_v12 = vunpack.i.h.bf16 %v9284_v1  ;;  %v4980_v34 = vunpack.i.h.bf16 %v6951_v29 }
 0x2d4   : > { %v2322_v51 = vsel %vm485_vm8, %v2321_v17, %v2280_v21  ;;  %v5019_v2 = vunpack.i.l.bf16 %v9309_v46  ;;  %v2352_v17 = vrot.slane %v7060_v55, 4  ;;  %v899_v21 = vsel %vm477_vm4, %v9312_v8, %v5005_v47 }
 0x2d5   : > { %v2323_v36 = vsel %vm487_vm9, %v2322_v51, %v2284_v60  ;;  %v5059_v55 = vunpack.i.l.bf16 %v9313_v22  ;;  %v900_v47 = vsel %vm479_vm5, %v899_v21, %v4930_v26  ;;  %v1717_v31 = vsel %vm481_vm6, %v1716_v3, %v5070_v45 }
 0x2d6   : > { %v898_v60 = vsel %vm489_vm10, %v897_v54, %v5019_v2  ;;  %v2363_v27 = vsel %vm2356_vm11, %v7204_v20, %v2352_v17  ;;  %v1908_v48 = vsel %vm483_vm7, %v7172_v56, %v9314_v12  ;;  %v5010_v14 = vunpack.i.h.bf16 %v6947_v24  ;;  %v9316_v56 = vld [vmem:[#allocation49_spill] sm:$0xff] }
 0x2d7   : > { %v1508_v51 = vsel %vm489_vm10, %v1507_v62, %v5059_v55  ;;  %v1104_v2 = vsel %vm489_vm10, %v1103_v4, %v5039_v16  ;;  %v4935_v26 = vunpack.i.h.bf16 %v6931_v49  ;;  %v2334_v20 = vrot.slane %v898_v60, 4 }
 0x2d8   : > { %v2361_v39 = vsel %vm2356_vm11, %v1508_v51, %v2346_v42  ;;  %v9315_v1 = vunpack.i.h.bf16 %v9298_v25  ;;  %v1105_v29 = vsel %vm477_vm4, %v9316_v56, %v5025_v33  ;;  %v901_v24 = vsel %vm481_vm6, %v900_v47, %v5010_v14 }
 0x2d9   : > { %v1509_v57 = vsel %vm477_vm4, %v9317_v53, %v5045_v58  ;;  %v1718_v16 = vsel %vm483_vm7, %v1717_v31, %v4980_v34  ;;  %v5030_v49 = vunpack.i.h.bf16 %v6969_v30  ;;  %v5050_v5 = vunpack.i.h.bf16 %v6975_v32  ;;  %v7304_v30 = vld [vmem:[%s9127_s1] sm:$0xf]  ;;  %v9321_v34 = vld [vmem:[#allocation52_spill] sm:$0xff] }
 0x2da   : > { %v2288_v23 = vpop.permute.xlu1 %2287  ;;  %v1909_v0 = vsel %vm485_vm8, %v1908_v48, %v9315_v1  ;;  %v5075_v45 = vunpack.i.h.bf16 %v6977_v37  ;;  %v9318_v17 = vrot.slane %v7178_v52, 4  ;;  %v4945_v33 = vunpack.i.h.bf16 %v6937_v35 }
 0x2db   : > { %v2324_v44 = vsel %vm489_vm10, %v2323_v36, %v2288_v23  ;;  %v2296_v38 = vpop.permute.xlu0 %2295  ;;  %v2304_v25 = vpop.permute.xlu2 %2303  ;;  %v4960_v21 = vunpack.i.h.bf16 %v6943_v13  ;;  %v2325_v23 = vsel %vm477_vm4, %v7052_v18, %v2292_v15  ;;  %v4985_v32 = vunpack.i.h.bf16 %v6949_v28 }
 0x2dc   : > { %4644 = vmatpush.msk.msra.mxu0 %vm2356_vm11, %v2324_v44  ;;  %v2359_v8 = vsel %vm2356_vm11, %v1104_v2, %v9318_v17  ;;  %v2326_v37 = vsel %vm479_vm5, %v2325_v23, %v2296_v38  ;;  %v2357_v35 = vsel %vm2356_vm11, %v7190_v59, %v2334_v20  ;;  %v1719_v13 = vsel %vm485_vm8, %v1718_v16, %v5075_v45  ;;  %v9322_v2 = vld [vmem:[#allocation60_spill] sm:$0xff] }
 0x2dd   : > { %v902_v52 = vsel %vm483_vm7, %v901_v24, %v4935_v26  ;;  %v1106_v18 = vsel %vm479_vm5, %v1105_v29, %v4945_v33  ;;  %v1510_v15 = vsel %vm479_vm5, %v1509_v57, %v4960_v21  ;;  %v5035_v28 = vunpack.i.h.bf16 %v9304_v41  ;;  %v9327_v29 = vld [vmem:[#allocation14_spill] sm:$0xff]  ;;  %v9330_v21 = vld [vmem:[#allocation32_spill] sm:$0xff] }
 0x2de   : > { %2392 = vmatpush.msra.mxu0 %v2363_v27  ;;  %v1107_v44 = vsel %vm481_vm6, %v1106_v18, %v5030_v49  ;;  %v1511_v62 = vsel %vm481_vm6, %v1510_v15, %v5050_v5  ;;  %v5055_v42 = vunpack.i.h.bf16 %v9305_v7  ;;  %v4950_v59 = vunpack.i.h.bf16 %v6923_v61 }
 0x2df   : > { %v4965_v4 = vunpack.i.h.bf16 %v6928_v6  ;;  %v5015_v58 = vunpack.i.h.bf16 %v9306_v40  ;;  %v1720_v55 = vsel %vm487_vm9, %v1719_v13, %v4985_v32  ;;  %v4940_v3 = vunpack.i.h.bf16 %v6917_v19 }
 0x2e0   : > { %2393 = vmatpush.msra.mxu0 %v2361_v39  ;;  %v5080_v60 = vunpack.i.h.bf16 %v9308_v10  ;;  %v9319_v47 = vunpack.i.h.bf16 %v6428_v11  ;;  %v9320_v61 = vunpack.i.h.bf16 %v9301_v43  ;;  %v1108_v27 = vsel %vm483_vm7, %v1107_v44, %v4950_v59 }
 0x2e1   : > { %v903_v31 = vsel %vm485_vm8, %v902_v52, %v5015_v58  ;;  %v1512_v40 = vsel %vm483_vm7, %v1511_v62, %v4965_v4  ;;  %v5020_v19 = vunpack.i.h.bf16 %v9309_v46  ;;  %v1109_v48 = vsel %vm485_vm8, %v1108_v27, %v5035_v28  ;;  %v9323_v46 = vld [vmem:[#allocation43_spill] sm:$0xff]  ;;  %v9331_v52 = vld [vmem:[#allocation40_spill] sm:$0xff] }
 0x2e2   : > { %v2300_v36 = vpop.permute.xlu1 %2299  ;;  %2394 = vmatpush.msra.mxu0 %v2359_v8  ;;  %v1300_v7 = vsel %vm487_vm9, %v7158_v63, %v9319_v47  ;;  %v1910_v6 = vsel %vm487_vm9, %v1909_v0, %v9320_v61  ;;  %v1513_v12 = vsel %vm485_vm8, %v1512_v40, %v5055_v42  ;;  %v1721_v11 = vsel %vm489_vm10, %v1720_v55, %v5080_v60  ;;  %v9325_v0 = vld [vmem:[#allocation36_spill] sm:$0xff] }
 0x2e3   : > { %v2327_v54 = vsel %vm481_vm6, %v2326_v37, %v2300_v36  ;;  %v2308_v10 = vpop.permute.xlu0 %2307  ;;  %v4955_v63 = vunpack.i.h.bf16 %v6939_v9  ;;  %v4970_v14 = vunpack.i.h.bf16 %v9321_v34  ;;  %v2353_v26 = vrot.slane %v9322_v2, 4  ;;  %v2316_v38 = vpop.permute.xlu2 %2315 }
 0x2e4   : > { %2395 = vmatpush.msra.mxu0 %v2357_v35  ;;  %v2328_v41 = vsel %vm483_vm7, %v2327_v54, %v2304_v25  ;;  %v9324_v20 = vunpack.i.h.bf16 %v9323_v46  ;;  %v9326_v56 = vunpack.i.h.bf16 %v9325_v0  ;;  %v904_v9 = vsel %vm487_vm9, %v903_v31, %v4940_v3  ;;  %v9328_v25 = vld [vmem:[#allocation45_spill] sm:$0xff]  ;;  %v9333_v46 = vld [vmem:[#allocation10_spill] sm:$0xff] }
 0x2e5   : > { %4645 = vmatmul.msk.f32.vlgmr.msra.gmra.mxu0 %vm2370_vm12, %v7304_v30  ;;  %v2329_v43 = vsel %vm485_vm8, %v2328_v41, %v2308_v10  ;;  %v1514_v57 = vsel %vm487_vm9, %v1513_v12, %v4970_v14  ;;  %v2347_v16 = vrot.slane %v1721_v11, 4  ;;  %v1110_v49 = vsel %vm487_vm9, %v1109_v48, %v4955_v63  ;;  %v9332_v12 = vld [vmem:[#allocation9_spill] sm:$0xff] }
 0x2e6   : > { %v1301_v1 = vsel %vm489_vm10, %v1300_v7, %v9324_v20  ;;  %v689_v24 = vsel %vm485_vm8, %v9327_v29, %v9326_v56  ;;  %v5040_v5 = vunpack.i.h.bf16 %v9310_v50  ;;  %v5060_v45 = vunpack.i.h.bf16 %v9313_v22 }
 0x2e7   : > { %v9329_v17 = vunpack.i.h.bf16 %v9328_v25  ;;  %v905_v33 = vsel %vm489_vm10, %v904_v9, %v5020_v19  ;;  %v4815_v23 = vunpack.i.h.bf16 %v9330_v21  ;;  %v2341_v22 = vrot.slane %v1301_v1, 4 }
 0x2e8   : > { %v1515_v32 = vsel %vm489_vm10, %v1514_v57, %v5060_v45  ;;  %v1111_v37 = vsel %vm489_vm10, %v1110_v49, %v5040_v5  ;;  %v2335_v13 = vrot.slane %v905_v33, 4  ;;  %v4860_v18 = vunpack.i.h.bf16 %v9331_v52 }
 0x2e9   : > { %v1911_v8 = vsel %vm489_vm10, %v1910_v6, %v9329_v17  ;;  %v2362_v50 = vsel %vm2356_vm11, %v1515_v32, %v2347_v16  ;;  %v690_v35 = vsel %vm487_vm9, %v689_v24, %v4815_v23  ;;  %v2360_v15 = vsel %vm2356_vm11, %v1111_v37, %v2341_v22 }
 0x2ea   : > { %v2312_v51 = vpop.permute.xlu1 %2311  ;;  %v2364_v36 = vsel %vm2356_vm11, %v1911_v8, %v2353_v26  ;;  %v691_v54 = vsel %vm489_vm10, %v690_v35, %v4860_v18 }
 0x2eb   : > { %v2330_v39 = vsel %vm487_vm9, %v2329_v43, %v2312_v51  ;;  %v2358_v44 = vsel %vm2356_vm11, %v691_v54, %v2335_v13 }
 0x2ec   : > { %v2331_v53 = vsel %vm489_vm10, %v2330_v39, %v2316_v38 }
 0x2ed   : > { %4646 = vmatpush.msk.msra.mxu1 %vm2356_vm11, %v2331_v53 }
 0x2ef   : > { %2412 = vmatpush.msra.mxu1 %v2364_v36 }
 0x2f1   : > { %2413 = vmatpush.msra.mxu1 %v2362_v50 }
 0x2f3   : > { %2414 = vmatpush.msra.mxu1 %v2360_v15 }
 0x2f5   : > { %2415 = vmatpush.msra.mxu1 %v2358_v44 }
 0x2f6   : > { %4647 = vmatmul.msk.f32.vlgmr.msra.gmra.mxu1 %vm2370_vm12, %v7304_v30 }
 0x33e   : > { %v2368_v28 = vpop.permute.xlu0 %2367 }
 0x362   : > { %v2397_v62 = vpop.f32.mrf.mxu0 }
 0x363   : > { %v2398_v42 = vadd.f32 %v2397_v62, %v2368_v28 }
 0x365   : > { %vm2420_vm13 = vcmp.ge.f32.partialorder %v2398_v42, 0.0  ;;  %v2422_v59 = vmul.f32 0.2, %v2398_v42 }
 0x367   : > { %v2424_v4 = vsel %vm2420_vm13, %v2398_v42, %v2422_v59 }
 0x368   : > { %2439 = vrot.lane.b32.xlu0 %v2424_v4, %s5588_s29  ;;  %2430 = vrot.lane.b32.xlu2 %v2424_v4, %s5590_s16 }
 0x369   : > { %2427 = vrot.lane.b32.xlu1 %v2424_v4, %s5594_s28 }
 0x370   : > { %2436 = vrot.lane.b32.xlu2 %v2424_v4, %s5593_s8 }
 0x371   : > { %2433 = vrot.lane.b32.xlu1 %v2424_v4, %s5591_s17 }
 0x373   : > { %v2417_v58 = vpop.f32.mrf.mxu1 }
 0x374   : > { %v2418_v55 = vadd.f32 %v2417_v58, %v2368_v28 }
 0x376   : > { %vm2421_vm14 = vcmp.ge.f32.partialorder %v2418_v55, 0.0  ;;  %v2423_v30 = vmul.f32 0.2, %v2418_v55 }
 0x378   : > { %v2425_v3 = vsel %vm2421_vm14, %v2418_v55, %v2423_v30  ;;  %2445 = vrot.lane.b32.xlu2 %v2424_v4, %s5592_s26 }
 0x379   : > { %2442 = vrot.lane.b32.xlu1 %v2424_v4, %s5589_s15  ;;  %2449 = vrot.lane.b32.xlu0 %v2425_v3, %s5594_s28 }
 0x380   : > { %2455 = vrot.lane.b32.xlu2 %v2425_v3, %s5591_s17 }
 0x381   : > { %2452 = vrot.lane.b32.xlu1 %v2425_v3, %s5590_s16  ;;  %2458 = vrot.lane.b32.xlu0 %v2425_v3, %s5593_s8 }
 0x388   : > { %2464 = vrot.lane.b32.xlu2 %v2425_v3, %s5589_s15 }
 0x389   : > { %2461 = vrot.lane.b32.xlu1 %v2425_v3, %s5588_s29  ;;  %2467 = vrot.lane.b32.xlu0 %v2425_v3, %s5592_s26 }
 0x3c2   : > { %v2431_v60 = vpop.permute.xlu2 %2430 }
 0x3c3   : > { %v2470_v31 = vrot.slane %v2431_v60, 4 }
 0x3c5   : > { %v2471_v27 = vsel %vm309_vm0, %v2470_v31, %v2424_v4 }
 0x3c6   : > { %v2475_v34 = vperm.slane %v2471_v27, %v9332_v12 }
 0x3c8   : > { %v2496_v58 = vrot.slane %v2475_v34, 4 }
 0x3ca   : > { %v2437_v41 = vpop.permute.xlu2 %2436 }
 0x3d2   : > { %v2446_v7 = vpop.permute.xlu2 %2445 }
 0x3d3   : > { %v2488_v19 = vrot.slane %v2446_v7, 4 }
 0x3da   : > { %v2440_v61 = vpop.permute.xlu0 %2439  ;;  %v2456_v63 = vpop.permute.xlu2 %2455 }
 0x3db   : > { %v2428_v47 = vpop.permute.xlu1 %2427  ;;  %v2489_v48 = vsel %vm309_vm0, %v2488_v19, %v2440_v61  ;;  %v2532_v29 = vrot.slane %v2456_v63, 4 }
 0x3dc   : > { %v2493_v43 = vperm.slane %v2489_v48, %v9332_v12 }
 0x3de   : > { %v2506_v1 = vrot.slane %v2493_v43, 4 }
 0x3e2   : > { %v2465_v24 = vpop.permute.xlu2 %2464 }
 0x3e3   : > { %v2434_v6 = vpop.permute.xlu1 %2433  ;;  %v2538_v17 = vrot.slane %v2465_v24, 4 }
 0x3e4   : > { %v2476_v40 = vrot.slane %v2434_v6, 4 }
 0x3e6   : > { %v2477_v10 = vsel %vm309_vm0, %v2476_v40, %v2428_v47 }
 0x3e7   : > { %v2481_v11 = vperm.slane %v2477_v10, %v9332_v12 }
 0x3e9   : > { %v2494_v14 = vrot.slane %v2481_v11, 4  ;;  %v2497_v47 = vsel %vm309_vm0, %v2481_v11, %v2496_v58 }
 0x3ea   : > { %v2505_v27 = vperm.slane %v2497_v47, %v9333_v46 }
 0x3eb   : > { %v2443_v51 = vpop.permute.xlu1 %2442  ;;  %v2450_v2 = vpop.permute.xlu0 %2449  ;;  %v2495_v26 = vsel %vm309_vm0, %v2494_v14, %v2475_v34 }
 0x3ec   : > { %v2482_v38 = vrot.slane %v2443_v51, 4  ;;  %v2501_v20 = vperm.slane %v2495_v26, %v9333_v46  ;;  %v2533_v49 = vsel %vm309_vm0, %v2532_v29, %v2450_v2  ;;  %v2524_v10 = vrot.slane %v2505_v27, 4 }
 0x3ed   : > { %v2537_v21 = vperm.slane %v2533_v49, %v9332_v12 }
 0x3ee   : > { %v2483_v39 = vsel %vm309_vm0, %v2482_v38, %v2437_v41  ;;  %v2520_v53 = vrot.slane %v2501_v20, 4 }
 0x3ef   : > { %v2487_v0 = vperm.slane %v2483_v39, %v9332_v12  ;;  %v2550_v32 = vrot.slane %v2537_v21, 4 }
 0x3f1   : > { %v2507_v56 = vsel %vm309_vm0, %v2506_v1, %v2487_v0  ;;  %v2508_v28 = vrot.slane %v2487_v0, 4 }
 0x3f2   : > { %v2513_v9 = vperm.slane %v2507_v56, %v9333_v46 }
 0x3f3   : > { %v2453_v57 = vpop.permute.xlu1 %2452  ;;  %v2459_v16 = vpop.permute.xlu0 %2458  ;;  %v2509_v7 = vsel %vm309_vm0, %v2493_v43, %v2508_v28 }
 0x3f4   : > { %v2526_v5 = vrot.slane %v2453_v57, 4  ;;  %v2521_v45 = vsel %vm309_vm0, %v2513_v9, %v2520_v53  ;;  %v2518_v25 = vrot.slane %v2513_v9, 4  ;;  %v2539_v23 = vsel %vm309_vm0, %v2538_v17, %v2459_v16 }
 0x3f5   : > { %2594 = vrot.lane.b32.xlu0 %v2521_v45, %s5585_s13  ;;  %v2543_v37 = vperm.slane %v2539_v23, %v9332_v12  ;;  %v2517_v19 = vperm.slane %v2509_v7, %v9333_v46 }
 0x3f6   : > { %v2527_v8 = vsel %vm309_vm0, %v2526_v5, %v2425_v3  ;;  %v2519_v33 = vsel %vm309_vm0, %v2518_v25, %v2501_v20 }
 0x3f7   : > { %2590 = vrot.lane.b32.xlu1 %v2519_v33, %s5585_s13  ;;  %v2531_v36 = vperm.slane %v2527_v8, %v9332_v12  ;;  %v2564_v15 = vrot.slane %v2543_v37, 4  ;;  %v2522_v11 = vrot.slane %v2517_v19, 4  ;;  %v2525_v48 = vsel %vm309_vm0, %v2517_v19, %v2524_v10 }
 0x3f9   : > { %v2552_v35 = vrot.slane %v2531_v36, 4  ;;  %v2551_v52 = vsel %vm309_vm0, %v2550_v32, %v2531_v36  ;;  %v2523_v63 = vsel %vm309_vm0, %v2522_v11, %v2505_v27 }
 0x3fa   : > { %v2557_v44 = vperm.slane %v2551_v52, %v9333_v46 }
 0x3fb   : > { %v2468_v50 = vpop.permute.xlu0 %2467  ;;  %v2462_v13 = vpop.permute.xlu1 %2461  ;;  %v2553_v42 = vsel %vm309_vm0, %v2537_v21, %v2552_v35 }
 0x3fc   : > { %v2544_v22 = vrot.slane %v2468_v50, 4  ;;  %v2561_v30 = vperm.slane %v2553_v42, %v9333_v46  ;;  %v2576_v41 = vrot.slane %v2557_v44, 4 }
 0x3fe   : > { %v2545_v18 = vsel %vm309_vm0, %v2544_v22, %v2462_v13  ;;  %v2580_v34 = vrot.slane %v2561_v30, 4 }
 0x3ff   : > { %v2549_v54 = vperm.slane %v2545_v18, %v9332_v12 }
 0x401   : > { %v2562_v62 = vrot.slane %v2549_v54, 4  ;;  %v2565_v59 = vsel %vm309_vm0, %v2549_v54, %v2564_v15 }
 0x402   : > { %v2573_v4 = vperm.slane %v2565_v59, %v9333_v46 }
 0x403   : > { %v2563_v55 = vsel %vm309_vm0, %v2562_v62, %v2543_v37 }
 0x404   : > { %v2578_v3 = vrot.slane %v2573_v4, 4  ;;  %v2569_v60 = vperm.slane %v2563_v55, %v9333_v46  ;;  %v2581_v14 = vsel %vm309_vm0, %v2573_v4, %v2580_v34 }
 0x406   : > { %v2579_v31 = vsel %vm309_vm0, %v2578_v3, %v2561_v30  ;;  %v2577_v61 = vsel %vm309_vm0, %v2569_v60, %v2576_v41  ;;  %v2574_v6 = vrot.slane %v2569_v60, 4 }
 0x407   : > { %2600 = vrot.lane.b32.xlu0 %v2579_v31, %s5585_s13  ;;  %2596 = vrot.lane.b32.xlu1 %v2577_v61, %s5585_s13 }
 0x408   : > { %v2575_v40 = vsel %vm309_vm0, %v2574_v6, %v2557_v44 }
 0x409   : > { %2592 = vrot.lane.b32.xlu2 %v2575_v40, %s5585_s13 }
 0x40f   : > { %2602 = vrot.lane.b32.xlu1 %v2525_v48, %s5585_s13 }
 0x411   : > { %2598 = vrot.lane.b32.xlu2 %v2523_v63, %s5585_s13 }
 0x419   : > { %2604 = vrot.lane.b32.xlu2 %v2581_v14, %s5585_s13  ;;  %s5534_s13 = scalar_lea.hbm %s9131_s5, 16 }
 0x463   : > { %v2593_v43 = vpop.permute.xlu2 %2592 }
 0x464   : > { %2615 = vst.msk [vmem:[#allocation2 + $0x9] sm:$0xff] %vm299_vm3, %v2593_v43 }
 0x467   : > { %v2595_v51 = vpop.permute.xlu0 %2594 }
 0x468   : > { %2616 = vst.msk [vmem:[#allocation2 + $0x19] sm:$0xff] %vm299_vm3, %v2595_v51 }
 0x469   : > { %v2591_v2 = vpop.permute.xlu1 %2590 }
 0x46a   : > { %2614 = vst.msk [vmem:[#allocation2 + $0x1] sm:$0xff] %vm299_vm3, %v2591_v2 }
 0x46b   : > { %v2599_v26 = vpop.permute.xlu2 %2598  ;;  %v7509_v58 = vld [vmem:[#allocation2 + $0xa] sm:$0xff] }
 0x46c   : > { %2618 = vst.msk [vmem:[#allocation2 + $0x31] sm:$0xff] %vm299_vm3, %v2599_v26  ;;  %v3908_v7 = vrot.slane %v7509_v58, 4  ;;  %v7528_v6 = vld [vmem:[#allocation2 + $0x9] sm:$0xff] }
 0x46f   : > { %v7460_v25 = vld [vmem:[#allocation2 + $0x18] sm:$0xff] }
 0x470   : > { %v2644_v61 = vrot.slane %v7460_v25, 4  ;;  %v7549_v51 = vld [vmem:[#allocation2 + $0x19] sm:$0xff] }
 0x471   : > { %v7443_v38 = vld [vmem:[#allocation2] sm:$0xff]  ;;  %v7445_v39 = vld [vmem:[#allocation2 + $0x8] sm:$0xff] }
 0x472   : > { %v5102_v20 = vpack.i.bf16 %v7445_v39, %v7443_v38  ;;  %v2632_v1 = vrot.slane %v7443_v38, 4  ;;  %v2688_v53 = vrot.slane %v7445_v39, 4  ;;  %v7480_v22 = vld [vmem:[#allocation2 + $0x2] sm:$0xff] }
 0x473   : > { %v2605_v0 = vpop.permute.xlu2 %2604  ;;  %v2626_v56 = vld [vmem:[#allocation2 + $0x30] sm:$0xff]  ;;  %v3852_v13 = vrot.slane %v7480_v22, 4  ;;  %v7516_v60 = vld [vmem:[#allocation2 + $0x1] sm:$0xff] }
 0x474   : > { %2621 = vst.msk [vmem:[#allocation2 + $0x51] sm:$0xff] %vm299_vm3, %v2605_v0  ;;  %5103 = vrot.lane.b32.xlu1 %v5102_v20, %s5595_s9  ;;  %v2633_v29 = vsel %vm309_vm0, %v2626_v56, %v2632_v1  ;;  %v7506_v59 = vld [vmem:[#allocation2 + $0x31] sm:$0xff]  ;;  %v2630_v30 = vrot.slane %v2626_v56, 4  ;;  %v5142_v48 = vpack.i.bf16 %v7528_v6, %v7516_v60 }
 0x475   : > { %v2641_v11 = vperm.slane %v2633_v29, %v9332_v12 }
 0x476   : > { %v2631_v10 = vsel %vm309_vm0, %v2630_v30, %v7443_v38 }
 0x479   : > { %v2601_v24 = vpop.permute.xlu0 %2600  ;;  %v2597_v9 = vpop.permute.xlu1 %2596 }
 0x47a   : > { %2619 = vst.msk [vmem:[#allocation2 + $0x39] sm:$0xff] %vm299_vm3, %v2601_v24 }
 0x47b   : > { %2617 = vst.msk [vmem:[#allocation2 + $0x21] sm:$0xff] %vm299_vm3, %v2597_v9  ;;  %v7456_v57 = vld [vmem:[#allocation2 + $0x52] sm:$0xff] }
 0x47c   : > { %v3918_v21 = vrot.slane %v7456_v57, 4 }
 0x481   : > { %v2603_v16 = vpop.permute.xlu1 %2602  ;;  %v2627_v49 = vld [vmem:[#allocation2 + $0x38] sm:$0xff] }
 0x482   : > { %2620 = vst.msk [vmem:[#allocation2 + $0x49] sm:$0xff] %vm299_vm3, %v2603_v16  ;;  %v5112_v5 = vpack.i.bf16 %v2627_v49, %v2626_v56  ;;  %v2689_v45 = vsel %vm309_vm0, %v2627_v49, %v2688_v53  ;;  %v7462_v17 = vld [vmem:[#allocation2 + $0x20] sm:$0xff]  ;;  %v7488_v52 = vld [vmem:[#allocation2 + $0x32] sm:$0xff]  ;;  %v2686_v3 = vrot.slane %v2627_v49, 4  ;;  %v2637_v56 = vperm.slane %v2631_v10, %v9332_v12 }
 0x483   : > { %v7464_v8 = vld [vmem:[#allocation2 + $0x22] sm:$0xff]  ;;  %v5107_v33 = vpack.i.bf16 %v7462_v17, %v7460_v25  ;;  %v7490_v18 = vld [vmem:[#allocation2 + $0x3a] sm:$0xff]  ;;  %v3850_v15 = vrot.slane %v7488_v52, 4  ;;  %v7495_v54 = vsel %vm309_vm0, %v7488_v52, %v3852_v13  ;;  %v2697_v14 = vperm.slane %v2689_v45, %v9332_v12  ;;  %v7578_v49 = vld [vmem:[#allocation2 + $0x51] sm:$0xff] }
 0x484   : > { %5113 = vrot.lane.b32.xlu0 %v5112_v5, %s5595_s9  ;;  %v3919_v23 = vsel %vm309_vm0, %v3918_v21, %v7464_v8  ;;  %v3920_v36 = vrot.slane %v7464_v8, 4  ;;  %v7499_v28 = vld [vmem:[#allocation2 + $0x39] sm:$0xff]  ;;  %v3906_v42 = vrot.slane %v7490_v18, 4  ;;  %v7530_v40 = vld [vmem:[#allocation2 + $0x21] sm:$0xff]  ;;  %v3909_v19 = vsel %vm309_vm0, %v7490_v18, %v3908_v7 }
 0x485   : > { %5108 = vrot.lane.b32.xlu2 %v5107_v33, %s5595_s9  ;;  %v7503_v62 = vsel %vm309_vm0, %v3850_v15, %v7480_v22  ;;  %v5152_v55 = vpack.i.bf16 %v7499_v28, %v7506_v59  ;;  %v7518_v41 = vld [vmem:[#allocation2 + $0x1a] sm:$0xff]  ;;  %v7543_v63 = vperm.slane %v3909_v19, %v9332_v12  ;;  %v2687_v34 = vsel %vm309_vm0, %v2686_v3, %v7445_v39 }
 0x486   : > { %v3921_v32 = vsel %vm309_vm0, %v7456_v57, %v3920_v36  ;;  %v3907_v47 = vsel %vm309_vm0, %v3906_v42, %v7509_v58  ;;  %v2700_v43 = vrot.slane %v7462_v17, 4  ;;  %v5162_v38 = vpack.i.bf16 %v7464_v8, %v7456_v57 }
 0x487   : > { %v7533_v27 = vperm.slane %v3907_v47, %v9332_v12  ;;  %v7552_v2 = vperm.slane %v3921_v32, %v9332_v12  ;;  %v3944_v1 = vrot.slane %v7543_v63, 4  ;;  %v2693_v9 = vperm.slane %v2687_v34, %v9332_v12 }
 0x488   : > { %v7571_v53 = vperm.slane %v3919_v23, %v9332_v12  ;;  %v2668_v23 = vrot.slane %v2641_v11, 4  ;;  %v2724_v32 = vrot.slane %v2697_v14, 4 }
 0x489   : > { %v7476_v37 = vld [vmem:[#allocation2 + $0x48] sm:$0xff]  ;;  %v7478_v50 = vld [vmem:[#allocation2 + $0x50] sm:$0xff]  ;;  %v3932_v29 = vrot.slane %v7533_v27, 4  ;;  %v7575_v16 = vsel %vm309_vm0, %v7552_v2, %v3944_v1  ;;  %v2712_v13 = vrot.slane %v2693_v9, 4 }
 0x48a   : > { %v5117_v35 = vpack.i.bf16 %v7478_v50, %v7476_v37  ;;  %v7497_v44 = vld [vmem:[#allocation2 + $0x4a] sm:$0xff]  ;;  %v2698_v26 = vrot.slane %v7478_v50, 4  ;;  %v2701_v39 = vsel %vm309_vm0, %v7478_v50, %v2700_v43  ;;  %v2645_v0 = vsel %vm309_vm0, %v7476_v37, %v2644_v61 }
 0x48b   : > { %v3862_v4 = vrot.slane %v7497_v44, 4  ;;  %v2642_v24 = vrot.slane %v7476_v37, 4  ;;  %v7584_v45 = vsel %vm309_vm0, %v7571_v53, %v3932_v29  ;;  %v2653_v21 = vperm.slane %v2645_v0, %v9332_v12 }
 0x48c   : > { %5123 = vrot.lane.b32.xlu0 %v5102_v20, %s5596_s10  ;;  %5118 = vrot.lane.b32.xlu1 %v5117_v35, %s5595_s9  ;;  %v5147_v20 = vpack.i.bf16 %v7530_v40, %v7549_v51  ;;  %v2709_v36 = vperm.slane %v2701_v39, %v9332_v12  ;;  %v2656_v50 = vrot.slane %v2637_v56, 4 }
 0x48d   : > { %5133 = vrot.lane.b32.xlu2 %v5112_v5, %s5596_s10  ;;  %v7525_v31 = vsel %vm309_vm0, %v3862_v4, %v7518_v41  ;;  %v5167_v5 = vpack.i.bf16 %v7530_v40, %v7578_v49  ;;  %v2643_v37 = vsel %vm309_vm0, %v2642_v24, %v7460_v25  ;;  %v2669_v15 = vsel %vm309_vm0, %v2653_v21, %v2668_v23 }
 0x48e   : > { %v2725_v42 = vsel %vm309_vm0, %v2709_v36, %v2724_v32  ;;  %v2649_v4 = vperm.slane %v2643_v37, %v9332_v12  ;;  %v7601_v3 = vperm.slane %v2669_v15, %v9333_v46  ;;  %v2666_v47 = vrot.slane %v2653_v21, 4 }
 0x48f   : > { %v7604_v25 = vperm.slane %v2725_v42, %v9333_v46  ;;  %v2722_v34 = vrot.slane %v2709_v36, 4  ;;  %v3930_v42 = vrot.slane %v7571_v53, 4  ;;  %v5187_v53 = vpack.i.bf16 %v7480_v22, %v7488_v52 }
 0x490   : > { %v2657_v7 = vsel %vm309_vm0, %v2649_v4, %v2656_v50  ;;  %v2667_v43 = vsel %vm309_vm0, %v2666_v47, %v2641_v11  ;;  %v2654_v24 = vrot.slane %v2649_v4, 4  ;;  %v3861_v4 = vperm.slane %v7495_v54, %v9332_v12 }
 0x491   : > { %v5212_v19 = vpack.i.bf16 %v7604_v25, %v7601_v3  ;;  %v7615_v10 = vperm.slane %v2657_v7, %v9333_v46  ;;  %v2740_v15 = vrot.slane %v7604_v25, 4  ;;  %v3869_v54 = vperm.slane %v7525_v31, %v9332_v12 }
 0x493   : > { %v2680_v29 = vrot.slane %v7615_v10, 4 }
 0x494   : > { %5138 = vrot.lane.b32.xlu0 %v5117_v35, %s5596_s10  ;;  %5128 = vrot.lane.b32.xlu1 %v5107_v33, %s5596_s10  ;;  %v7586_v33 = vld [vmem:[#allocation2 + $0x49] sm:$0xff]  ;;  %v2699_v35 = vsel %vm309_vm0, %v2698_v26, %v7462_v17  ;;  %v5172_v17 = vpack.i.bf16 %v7497_v44, %v7490_v18 }
 0x495   : > { %5153 = vrot.lane.b32.xlu2 %v5152_v55, %s5595_s9  ;;  %v2705_v55 = vperm.slane %v2699_v35, %v9332_v12  ;;  %v5157_v30 = vpack.i.bf16 %v7578_v49, %v7586_v33  ;;  %v7660_v35 = vsel %vm309_vm0, %v2654_v24, %v2637_v56  ;;  %v7676_v56 = vsel %vm309_vm0, 0.0, %v2740_v15 }
 0x497   : > { %v2713_v61 = vsel %vm309_vm0, %v2705_v55, %v2712_v13  ;;  %v2710_v39 = vrot.slane %v2705_v55, 4 }
 0x499   : > { %v7663_v13 = vsel %vm309_vm0, %v2710_v39, %v2693_v9  ;;  %v5182_v9 = vpack.i.bf16 %v7518_v41, %v7509_v58  ;;  %v3874_v39 = vrot.slane %v3869_v54, 4 }
 0x49c   : > { %5143 = vrot.lane.b32.xlu0 %v5142_v48, %s5595_s9  ;;  %5148 = vrot.lane.b32.xlu1 %v5147_v20, %s5595_s9  ;;  %v7618_v48 = vperm.slane %v2713_v61, %v9333_v46  ;;  %v2723_v20 = vsel %vm309_vm0, %v2722_v34, %v2697_v14  ;;  %v7641_v14 = vsel %vm309_vm0, 0.0, %v2680_v29  ;;  %v7695_v61 = vsel %vm309_vm0, %v3930_v42, %v7533_v27 }
 0x49d   : > { %5163 = vrot.lane.b32.xlu2 %v5162_v38, %s5595_s9  ;;  %v7625_v38 = vperm.slane %v2667_v43, %v9333_v46  ;;  %v7629_v1 = vperm.slane %v2723_v20, %v9333_v46  ;;  %9334 = vst [vmem:[#allocation39_spill] sm:$0xff] %v7695_v61  ;;  %v3888_v43 = vrot.slane %v3861_v4, 4  ;;  %v5177_v27 = vpack.i.bf16 %v7586_v33, %v7499_v28 }
 0x49e   : > { %v5202_v26 = vpack.i.bf16 %v7618_v48, %v7615_v10  ;;  %v2736_v21 = vrot.slane %v7618_v48, 4  ;;  %v3310_v29 = vrot.slane %v7530_v40, 4  ;;  %v3296_v42 = vrot.slane %v7499_v28, 4 }
 0x49f   : > { %v2682_v0 = vrot.slane %v7625_v38, 4  ;;  %v5207_v11 = vpack.i.bf16 %v7629_v1, %v7625_v38  ;;  %v7797_v38 = vperm.slane %v7663_v13, %v9333_v46 }
 0x4a0   : > { %v7647_v32 = vsel %vm309_vm0, 0.0, %v2736_v21  ;;  %v3311_v15 = vsel %vm309_vm0, %v7578_v49, %v3310_v29 }
 0x4a1   : > { %v7638_v23 = vsel %vm309_vm0, 0.0, %v2682_v0  ;;  %v5237_v50 = vpack.i.bf16 %v7647_v32, %v7641_v14  ;;  %v3254_v0 = vrot.slane %v7549_v51, 4 }
 0x4a3   : > { %v3255_v21 = vsel %vm309_vm0, %v7586_v33, %v3254_v0 }
 0x4a4   : > { %5158 = vrot.lane.b32.xlu0 %v5157_v30, %s5595_s9  ;;  %5168 = vrot.lane.b32.xlu1 %v5167_v5, %s5596_s10  ;;  %v2738_v5 = vrot.slane %v7629_v1, 4 }
 0x4a5   : > { %5173 = vrot.lane.b32.xlu2 %v5172_v17, %s5595_s9  ;;  %v3942_v17 = vrot.slane %v7552_v2, 4 }
 0x4a6   : > { %v7644_v36 = vsel %vm309_vm0, 0.0, %v2738_v5  ;;  %v3298_v5 = vrot.slane %v7528_v6, 4 }
 0x4a7   : > { %v5242_v37 = vpack.i.bf16 %v7644_v36, %v7638_v23 }
 0x4ac   : > { %4260 = vrot.lane.b32.xlu0 %v7456_v57, %s5596_s10  ;;  %4256 = vrot.lane.b32.xlu1 %v7490_v18, %s5596_s10  ;;  %v3857_v57 = vperm.slane %v7503_v62, %v9332_v12  ;;  %v2684_v18 = vrot.slane %v7601_v3, 4  ;;  %v3864_v62 = vrot.slane %v7518_v41, 4 }
 0x4ad   : > { %4258 = vrot.lane.b32.xlu2 %v7497_v44, %s5596_s10 }
 0x4ae   : > { %v7673_v55 = vsel %vm309_vm0, 0.0, %v2684_v18  ;;  %v3876_v47 = vrot.slane %v3857_v57, 4  ;;  %v3865_v7 = vsel %vm309_vm0, %v7497_v44, %v3864_v62  ;;  %v7723_v24 = vsel %vm309_vm0, %v3874_v39, %v3857_v57 }
 0x4af   : > { %v5247_v30 = vpack.i.bf16 %v7676_v56, %v7673_v55  ;;  %v3873_v31 = vperm.slane %v3865_v7, %v9332_v12  ;;  %9337 = vst [vmem:[#allocation42_spill] sm:$0xff] %v7723_v24  ;;  %v3299_v18 = vsel %vm309_vm0, %v7499_v28, %v3298_v5  ;;  %v3263_v57 = vperm.slane %v3255_v21, %v9332_v12 }
 0x4b0   : > { %v7699_v34 = vsel %vm309_vm0, %v3869_v54, %v3876_v47  ;;  %v3307_v62 = vperm.slane %v3299_v18, %v9332_v12  ;;  %v3252_v54 = vrot.slane %v7586_v33, 4  ;;  %v3308_v7 = vrot.slane %v7578_v49, 4 }
 0x4b1   : > { %v7707_v2 = vsel %vm309_vm0, %v3873_v31, %v3888_v43  ;;  %v3886_v44 = vrot.slane %v3873_v31, 4  ;;  %v3276_v47 = vrot.slane %v3263_v57, 4 }
 0x4b2   : > { %9335 = vst [vmem:[#allocation17_spill] sm:$0xff] %v7707_v2  ;;  %v3253_v43 = vsel %vm309_vm0, %v3252_v54, %v7549_v51  ;;  %v3309_v49 = vsel %vm309_vm0, %v3308_v7, %v7530_v40 }
 0x4b3   : > { %v7710_v20 = vsel %vm309_vm0, %v3886_v44, %v3861_v4  ;;  %v3240_v4 = vrot.slane %v7506_v59, 4  ;;  %v3315_v40 = vperm.slane %v3309_v49, %v9332_v12 }
 0x4b4   : > { %4252 = vrot.lane.b32.xlu0 %v7464_v8, %s5596_s10  ;;  %5183 = vrot.lane.b32.xlu1 %v5182_v9, %s5595_s9  ;;  %v7704_v8 = vsel %vm309_vm0, %v3942_v17, %v7543_v63  ;;  %9336 = vst [vmem:[#allocation34_spill] sm:$0xff] %v7710_v20  ;;  %v3242_v63 = vrot.slane %v7516_v60, 4 }
 0x4b5   : > { %5188 = vrot.lane.b32.xlu2 %v5187_v53, %s5595_s9  ;;  %v3319_v53 = vperm.slane %v3311_v15, %v9332_v12  ;;  %v3241_v28 = vsel %vm309_vm0, %v3240_v4, %v7516_v60  ;;  %v3320_v21 = vrot.slane %v3315_v40, 4 }
 0x4b6   : > { %v3247_v44 = vperm.slane %v3241_v28, %v9332_v12 }
 0x4b7   : > { %v3332_v31 = vrot.slane %v3319_v53, 4 }
 0x4b8   : > { %v3266_v0 = vrot.slane %v3247_v44, 4 }
 0x4b9   : > { %v3333_v10 = vsel %vm309_vm0, %v3332_v31, %v3307_v62 }
 0x4bc   : > { %5178 = vrot.lane.b32.xlu0 %v5177_v27, %s5596_s10  ;;  %4250 = vrot.lane.b32.xlu1 %v7518_v41, %s5596_s10  ;;  %v5197_v41 = vpack.i.bf16 %v7516_v60, %v7506_v59  ;;  %v3259_v27 = vperm.slane %v3253_v43, %v9332_v12 }
 0x4bd   : > { %4254 = vrot.lane.b32.xlu2 %v7488_v52, %s5596_s10  ;;  %v3243_v52 = vsel %vm309_vm0, %v7506_v59, %v3242_v63  ;;  %v3334_v59 = vrot.slane %v3307_v62, 4  ;;  %v3339_v63 = vperm.slane %v3333_v10, %v9333_v46 }
 0x4be   : > { %v3251_v9 = vperm.slane %v3243_v52, %v9332_v12  ;;  %v3264_v3 = vrot.slane %v3259_v27, 4  ;;  %v3267_v5 = vsel %vm309_vm0, %v3259_v27, %v3266_v0 }
 0x4bf   : > { %v3275_v18 = vperm.slane %v3267_v5, %v9333_v46  ;;  %v3348_v49 = vrot.slane %v3339_v63, 4 }
 0x4c0   : > { %v3278_v17 = vrot.slane %v3251_v9, 4  ;;  %v3277_v60 = vsel %vm309_vm0, %v3276_v47, %v3251_v9  ;;  %v3265_v52 = vsel %vm309_vm0, %v3264_v3, %v3247_v44 }
 0x4c1   : > { %v3290_v9 = vrot.slane %v3275_v18, 4 }
 0x4c2   : > { %v3279_v33 = vsel %vm309_vm0, %v3263_v57, %v3278_v17  ;;  %v7793_v57 = vperm.slane %v7660_v35, %v9333_v46 }
 0x4c3   : > { %v3287_v48 = vperm.slane %v3279_v33, %v9333_v46 }
 0x4c4   : > { %4248 = vrot.lane.b32.xlu0 %v7509_v58, %s5596_s10  ;;  %5198 = vrot.lane.b32.xlu1 %v5197_v41, %s5596_s10  ;;  %v3297_v58 = vsel %vm309_vm0, %v3296_v42, %v7528_v6  ;;  %v2678_v62 = vrot.slane %v7793_v57, 4 }
 0x4c5   : > { %4246 = vrot.lane.b32.xlu2 %v7480_v22, %s5596_s10  ;;  %v5192_v22 = vpack.i.bf16 %v7549_v51, %v7528_v6  ;;  %v3303_v6 = vperm.slane %v3297_v58, %v9332_v12  ;;  %v3335_v51 = vsel %vm309_vm0, %v3319_v53, %v3334_v59  ;;  %v2734_v53 = vrot.slane %v7797_v38, 4 }
 0x4c6   : > { %v3343_v39 = vperm.slane %v3335_v51, %v9333_v46  ;;  %v3291_v58 = vsel %vm309_vm0, 0.0, %v3290_v9  ;;  %v2679_v28 = vsel %vm309_vm0, 0.0, %v2678_v62  ;;  %v3349_v51 = vsel %vm309_vm0, 0.0, %v3348_v49 }
 0x4c7   : > { %v3322_v29 = vrot.slane %v3303_v6, 4  ;;  %v3321_v15 = vsel %vm309_vm0, %v3320_v21, %v3303_v6  ;;  %v2735_v17 = vsel %vm309_vm0, 0.0, %v2734_v53 }
 0x4c8   : > { %v5227_v25 = vpack.i.bf16 %v3343_v39, %v3287_v48  ;;  %v7804_v4 = vperm.slane %v3321_v15, %v9333_v46  ;;  %v5232_v14 = vpack.i.bf16 %v2735_v17, %v2679_v28  ;;  %v3350_v7 = vrot.slane %v3343_v39, 4 }
 0x4c9   : > { %v3323_v41 = vsel %vm309_vm0, %v3315_v40, %v3322_v29 }
 0x4ca   : > { %v3331_v1 = vperm.slane %v3323_v41, %v9333_v46  ;;  %v3344_v54 = vrot.slane %v7804_v4, 4  ;;  %v3351_v43 = vsel %vm309_vm0, 0.0, %v3350_v7 }
 0x4cc   : > { %5193 = vrot.lane.b32.xlu0 %v5192_v22, %s5596_s10  ;;  %5203 = vrot.lane.b32.xlu1 %v5202_v26, %s5589_s15  ;;  %v3283_v26 = vperm.slane %v3277_v60, %v9333_v46  ;;  %v5217_v42 = vpack.i.bf16 %v3331_v1, %v3275_v18  ;;  %v3346_v13 = vrot.slane %v3331_v1, 4  ;;  %v3345_v59 = vsel %vm309_vm0, 0.0, %v3344_v54 }
 0x4cd   : > { %5213 = vrot.lane.b32.xlu2 %v5212_v19, %s5590_s16 }
 0x4ce   : > { %v5222_v19 = vpack.i.bf16 %v3339_v63, %v3283_v26  ;;  %v3347_v36 = vsel %vm309_vm0, 0.0, %v3346_v13  ;;  %v3292_v60 = vrot.slane %v3283_v26, 4 }
 0x4d0   : > { %v3293_v44 = vsel %vm309_vm0, 0.0, %v3292_v60 }
 0x4d1   : > { %v5262_v27 = vpack.i.bf16 %v3349_v51, %v3293_v44 }
 0x4d4   : > { %5208 = vrot.lane.b32.xlu0 %v5207_v11, %s5593_s8  ;;  %5228 = vrot.lane.b32.xlu1 %v5227_v25, %s5590_s16  ;;  %v7801_v11 = vperm.slane %v3265_v52, %v9333_v46 }
 0x4d5   : > { %5223 = vrot.lane.b32.xlu2 %v5222_v19, %s5593_s8 }
 0x4d6   : > { %v3288_v35 = vrot.slane %v7801_v11, 4 }
 0x4d8   : > { %v3289_v23 = vsel %vm309_vm0, 0.0, %v3288_v35 }
 0x4d9   : > { %v5252_v32 = vpack.i.bf16 %v3345_v59, %v3289_v23 }
 0x4dc   : > { %5218 = vrot.lane.b32.xlu0 %v5217_v42, %s5589_s15  ;;  %5243 = vrot.lane.b32.xlu1 %v5242_v37, %s5591_s17  ;;  %v5257_v37 = vpack.i.bf16 %v3347_v36, %v3291_v58 }
 0x4dd   : > { %5238 = vrot.lane.b32.xlu2 %v5237_v50, %s5588_s29  ;;  %v3294_v50 = vrot.slane %v3287_v48, 4 }
 0x4df   : > { %v7819_v47 = vpop.permute.xlu2 %5108  ;;  %v3295_v31 = vsel %vm309_vm0, 0.0, %v3294_v50 }
 0x4e0   : > { %v5267_v33 = vpack.i.bf16 %v3351_v43, %v3295_v31  ;;  %v5110_v0 = vunpack.i.l.bf16 %v7819_v47 }
 0x4e2   : > { %v2858_v9 = vrot.slane %v5110_v0, 4 }
 0x4e4   : > { %5258 = vrot.lane.b32.xlu1 %v5257_v37, %s5588_s29  ;;  %5233 = vrot.lane.b32.xlu0 %v5232_v14, %s5592_s26 }
 0x4e5   : > { %5253 = vrot.lane.b32.xlu2 %v5252_v32, %s5592_s26 }
 0x4e6   : > { %v5104_v10 = vpop.permute.xlu1 %5103 }
 0x4e7   : > { %v7830_v22 = vpop.permute.xlu2 %5133  ;;  %v5105_v40 = vunpack.i.l.bf16 %v5104_v10  ;;  %v5106_v39 = vunpack.i.h.bf16 %v5104_v10 }
 0x4e8   : > { %v5136_v1 = vunpack.i.h.bf16 %v7830_v22  ;;  %v5135_v62 = vunpack.i.l.bf16 %v7830_v22 }
 0x4e9   : > { %v2846_v63 = vrot.slane %v5105_v40, 4  ;;  %v2902_v29 = vrot.slane %v5106_v39, 4 }
 0x4ea   : > { %v3106_v23 = vrot.slane %v5136_v1, 4  ;;  %v3050_v14 = vrot.slane %v5135_v62, 4 }
 0x4ec   : > { %5248 = vrot.lane.b32.xlu0 %v5247_v30, %s5594_s28  ;;  %v5111_v30 = vunpack.i.h.bf16 %v7819_v47 }
 0x4ed   : > { %5268 = vrot.lane.b32.xlu2 %v5267_v33, %s5594_s28 }
 0x4ee   : > { %v2914_v15 = vrot.slane %v5111_v30, 4 }
 0x4ef   : > { %v7839_v6 = vpop.permute.xlu2 %5153 }
 0x4f4   : > { %5263 = vrot.lane.b32.xlu0 %v5262_v27, %s5591_s17 }
 0x4f6   : > { %v5114_v48 = vpop.permute.xlu0 %5113 }
 0x4f7   : > { %v7844_v26 = vpop.permute.xlu2 %5163  ;;  %v5115_v55 = vunpack.i.l.bf16 %v5114_v48  ;;  %v5116_v56 = vunpack.i.h.bf16 %v5114_v48 }
 0x4f9   : > { %v2844_v19 = vrot.slane %v5115_v55, 4  ;;  %v2847_v5 = vsel %vm309_vm0, %v5115_v55, %v2846_v63  ;;  %v2900_v52 = vrot.slane %v5116_v56, 4  ;;  %v2903_v18 = vsel %vm309_vm0, %v5116_v56, %v2902_v29 }
 0x4fa   : > { %v2855_v53 = vperm.slane %v2847_v5, %v9332_v12  ;;  %v2911_v13 = vperm.slane %v2903_v18, %v9332_v12 }
 0x4fb   : > { %v2845_v35 = vsel %vm309_vm0, %v2844_v19, %v5105_v40  ;;  %v2901_v58 = vsel %vm309_vm0, %v2900_v52, %v5106_v39 }
 0x4fc   : > { %v7862_v32 = vperm.slane %v2845_v35, %v9332_v12  ;;  %v2882_v50 = vrot.slane %v2855_v53, 4  ;;  %v7866_v43 = vperm.slane %v2901_v58, %v9332_v12  ;;  %v2938_v33 = vrot.slane %v2911_v13, 4 }
 0x4fe   : > { %v5124_v3 = vpop.permute.xlu0 %5123  ;;  %v5119_v25 = vpop.permute.xlu1 %5118  ;;  %v2870_v19 = vrot.slane %v7862_v32, 4  ;;  %v2926_v5 = vrot.slane %v7866_v43, 4 }
 0x4ff   : > { %v7849_v21 = vpop.permute.xlu2 %5173  ;;  %v5121_v41 = vunpack.i.h.bf16 %v5119_v25  ;;  %v5120_v42 = vunpack.i.l.bf16 %v5119_v25  ;;  %v5126_v54 = vunpack.i.h.bf16 %v5124_v3  ;;  %v5125_v28 = vunpack.i.l.bf16 %v5124_v3 }
 0x501   : > { %v2915_v47 = vsel %vm309_vm0, %v5121_v41, %v2914_v15  ;;  %v2912_v17 = vrot.slane %v5121_v41, 4  ;;  %v2856_v37 = vrot.slane %v5120_v42, 4  ;;  %v2859_v59 = vsel %vm309_vm0, %v5120_v42, %v2858_v9 }
 0x502   : > { %v2923_v36 = vperm.slane %v2915_v47, %v9332_v12  ;;  %v2867_v7 = vperm.slane %v2859_v59, %v9332_v12  ;;  %v3108_v60 = vrot.slane %v5126_v54, 4  ;;  %v3052_v51 = vrot.slane %v5125_v28, 4 }
 0x503   : > { %v2913_v27 = vsel %vm309_vm0, %v2912_v17, %v5111_v30  ;;  %v2857_v10 = vsel %vm309_vm0, %v2856_v37, %v5110_v0  ;;  %v3051_v42 = vsel %vm309_vm0, %v3050_v14, %v5125_v28  ;;  %v3107_v9 = vsel %vm309_vm0, %v3106_v23, %v5126_v54 }
 0x504   : > { %v2880_v48 = vrot.slane %v2867_v7, 4  ;;  %v2936_v40 = vrot.slane %v2923_v36, 4  ;;  %v2883_v29 = vsel %vm309_vm0, %v2867_v7, %v2882_v50  ;;  %v2939_v3 = vsel %vm309_vm0, %v2923_v36, %v2938_v33 }
 0x505   : > { %v7878_v30 = vperm.slane %v2913_v27, %v9332_v12  ;;  %v7881_v0 = vperm.slane %v2857_v10, %v9332_v12  ;;  %v7884_v18 = vperm.slane %v2883_v29, %v9333_v46  ;;  %v7887_v15 = vperm.slane %v2939_v3, %v9333_v46 }
 0x506   : > { %v5139_v22 = vpop.permute.xlu0 %5138  ;;  %v5129_v31 = vpop.permute.xlu1 %5128  ;;  %v2881_v25 = vsel %vm309_vm0, %v2880_v48, %v2855_v53  ;;  %v2937_v35 = vsel %vm309_vm0, %v2936_v40, %v2911_v13  ;;  %v3053_v47 = vsel %vm309_vm0, %v5135_v62, %v3052_v51  ;;  %v3109_v58 = vsel %vm309_vm0, %v5136_v1, %v3108_v60 }
 0x507   : > { %v7868_v49 = vpop.permute.xlu2 %4258  ;;  %v5140_v44 = vunpack.i.l.bf16 %v5139_v22  ;;  %v5141_v39 = vunpack.i.h.bf16 %v5139_v22  ;;  %v5131_v55 = vunpack.i.h.bf16 %v5129_v31  ;;  %v5130_v56 = vunpack.i.l.bf16 %v5129_v31 }
 0x508   : > { %v7892_v53 = vperm.slane %v2881_v25, %v9333_v46  ;;  %v5282_v28 = vpack.i.bf16 %v7887_v15, %v7884_v18  ;;  %v7905_v54 = vperm.slane %v2937_v35, %v9333_v46  ;;  %v2871_v13 = vsel %vm309_vm0, %v7881_v0, %v2870_v19 }
 0x509   : > { %v3062_v63 = vrot.slane %v5140_v44, 4  ;;  %v3120_v41 = vrot.slane %v5131_v55, 4  ;;  %v3064_v52 = vrot.slane %v5130_v56, 4  ;;  %v3118_v17 = vrot.slane %v5141_v39, 4 }
 0x50a   : > { %v2927_v62 = vsel %vm309_vm0, %v7878_v30, %v2926_v5  ;;  %v7916_v50 = vperm.slane %v2871_v13, %v9333_v46  ;;  %v7922_v22 = vperm.slane %v3051_v42, %v9332_v12  ;;  %v3061_v31 = vperm.slane %v3053_v47, %v9332_v12  ;;  %5283 = vrot.lane.b32.xlu1 %v5282_v28, %s5590_s16 }
 0x50b   : > { %v3063_v36 = vsel %vm309_vm0, %v3062_v63, %v5130_v56  ;;  %v3121_v23 = vsel %vm309_vm0, %v5141_v39, %v3120_v41  ;;  %v3065_v14 = vsel %vm309_vm0, %v5140_v44, %v3064_v52  ;;  %v7919_v7 = vperm.slane %v2927_v62, %v9333_v46 }
 0x50c   : > { %9338 = vst [vmem:[#allocation33_spill] sm:$0xff] %v7916_v50  ;;  %v7926_v33 = vperm.slane %v3107_v9, %v9332_v12  ;;  %v5277_v60 = vpack.i.bf16 %v7905_v54, %v7892_v53  ;;  %v3117_v44 = vperm.slane %v3109_v58, %v9332_v12  ;;  %v3119_v51 = vsel %vm309_vm0, %v3118_v17, %v5131_v55 }
 0x50d   : > { %9339 = vst [vmem:[#allocation38_spill] sm:$0xff] %v7919_v7  ;;  %v5272_v27 = vpack.i.bf16 %v7919_v7, %v7916_v50  ;;  %v3129_v48 = vperm.slane %v3121_v23, %v9332_v12  ;;  %v7938_v40 = vperm.slane %v3063_v36, %v9332_v12  ;;  %v3073_v39 = vperm.slane %v3065_v14, %v9332_v12 }
 0x50e   : > { %v7898_v37 = vpop.permute.xlu0 %5143  ;;  %v7900_v59 = vpop.permute.xlu1 %5148  ;;  %9340 = vst [vmem:[#allocation37_spill] sm:$0xff] %v7922_v22  ;;  %5278 = vrot.lane.b32.xlu2 %v5277_v60, %s5593_s8  ;;  %v5156_v63 = vunpack.i.h.bf16 %v7839_v6  ;;  %v5155_v55 = vunpack.i.l.bf16 %v7839_v6  ;;  %v3076_v3 = vrot.slane %v7922_v22, 4  ;;  %v7949_v25 = vperm.slane %v3119_v51, %v9332_v12 }
 0x50f   : > { %v7911_v1 = vpop.permute.xlu2 %5188  ;;  %9341 = vst [vmem:[#allocation15_spill] sm:$0xff] %v7926_v33  ;;  %v5146_v10 = vunpack.i.h.bf16 %v7898_v37  ;;  %v5145_v56 = vunpack.i.l.bf16 %v7898_v37  ;;  %5273 = vrot.lane.b32.xlu0 %v5272_v27, %s5589_s15  ;;  %v5151_v29 = vunpack.i.h.bf16 %v7900_v59  ;;  %v3088_v19 = vrot.slane %v3061_v31, 4 }
 0x510   : > { %9342 = vst [vmem:[#allocation22_spill] sm:$0xff] %v7938_v40  ;;  %v3132_v5 = vrot.slane %v7926_v33, 4  ;;  %v3144_v41 = vrot.slane %v3117_v44, 4  ;;  %v3142_v35 = vrot.slane %v3129_v48, 4  ;;  %v3086_v47 = vrot.slane %v3073_v39, 4 }
 0x511   : > { %9343 = vst [vmem:[#allocation21_spill] sm:$0xff] %v7949_v25  ;;  %v3512_v52 = vrot.slane %v5146_v10, 4  ;;  %v3456_v6 = vrot.slane %v5145_v56, 4  ;;  %v3077_v58 = vsel %vm309_vm0, %v7938_v40, %v3076_v3  ;;  %v3510_v36 = vrot.slane %v5156_v63, 4 }
 0x512   : > { %v3454_v37 = vrot.slane %v5155_v55, 4  ;;  %v3524_v28 = vrot.slane %v5151_v29, 4  ;;  %v5150_v13 = vunpack.i.l.bf16 %v7900_v59  ;;  %v7960_v62 = vperm.slane %v3077_v58, %v9333_v46 }
 0x513   : > { %v3133_v23 = vsel %vm309_vm0, %v7949_v25, %v3132_v5  ;;  %v3089_v14 = vsel %vm309_vm0, %v3073_v39, %v3088_v19  ;;  %v3145_v60 = vsel %vm309_vm0, %v3129_v48, %v3144_v41  ;;  %v3513_v51 = vsel %vm309_vm0, %v5156_v63, %v3512_v52 }
 0x514   : > { %v7968_v27 = vperm.slane %v3133_v23, %v9333_v46  ;;  %v7971_v3 = vperm.slane %v3089_v14, %v9333_v46  ;;  %v7974_v59 = vperm.slane %v3145_v60, %v9333_v46  ;;  %v3457_v58 = vsel %vm309_vm0, %v5155_v55, %v3456_v6 }
 0x515   : > { %v3087_v24 = vsel %vm309_vm0, %v3086_v47, %v3061_v31  ;;  %v3143_v5 = vsel %vm309_vm0, %v3142_v35, %v3117_v44  ;;  %v3468_v52 = vrot.slane %v5150_v13, 4  ;;  %v3511_v44 = vsel %vm309_vm0, %v3510_v36, %v5146_v10 }
 0x516   : > { %v5159_v42 = vpop.permute.xlu0 %5158  ;;  %v7952_v9 = vpop.permute.xlu1 %5168  ;;  %9344 = vst [vmem:[#allocation35_spill] sm:$0xff] %v7971_v3  ;;  %v5287_v48 = vpack.i.bf16 %v7968_v27, %v7960_v62  ;;  %v5297_v63 = vpack.i.bf16 %v7974_v59, %v7971_v3  ;;  %v7984_v19 = vperm.slane %v3087_v24, %v9333_v46  ;;  %v7987_v41 = vperm.slane %v3143_v5, %v9333_v46 }
 0x517   : > { %v7956_v17 = vpop.permute.xlu2 %4254  ;;  %9345 = vst [vmem:[#allocation44_spill] sm:$0xff] %v7974_v59  ;;  %v5161_v39 = vunpack.i.h.bf16 %v5159_v42  ;;  %v5160_v55 = vunpack.i.l.bf16 %v5159_v42  ;;  %v3455_v35 = vsel %vm309_vm0, %v3454_v37, %v5145_v56  ;;  %v3465_v14 = vperm.slane %v3457_v58, %v9332_v12 }
 0x518   : > { %5288 = vrot.lane.b32.xlu2 %v5287_v48, %s5589_s15  ;;  %5298 = vrot.lane.b32.xlu0 %v5297_v63, %s5590_s16  ;;  %v5292_v24 = vpack.i.bf16 %v7987_v41, %v7984_v19  ;;  %v5166_v56 = vunpack.i.h.bf16 %v7844_v26  ;;  %v3521_v36 = vperm.slane %v3513_v51, %v9332_v12  ;;  %v5190_v60 = vunpack.i.l.bf16 %v7911_v1 }
 0x519   : > { %v3522_v23 = vrot.slane %v5161_v39, 4  ;;  %v3525_v31 = vsel %vm309_vm0, %v5161_v39, %v3524_v28  ;;  %v3466_v42 = vrot.slane %v5160_v55, 4  ;;  %v3469_v28 = vsel %vm309_vm0, %v5160_v55, %v3468_v52 }
 0x51a   : > { %v3533_v10 = vperm.slane %v3525_v31, %v9332_v12  ;;  %5293 = vrot.lane.b32.xlu1 %v5292_v24, %s5593_s8  ;;  %v3477_v37 = vperm.slane %v3469_v28, %v9332_v12  ;;  %v8009_v5 = vperm.slane %v3455_v35, %v9332_v12  ;;  %v8016_v63 = vperm.slane %v3511_v44, %v9332_v12 }
 0x51b   : > { %v3467_v58 = vsel %vm309_vm0, %v3466_v42, %v5150_v13  ;;  %v3523_v39 = vsel %vm309_vm0, %v3522_v23, %v5151_v29  ;;  %v3492_v51 = vrot.slane %v3465_v14, 4  ;;  %v4134_v24 = vrot.slane %v5166_v56, 4 }
 0x51c   : > { %9346 = vst [vmem:[#allocation41_spill] sm:$0xff] %v8009_v5  ;;  %v3490_v52 = vrot.slane %v3477_v37, 4  ;;  %v8019_v55 = vperm.slane %v3467_v58, %v9332_v12  ;;  %v3546_v31 = vrot.slane %v3533_v10, 4  ;;  %v5165_v28 = vunpack.i.l.bf16 %v7844_v26 }
 0x51d   : > { %9347 = vst [vmem:[#allocation46_spill] sm:$0xff] %v8016_v63  ;;  %v3548_v35 = vrot.slane %v3521_v36, 4  ;;  %v8023_v59 = vperm.slane %v3523_v39, %v9332_v12  ;;  %v4064_v13 = vrot.slane %v5190_v60, 4  ;;  %v3480_v23 = vrot.slane %v8009_v5, 4 }
 0x51e   : > { %v7996_v47 = vpop.permute.xlu0 %4260  ;;  %v7998_v6 = vpop.permute.xlu1 %4256  ;;  %9348 = vst [vmem:[#allocation47_spill] sm:$0xff] %v8019_v55  ;;  %v3493_v44 = vsel %vm309_vm0, %v3477_v37, %v3492_v51  ;;  %v3536_v42 = vrot.slane %v8016_v63, 4  ;;  %v3491_v26 = vsel %vm309_vm0, %v3490_v52, %v3465_v14  ;;  %v3547_v37 = vsel %vm309_vm0, %v3546_v31, %v3521_v36 }
 0x51f   : > { %v8013_v48 = vpop.permute.xlu2 %4246  ;;  %9349 = vst [vmem:[#allocation57_spill] sm:$0xff] %v8023_v59  ;;  %v8030_v58 = vperm.slane %v3493_v44, %v9333_v46  ;;  %v3549_v3 = vsel %vm309_vm0, %v3533_v10, %v3548_v35  ;;  %v8040_v29 = vperm.slane %v3491_v26, %v9333_v46  ;;  %v3481_v51 = vsel %vm309_vm0, %v8019_v55, %v3480_v23 }
 0x520   : > { %v8037_v39 = vperm.slane %v3549_v3, %v9333_v46  ;;  %v5191_v44 = vunpack.i.h.bf16 %v7911_v1  ;;  %v8047_v10 = vperm.slane %v3547_v37, %v9333_v46  ;;  %v8050_v14 = vperm.slane %v3481_v51, %v9333_v46 }
 0x521   : > { %9350 = vst [vmem:[#allocation58_spill] sm:$0xff] %v8030_v58  ;;  %v3537_v3 = vsel %vm309_vm0, %v8023_v59, %v3536_v42  ;;  %v9352_v36 = vunpack.i.h.bf16 %v7849_v21  ;;  %v4132_v51 = vrot.slane %v5165_v28, 4 }
 0x522   : > { %9351 = vst [vmem:[#allocation54_spill] sm:$0xff] %v8037_v39  ;;  %v5312_v52 = vpack.i.bf16 %v8037_v39, %v8030_v58  ;;  %v8057_v35 = vperm.slane %v3537_v3, %v9333_v46  ;;  %v4065_v1 = vsel %vm309_vm0, %v4064_v13, %v5191_v44  ;;  %v5307_v23 = vpack.i.bf16 %v8047_v10, %v8040_v29 }
 0x523   : > { %v4076_v31 = vrot.slane %v9352_v36, 4  ;;  %v4135_v3 = vsel %vm309_vm0, %v5165_v28, %v4134_v24  ;;  %v8076_v36 = vperm.slane %v4065_v1, %v9332_v12  ;;  %v4338_v24 = vrot.slane %v7996_v47, 4 }
 0x524   : > { %5313 = vrot.lane.b32.xlu0 %v5312_v52, %s5590_s16  ;;  %v5302_v42 = vpack.i.bf16 %v8057_v35, %v8050_v14  ;;  %5308 = vrot.lane.b32.xlu1 %v5307_v23, %s5593_s8  ;;  %v4066_v52 = vrot.slane %v5191_v44, 4  ;;  %v5175_v1 = vunpack.i.l.bf16 %v7849_v21 }
 0x525   : > { %9354 = vst [vmem:[#allocation55_spill] sm:$0xff] %v8076_v36  ;;  %v4090_v23 = vrot.slane %v8076_v36, 4 }
 0x526   : > { %v4253_v33 = vpop.permute.xlu0 %4252  ;;  %v8034_v22 = vpop.permute.xlu1 %5183  ;;  %5303 = vrot.lane.b32.xlu2 %v5302_v42, %s5589_s15  ;;  %v8096_v42 = vperm.slane %v7584_v45, %v9333_v46  ;;  %v4120_v5 = vrot.slane %v5175_v1, 4 }
 0x527   : > { %v9182_v26 = vunpack.i.h.bf16 %v8034_v22  ;;  %v8068_v37 = vpop.permute.xlu2 %5213  ;;  %v4339_v44 = vsel %vm309_vm0, %v4338_v24, %v4253_v33  ;;  %v4340_v63 = vrot.slane %v4253_v33, 4  ;;  %v4326_v33 = vrot.slane %v7998_v6, 4 }
 0x528   : > { %9353 = vst [vmem:[#allocation59_spill] sm:$0xff] %v8068_v37  ;;  %v8084_v37 = vperm.slane %v4135_v3, %v9332_v12  ;;  %v8100_v3 = vperm.slane %v7575_v16, %v9333_v46 }
 0x529   : > { %v4077_v13 = vsel %vm309_vm0, %v4076_v31, %v9182_v26  ;;  %v4133_v31 = vsel %vm309_vm0, %v4132_v51, %v5166_v56  ;;  %9356 = vst [vmem:[#allocation50_spill] sm:$0xff] %v8096_v42  ;;  %v4067_v26 = vsel %vm309_vm0, %v5190_v60, %v4066_v52  ;;  %v2896_v56 = vrot.slane %v7892_v53, 4 }
 0x52a   : > { %v8088_v28 = vperm.slane %v4077_v13, %v9332_v12  ;;  %v8105_v13 = vperm.slane %v7699_v34, %v9333_v46  ;;  %v2952_v51 = vrot.slane %v7905_v54, 4  ;;  %v8110_v24 = vperm.slane %v4133_v31, %v9332_v12 }
 0x52b   : > { %v4345_v60 = vperm.slane %v4339_v44, %v9332_v12  ;;  %v5185_v52 = vunpack.i.l.bf16 %v8034_v22  ;;  %v8122_v54 = vperm.slane %v4067_v26, %v9332_v12  ;;  %v5171_v31 = vunpack.i.h.bf16 %v7952_v9 }
 0x52c   : > { %9355 = vst [vmem:[#allocation53_spill] sm:$0xff] %v8088_v28  ;;  %v4091_v16 = vsel %vm309_vm0, %v8088_v28, %v4090_v23  ;;  %v5170_v23 = vunpack.i.l.bf16 %v7952_v9  ;;  %v8137_v26 = vsel %vm309_vm0, 0.0, %v2952_v51  ;;  %v4341_v53 = vsel %vm309_vm0, %v7996_v47, %v4340_v63 }
 0x52d   : > { %9357 = vst [vmem:[#allocation48_spill] sm:$0xff] %v8105_v13  ;;  %v8118_v34 = vperm.slane %v4091_v16, %v9333_v46  ;;  %v8134_v16 = vsel %vm309_vm0, 0.0, %v2896_v56  ;;  %v3100_v9 = vrot.slane %v7960_v62, 4  ;;  %v4350_v25 = vrot.slane %v4345_v60, 4 }
 0x52e   : > { %v8079_v39 = vpop.permute.xlu0 %5178  ;;  %v8081_v58 = vpop.permute.xlu1 %4250  ;;  %v4122_v40 = vrot.slane %v5185_v52, 4  ;;  %v3156_v63 = vrot.slane %v7968_v27, 4  ;;  %v3730_v27 = vrot.slane %v5171_v31, 4  ;;  %v4270_v51 = vrot.slane %v7956_v17, 4 }
 0x52f   : > { %9358 = vst [vmem:[#allocation56_spill] sm:$0xff] %v8118_v34  ;;  %v8126_v45 = vpop.permute.xlu2 %5223  ;;  %v5322_v44 = vpack.i.bf16 %v8118_v34, %v8096_v42  ;;  %v4121_v42 = vsel %vm309_vm0, %v4120_v5, %v5185_v52 }
 0x530   : > { %v8164_v47 = vsel %vm309_vm0, 0.0, %v3156_v63 }
 0x531   : > { %5323 = vrot.lane.b32.xlu0 %v5322_v44, %s5589_s15  ;;  %v8161_v44 = vsel %vm309_vm0, 0.0, %v3100_v9  ;;  %v8179_v9 = vperm.slane %v4121_v42, %v9332_v12 }
 0x532   : > { %9360 = vst [vmem:[#allocation51_spill] sm:$0xff] %v8161_v44 }
 0x533   : > { %v4146_v44 = vrot.slane %v8179_v9, 4 }
 0x536   : > { %v4249_v59 = vpop.permute.xlu0 %4248  ;;  %v8131_v55 = vpop.permute.xlu1 %5198 }
 0x537   : > { %v4327_v7 = vsel %vm309_vm0, %v4326_v33, %v4249_v59  ;;  %v4328_v50 = vrot.slane %v4249_v59, 4  ;;  %v9193_v56 = vunpack.i.l.bf16 %v8131_v55  ;;  %v9194_v5 = vunpack.i.h.bf16 %v8131_v55 }
 0x538   : > { %v4333_v34 = vperm.slane %v4327_v7, %v9332_v12  ;;  %v5180_v7 = vunpack.i.l.bf16 %v8079_v39 }
 0x539   : > { %v3660_v33 = vrot.slane %v9193_v56, 4  ;;  %v4329_v52 = vsel %vm309_vm0, %v7998_v6, %v4328_v50  ;;  %v4123_v50 = vsel %vm309_vm0, %v5175_v1, %v4122_v40  ;;  %v8192_v1 = vpop.permute.xlu2 %5238 }
 0x53a   : > { %v8152_v59 = vsel %vm309_vm0, %v4350_v25, %v4333_v34  ;;  %v4352_v62 = vrot.slane %v4333_v34, 4  ;;  %v8167_v25 = vperm.slane %v4341_v53, %v9332_v12  ;;  %v9362_v53 = vunpack.i.h.bf16 %v8079_v39 }
 0x53b   : > { %9359 = vst [vmem:[#allocation49_spill] sm:$0xff] %v8152_v59  ;;  %v3661_v34 = vsel %vm309_vm0, %v3660_v33, %v9194_v5  ;;  %v3728_v59 = vrot.slane %v5170_v23, 4  ;;  %v8184_v61 = vperm.slane %v4329_v52, %v9332_v12  ;;  %v3716_v40 = vrot.slane %v5180_v7, 4 }
 0x53c   : > { %v4353_v56 = vsel %vm309_vm0, %v4345_v60, %v4352_v62  ;;  %v3672_v63 = vrot.slane %v9362_v53, 4  ;;  %v3731_v52 = vsel %vm309_vm0, %v5170_v23, %v3730_v27  ;;  %v4272_v5 = vrot.slane %v8013_v48, 4 }
 0x53d   : > { %v8176_v6 = vperm.slane %v4353_v56, %v9333_v46  ;;  %v8195_v56 = vperm.slane %v3661_v34, %v9332_v12  ;;  %v4362_v36 = vrot.slane %v8167_v25, 4  ;;  %v4131_v62 = vperm.slane %v4123_v50, %v9332_v12 }
 0x53e   : > { %v8186_v33 = vpop.permute.xlu0 %5193  ;;  %v8188_v60 = vpop.permute.xlu1 %5203  ;;  %v3729_v20 = vsel %vm309_vm0, %v3728_v59, %v5171_v31  ;;  %v4271_v31 = vsel %vm309_vm0, %v4270_v51, %v8013_v48  ;;  %v4284_v59 = vrot.slane %v8081_v58, 4 }
 0x53f   : > { %9361 = vst [vmem:[#allocation52_spill] sm:$0xff] %v8176_v6  ;;  %v9199_v42 = vunpack.i.h.bf16 %v8186_v33  ;;  %v5195_v53 = vunpack.i.l.bf16 %v8186_v33  ;;  %4415 = vrot.lane.b32.xlu2 %v8176_v6, %s5589_s15  ;;  %v4363_v27 = vsel %vm309_vm0, %v4362_v36, %v8184_v61  ;;  %v3686_v50 = vrot.slane %v8195_v56, 4 }
 0x540   : > { %9363 = vst [vmem:[#allocation60_spill] sm:$0xff] %v8195_v56  ;;  %v4273_v36 = vsel %vm309_vm0, %v7956_v17, %v4272_v5  ;;  %v8233_v48 = vperm.slane %v4363_v27, %v9333_v46  ;;  %v4147_v17 = vsel %vm309_vm0, %v8110_v24, %v4146_v44  ;;  %v4282_v5 = vrot.slane %v7868_v49, 4 }
 0x541   : > { %v3673_v34 = vsel %vm309_vm0, %v3672_v63, %v9199_v42  ;;  %v3717_v28 = vsel %vm309_vm0, %v3716_v40, %v5195_v53  ;;  %v3718_v2 = vrot.slane %v5195_v53, 4  ;;  %v8225_v40 = vperm.slane %v3729_v20, %v9332_v12 }
 0x542   : > { %v8212_v6 = vperm.slane %v3673_v34, %v9332_v12  ;;  %v8215_v23 = vperm.slane %v3717_v28, %v9332_v12  ;;  %v3739_v53 = vperm.slane %v3731_v52, %v9332_v12  ;;  %v4158_v34 = vrot.slane %v4131_v62, 4  ;;  %9364 = vst [vmem:[#allocation43_spill] sm:$0xff] %v8233_v48 }
 0x543   : > { %v3719_v63 = vsel %vm309_vm0, %v5180_v7, %v3718_v2  ;;  %v8238_v2 = vperm.slane %v4271_v31, %v9332_v12  ;;  %v4285_v31 = vsel %vm309_vm0, %v7868_v49, %v4284_v59  ;;  %v8271_v59 = vperm.slane %v4147_v17, %v9333_v46 }
 0x544   : > { %v3727_v28 = vperm.slane %v3719_v63, %v9332_v12  ;;  %v3742_v42 = vrot.slane %v8215_v23, 4  ;;  %v3687_v51 = vsel %vm309_vm0, %v8212_v6, %v3686_v50  ;;  %v9368_v50 = vunpack.i.h.bf16 %v8034_v22 }
 0x545   : > { %9365 = vst [vmem:[#allocation36_spill] sm:$0xff] %v8238_v2  ;;  %v8245_v63 = vperm.slane %v3687_v51, %v9333_v46  ;;  %v4159_v27 = vsel %vm309_vm0, %v8084_v37, %v4158_v34  ;;  %v4364_v22 = vrot.slane %v8184_v61, 4  ;;  %v9369_v61 = vunpack.i.h.bf16 %v7849_v21 }
 0x546   : > { %v3754_v20 = vrot.slane %v3727_v28, 4  ;;  %v8240_v7 = vpop.permute.xlu0 %5208  ;;  %v8242_v52 = vpop.permute.xlu1 %5228  ;;  %v4078_v56 = vrot.slane %v9368_v50, 4  ;;  %v3743_v44 = vsel %vm309_vm0, %v8225_v40, %v3742_v42  ;;  %v4283_v17 = vsel %vm309_vm0, %v4282_v5, %v8081_v58 }
 0x547   : > { %9366 = vst [vmem:[#allocation14_spill] sm:$0xff] %v8242_v52  ;;  %4423 = vrot.lane.b32.xlu2 %v8233_v48, %s5593_s8  ;;  %v8258_v52 = vperm.slane %v4273_v36, %v9332_v12  ;;  %v5332_v51 = vpack.i.bf16 %v8105_v13, %v8245_v63  ;;  %v5254_v50 = vpop.permute.xlu2 %5253  ;;  %v8268_v49 = vperm.slane %v3743_v44, %v9333_v46  ;;  %v3752_v48 = vrot.slane %v3739_v53, 4 }
 0x548   : > { %9367 = vst [vmem:[#allocation45_spill] sm:$0xff] %v8245_v63  ;;  %v3755_v36 = vsel %vm309_vm0, %v3739_v53, %v3754_v20  ;;  %v4296_v13 = vrot.slane %v8238_v2, 4  ;;  %v8276_v63 = vperm.slane %v4285_v31, %v9332_v12  ;;  %v4079_v34 = vsel %vm309_vm0, %v9369_v61, %v4078_v56 }
 0x549   : > { %5333 = vrot.lane.b32.xlu0 %v5332_v51, %s5589_s15  ;;  %v8280_v42 = vperm.slane %v3755_v36, %v9333_v46  ;;  %v5317_v53 = vpack.i.bf16 %v8268_v49, %v8271_v59  ;;  %v8290_v20 = vperm.slane %v4159_v27, %v9333_v46  ;;  %v5256_v31 = vunpack.i.h.bf16 %v5254_v50 }
 0x54a   : > { %v5255_v44 = vunpack.i.l.bf16 %v5254_v50  ;;  %v3753_v51 = vsel %vm309_vm0, %v3752_v48, %v3727_v28  ;;  %v9370_v36 = vrot.slane %v8084_v37, 4  ;;  %v4365_v58 = vsel %vm309_vm0, %v8167_v25, %v4364_v22 }
 0x54b   : > { %5318 = vrot.lane.b32.xlu1 %v5317_v53, %s5589_s15  ;;  %v5342_v21 = vpack.i.bf16 %v8280_v42, %v8290_v20  ;;  %v2898_v56 = vrot.slane %v7884_v18, 4  ;;  %v2954_v5 = vrot.slane %v7887_v15, 4  ;;  %v8304_v27 = vperm.slane %v4079_v34, %v9332_v12 }
 0x54c   : > { %v4157_v2 = vsel %vm309_vm0, %v9370_v36, %v4131_v62  ;;  %v8307_v28 = vperm.slane %v4283_v17, %v9332_v12  ;;  %v4306_v37 = vrot.slane %v8276_v63, 4  ;;  %v9371_v62 = vunpack.i.h.bf16 %v8131_v55 }
 0x54d   : > { %v8316_v18 = vperm.slane %v3753_v51, %v9333_v46  ;;  %v8319_v15 = vperm.slane %v4157_v2, %v9333_v46  ;;  %v9372_v22 = vunpack.i.h.bf16 %v8186_v33  ;;  %v3415_v17 = vsel %vm477_vm4, %v7804_v4, %v5256_v31 }
 0x54e   : > { %v3662_v48 = vrot.slane %v9371_v62, 4  ;;  %v5219_v50 = vpop.permute.xlu0 %5218  ;;  %v8312_v61 = vpop.permute.xlu1 %5243  ;;  %v3408_v36 = vsel %vm477_vm4, %v7801_v11, %v5255_v44  ;;  %v8328_v62 = vperm.slane %v4365_v58, %v9333_v46  ;;  %v8336_v2 = vsel %vm309_vm0, 0.0, %v2954_v5 }
 0x54f   : > { %v5221_v53 = vunpack.i.h.bf16 %v5219_v50  ;;  %v5220_v25 = vunpack.i.l.bf16 %v5219_v50  ;;  %5343 = vrot.lane.b32.xlu2 %v5342_v21, %s5590_s16  ;;  %v3674_v34 = vrot.slane %v9372_v22, 4  ;;  %v8333_v50 = vsel %vm309_vm0, 0.0, %v2898_v56 }
 0x550   : > { %9373 = vst [vmem:[#allocation32_spill] sm:$0xff] %v8328_v62  ;;  %v4100_v33 = vrot.slane %v8304_v27, 4  ;;  %v5226_v4 = vunpack.i.h.bf16 %v8126_v45  ;;  %v9374_v31 = vunpack.i.l.bf16 %v8131_v55  ;;  %v4307_v44 = vsel %vm309_vm0, %v4306_v37, %v8258_v52 }
 0x551   : > { %v3409_v21 = vsel %vm479_vm5, %v3408_v36, %v5220_v25  ;;  %v3416_v51 = vsel %vm479_vm5, %v3415_v17, %v5221_v53  ;;  %4431 = vrot.lane.b32.xlu0 %v8328_v62, %s5590_s16  ;;  %v5225_v58 = vunpack.i.l.bf16 %v8126_v45  ;;  %v4297_v56 = vsel %vm309_vm0, %v8307_v28, %v4296_v13 }
 0x552   : > { %v3663_v11 = vsel %vm309_vm0, %v9374_v31, %v3662_v48  ;;  %v5327_v5 = vpack.i.bf16 %v8316_v18, %v8319_v15  ;;  %v5241_v55 = vunpack.i.h.bf16 %v8192_v1  ;;  %v5240_v48 = vunpack.i.l.bf16 %v8192_v1 }
 0x553   : > { %v3102_v25 = vrot.slane %v7984_v19, 4  ;;  %v3158_v22 = vrot.slane %v7987_v41, 4  ;;  %v3671_v37 = vperm.slane %v3663_v11, %v9332_v12  ;;  %v9375_v45 = vunpack.i.h.bf16 %v8079_v39 }
 0x554   : > { %5328 = vrot.lane.b32.xlu1 %v5327_v5, %s5593_s8  ;;  %v8364_v17 = vperm.slane %v4307_v44, %v9333_v46  ;;  %v9376_v36 = vrot.slane %v8122_v54, 4  ;;  %v5206_v19 = vunpack.i.h.bf16 %v8188_v60  ;;  %v5205_v41 = vunpack.i.l.bf16 %v8188_v60 }
 0x555   : > { %v3675_v13 = vsel %vm309_vm0, %v9375_v45, %v3674_v34  ;;  %v8373_v39 = vsel %vm309_vm0, 0.0, %v3102_v25  ;;  %v8376_v34 = vsel %vm309_vm0, 0.0, %v3158_v22  ;;  %v3506_v25 = vrot.slane %v8040_v29, 4 }
 0x556   : > { %v4103_v1 = vsel %vm309_vm0, %v8304_v27, %v9376_v36  ;;  %v5234_v31 = vpop.permute.xlu0 %5233  ;;  %v5259_v11 = vpop.permute.xlu1 %5258  ;;  %v3683_v27 = vperm.slane %v3675_v13, %v9332_v12  ;;  %v5392_v60 = vpack.i.bf16 %v8376_v34, %v8373_v39  ;;  %v9398_v34 = vld [vmem:[#allocation44_spill] sm:$0xff] }
 0x557   : > { %v5236_v5 = vunpack.i.h.bf16 %v5234_v31  ;;  %v5235_v44 = vunpack.i.l.bf16 %v5234_v31  ;;  %v5261_v45 = vunpack.i.h.bf16 %v5259_v11  ;;  %v5260_v53 = vunpack.i.l.bf16 %v5259_v11  ;;  %4395 = vrot.lane.b32.xlu2 %v8364_v17, %s5593_s8 }
 0x558   : > { %v8382_v36 = vperm.slane %v4103_v1, %v9333_v46  ;;  %v9377_v1 = vpack.i.bf16 %v8137_v26, %v8134_v16  ;;  %v4101_v16 = vsel %vm309_vm0, %v4100_v33, %v8122_v54  ;;  %v9378_v33 = vrot.slane %v7878_v30, 4 }
 0x559   : > { %v2805_v22 = vsel %vm477_vm4, %v7797_v38, %v5236_v5  ;;  %v2798_v31 = vsel %vm477_vm4, %v7793_v57, %v5235_v44  ;;  %v3417_v11 = vsel %vm481_vm6, %v3416_v51, %v5261_v45  ;;  %v3410_v62 = vsel %vm481_vm6, %v3409_v21, %v5260_v53 }
 0x55a   : > { %v2799_v12 = vsel %vm479_vm5, %v2798_v31, %v5205_v41  ;;  %v2806_v13 = vsel %vm479_vm5, %v2805_v22, %v5206_v19  ;;  %5373 = vrot.lane.b32.xlu0 %v9377_v1, %s5591_s17  ;;  %v3411_v29 = vsel %vm483_vm7, %v3410_v62, %v5225_v58  ;;  %v3418_v38 = vsel %vm483_vm7, %v3417_v11, %v5226_v4  ;;  %v9381_v22 = vld [vmem:[#allocation17_spill] sm:$0xff] }
 0x55b   : > { %v2868_v5 = vrot.slane %v7881_v0, 4  ;;  %v8403_v57 = vsel %vm481_vm6, %v2799_v12, %v5240_v48  ;;  %v8406_v21 = vsel %vm481_vm6, %v2806_v13, %v5241_v55  ;;  %v8409_v51 = vperm.slane %v4297_v56, %v9333_v46  ;;  %v9382_v1 = vld [vmem:[#allocation53_spill] sm:$0xff] }
 0x55c   : > { %v3698_v53 = vrot.slane %v3671_v37, 4  ;;  %v5352_v26 = vpack.i.bf16 %v8382_v36, %v8100_v3  ;;  %v3562_v0 = vrot.slane %v8047_v10, 4  ;;  %v8422_v58 = vsel %vm309_vm0, 0.0, %v3506_v25 }
 0x55d   : > { %4387 = vrot.lane.b32.xlu1 %v8409_v51, %s5589_s15  ;;  %v8426_v56 = vperm.slane %v4101_v16, %v9333_v46  ;;  %v2869_v54 = vsel %vm309_vm0, %v2868_v5, %v7862_v32  ;;  %v2925_v10 = vsel %vm309_vm0, %v9378_v33, %v7866_v43  ;;  %v3740_v55 = vrot.slane %v8225_v40, 4 }
 0x55e   : > { %v8418_v62 = vpop.permute.xlu0 %5248  ;;  %v3699_v4 = vsel %vm309_vm0, %v3683_v27, %v3698_v53  ;;  %v3696_v48 = vrot.slane %v3683_v27, 4  ;;  %v8437_v19 = vperm.slane %v7704_v8, %v9333_v46  ;;  %v8440_v41 = vsel %vm309_vm0, 0.0, %v3562_v0  ;;  %v9379_v8 = vld [vmem:[#allocation51_spill] sm:$0xff] }
 0x55f   : > { %5353 = vrot.lane.b32.xlu2 %v5352_v26, %s5590_s16  ;;  %v8443_v44 = vperm.slane %v3699_v4, %v9333_v46  ;;  %v3504_v32 = vrot.slane %v8050_v14, 4  ;;  %v3560_v45 = vrot.slane %v8057_v35, 4  ;;  %v5412_v43 = vpack.i.bf16 %v8440_v41, %v8422_v58 }
 0x560   : > { %v4144_v30 = vrot.slane %v8110_v24, 4  ;;  %v3741_v40 = vsel %vm309_vm0, %v3740_v55, %v8215_v23  ;;  %v9380_v27 = vpack.i.bf16 %v8164_v47, %v9379_v8  ;;  %v8457_v25 = vperm.slane %v2869_v54, %v9333_v46  ;;  %v9383_v55 = vld [vmem:[#allocation34_spill] sm:$0xff] }
 0x561   : > { %v8460_v14 = vperm.slane %v2925_v10, %v9333_v46  ;;  %v5337_v35 = vpack.i.bf16 %v8426_v56, %v8437_v19  ;;  %v8466_v24 = vperm.slane %v9381_v22, %v9333_v46  ;;  %v3697_v31 = vsel %vm309_vm0, %v3696_v48, %v3671_v37 }
 0x562   : > { %5388 = vrot.lane.b32.xlu0 %v9380_v27, %s5588_s29  ;;  %v4145_v23 = vsel %vm309_vm0, %v4144_v30, %v8179_v9  ;;  %v3505_v11 = vsel %vm309_vm0, 0.0, %v3504_v32  ;;  %v3561_v12 = vsel %vm309_vm0, 0.0, %v3560_v45  ;;  %v8477_v13 = vperm.slane %v3741_v40, %v9333_v46  ;;  %v9384_v40 = vld [vmem:[#allocation55_spill] sm:$0xff] }
 0x563   : > { %v5357_v47 = vpack.i.bf16 %v8466_v24, %v8443_v44  ;;  %v4088_v5 = vrot.slane %v9382_v1, 4  ;;  %v2892_v16 = vrot.slane %v8457_v25, 4  ;;  %v2948_v9 = vrot.slane %v8460_v14, 4 }
 0x564   : > { %v3703_v0 = vperm.slane %v3697_v31, %v9333_v46  ;;  %v8485_v4 = vperm.slane %v4145_v23, %v9333_v46  ;;  %v5407_v54 = vpack.i.bf16 %v3561_v12, %v3505_v11  ;;  %v3893_v48 = vperm.slane %v9383_v55, %v9333_v46  ;;  %v9385_v31 = vld [vmem:[#allocation39_spill] sm:$0xff]  ;;  %v9386_v12 = vld [vmem:[#allocation22_spill] sm:$0xff]  ;;  %v9388_v55 = vld [vmem:[#allocation33_spill] sm:$0xff] }
 0x565   : > { %5338 = vrot.lane.b32.xlu1 %v5337_v35, %s5593_s8  ;;  %v3764_v32 = vrot.slane %v8477_v13, 4  ;;  %v2893_v45 = vsel %vm309_vm0, 0.0, %v2892_v16  ;;  %v2949_v30 = vsel %vm309_vm0, 0.0, %v2948_v9  ;;  %v4089_v8 = vsel %vm309_vm0, %v4088_v5, %v9384_v40  ;;  %v9387_v9 = vld [vmem:[#allocation21_spill] sm:$0xff] }
 0x566   : > { %v5264_v53 = vpop.permute.xlu0 %5263  ;;  %v5347_v27 = vpack.i.bf16 %v3893_v48, %v3703_v0  ;;  %v8505_v22 = vperm.slane %v4089_v8, %v9333_v46  ;;  %v4308_v23 = vrot.slane %v8258_v52, 4  ;;  %v3074_v1 = vrot.slane %v9386_v12, 4  ;;  %v9391_v8 = vld [vmem:[#allocation60_spill] sm:$0xff] }
 0x567   : > { %v5266_v37 = vunpack.i.h.bf16 %v5264_v53  ;;  %v5265_v26 = vunpack.i.l.bf16 %v5264_v53  ;;  %5358 = vrot.lane.b32.xlu2 %v5357_v47, %s5590_s16  ;;  %v3765_v35 = vsel %vm309_vm0, 0.0, %v3764_v32  ;;  %v8510_v47 = vperm.slane %v9385_v31, %v9333_v46  ;;  %v8540_v31 = vpop.permute.xlu2 %5268 }
 0x568   : > { %v3684_v5 = vrot.slane %v8212_v6, 4  ;;  %v4309_v16 = vsel %vm309_vm0, %v8276_v63, %v4308_v23  ;;  %v4112_v52 = vrot.slane %v8505_v22, 4  ;;  %v2894_v32 = vrot.slane %v9388_v55, 4  ;;  %v9390_v6 = vld [vmem:[#allocation37_spill] sm:$0xff] }
 0x569   : > { %v8488_v33 = vsel %vm485_vm8, %v3411_v29, %v5265_v26  ;;  %v8491_v10 = vsel %vm485_vm8, %v3418_v38, %v5266_v37  ;;  %v4168_v29 = vrot.slane %v8485_v4, 4  ;;  %v5362_v38 = vpack.i.bf16 %v2949_v30, %v2893_v45  ;;  %v9389_v45 = vld [vmem:[#allocation38_spill] sm:$0xff] }
 0x56a   : > { %5408 = vrot.lane.b32.xlu0 %v5407_v54, %s5588_s29  ;;  %v3130_v37 = vrot.slane %v9387_v9, 4  ;;  %v3954_v26 = vrot.slane %v8510_v47, 4  ;;  %v8523_v54 = vperm.slane %v4309_v16, %v9333_v46  ;;  %v2950_v30 = vrot.slane %v9389_v45, 4 }
 0x56b   : > { %v4169_v11 = vsel %vm309_vm0, 0.0, %v4168_v29  ;;  %v3075_v40 = vsel %vm309_vm0, %v3074_v1, %v9390_v6  ;;  %v8531_v63 = vsel %vm309_vm0, %v3684_v5, %v9391_v8  ;;  %v9392_v29 = vld [vmem:[#allocation15_spill] sm:$0xff]  ;;  %v2895_v12 = vsel %vm309_vm0, 0.0, %v2894_v32 }
 0x56c   : > { %v5417_v53 = vpack.i.bf16 %v3765_v35, %v4169_v11  ;;  %v4170_v35 = vrot.slane %v8271_v59, 4  ;;  %v3955_v23 = vsel %vm309_vm0, 0.0, %v3954_v26  ;;  %v9393_v11 = vpack.i.bf16 %v8336_v2, %v8333_v50 }
 0x56d   : > { %5348 = vrot.lane.b32.xlu1 %v5347_v27, %s5593_s8  ;;  %v4113_v27 = vsel %vm309_vm0, 0.0, %v4112_v52  ;;  %v8548_v1 = vperm.slane %v3075_v40, %v9333_v46  ;;  %v3766_v5 = vrot.slane %v8268_v49, 4  ;;  %v2951_v59 = vsel %vm309_vm0, 0.0, %v2950_v30 }
 0x56e   : > { %v5422_v16 = vpack.i.bf16 %v4113_v27, %v3955_v23  ;;  %v8560_v50 = vsel %vm309_vm0, 0.0, %v4170_v35  ;;  %v3712_v2 = vrot.slane %v3703_v0, 4  ;;  %v5367_v26 = vpack.i.bf16 %v2951_v59, %v2895_v12  ;;  %v9395_v35 = vld [vmem:[#allocation47_spill] sm:$0xff] }
 0x56f   : > { %5363 = vrot.lane.b32.xlu2 %v5362_v38, %s5592_s26  ;;  %v3131_v38 = vsel %vm309_vm0, %v3130_v37, %v9392_v29  ;;  %v4174_v37 = vrot.slane %v8290_v20, 4  ;;  %v8557_v52 = vsel %vm309_vm0, 0.0, %v3766_v5  ;;  %v3098_v55 = vrot.slane %v8548_v1, 4  ;;  %v8586_v27 = vpop.permute.xlu2 %5278 }
 0x570   : > { %v8553_v9 = vperm.slane %v3131_v38, %v9333_v46  ;;  %v5427_v49 = vpack.i.bf16 %v8557_v52, %v8560_v50  ;;  %v8572_v45 = vsel %vm309_vm0, 0.0, %v3712_v2  ;;  %v3478_v23 = vrot.slane %v9395_v35, 4 }
 0x571   : > { %v8578_v6 = vsel %vm309_vm0, 0.0, %v4174_v37  ;;  %v3099_v29 = vsel %vm309_vm0, 0.0, %v3098_v55  ;;  %v4172_v59 = vrot.slane %v8319_v15, 4  ;;  %v9397_v37 = vld [vmem:[#allocation35_spill] sm:$0xff]  ;;  %v9400_v55 = vld [vmem:[#allocation46_spill] sm:$0xff]  ;;  %v9402_v15 = vld [vmem:[#allocation49_spill] sm:$0xff]  ;;  %v5210_v35 = vunpack.i.l.bf16 %v8240_v7 }
 0x572   : > { %5418 = vrot.lane.b32.xlu0 %v5417_v53, %s5592_s26  ;;  %v3902_v53 = vrot.slane %v3893_v48, 4  ;;  %v3770_v48 = vrot.slane %v8280_v42, 4  ;;  %v3154_v20 = vrot.slane %v8553_v9, 4  ;;  %v9394_v42 = vld [vmem:[#allocation52_spill] sm:$0xff]  ;;  %v3104_v39 = vrot.slane %v9397_v37, 4 }
 0x573   : > { %v4376_v0 = vrot.slane %v9394_v42, 4  ;;  %v5245_v58 = vunpack.i.l.bf16 %v8312_v61  ;;  %v5251_v41 = vunpack.i.h.bf16 %v8418_v62 }
 0x574   : > { %v8568_v32 = vsel %vm309_vm0, 0.0, %v3902_v53  ;;  %v8575_v30 = vsel %vm309_vm0, 0.0, %v3770_v48  ;;  %v3155_v38 = vsel %vm309_vm0, 0.0, %v3154_v20  ;;  %v3768_v53 = vrot.slane %v8316_v18, 4  ;;  %v9399_v48 = vld [vmem:[#allocation41_spill] sm:$0xff]  ;;  %v9401_v18 = vld [vmem:[#allocation59_spill] sm:$0xff] }
 0x575   : > { %4403 = vrot.lane.b32.xlu1 %v8523_v54, %s5590_s16  ;;  %v5462_v40 = vpack.i.bf16 %v8568_v32, %v8572_v45  ;;  %v5457_v8 = vpack.i.bf16 %v8575_v30, %v8578_v6  ;;  %v4377_v5 = vsel %vm309_vm0, 0.0, %v4376_v0  ;;  %v5216_v42 = vunpack.i.h.bf16 %v9401_v18  ;;  %v501_v45 = vld [vmem:[%s9130_s4] sm:$0xf]  ;;  %s4643_s16 = sshll.u32 %s5714_s12, 3 }
 0x576   : > { %v3769_v2 = vsel %vm309_vm0, 0.0, %v3768_v53  ;;  %v4294_v0 = vrot.slane %v8307_v28, 4 }
 0x577   : > { %5378 = vrot.lane.b32.xlu2 %v9393_v11, %s5594_s28  ;;  %v9396_v11 = vld [vmem:[#allocation57_spill] sm:$0xff] }
 0x578   : > { %v3534_v12 = vrot.slane %v9396_v11, 4  ;;  %v3105_v11 = vsel %vm309_vm0, 0.0, %v3104_v39 }
 0x57a   : > { %5423 = vrot.lane.b32.xlu0 %v5422_v16, %s5592_s26  ;;  %v5382_v16 = vpack.i.bf16 %v3155_v38, %v3099_v29  ;;  %v3535_v20 = vsel %vm309_vm0, %v3534_v12, %v9400_v55  ;;  %v8612_v29 = vperm.slane %v9402_v15, %v9333_v46  ;;  %v5211_v38 = vunpack.i.h.bf16 %v8240_v7 }
 0x57b   : > { %v8627_v53 = vperm.slane %v3535_v20, %v9333_v46  ;;  %v5215_v7 = vunpack.i.l.bf16 %v9401_v18 }
 0x57c   : > { %v4374_v37 = vrot.slane %v8612_v29, 4  ;;  %v2808_v39 = vsel %vm483_vm7, %v8406_v21, %v5211_v38 }
 0x57d   : > { %5368 = vrot.lane.b32.xlu1 %v5367_v26, %s5588_s29  ;;  %v3479_v26 = vsel %vm309_vm0, %v3478_v23, %v9399_v48  ;;  %v4173_v23 = vsel %vm309_vm0, 0.0, %v4172_v59  ;;  %v5250_v59 = vunpack.i.l.bf16 %v8418_v62  ;;  %v3558_v55 = vrot.slane %v8627_v53, 4 }
 0x57e   : > { %v5442_v12 = vpack.i.bf16 %v3769_v2, %v4173_v23  ;;  %v9403_v2 = vld [vmem:[#allocation36_spill] sm:$0xff]  ;;  %v4375_v21 = vsel %vm309_vm0, 0.0, %v4374_v37 }
 0x57f   : > { %5393 = vrot.lane.b32.xlu2 %v5392_v60, %s5591_s17  ;;  %v3160_v60 = vrot.slane %v9398_v34, 4  ;;  %v2801_v34 = vsel %vm483_vm7, %v8403_v57, %v5210_v35  ;;  %v4320_v57 = vrot.slane %v8409_v51, 4  ;;  %v3559_v35 = vsel %vm309_vm0, 0.0, %v3558_v55 }
 0x581   : > { %v3161_v28 = vsel %vm309_vm0, 0.0, %v3160_v60  ;;  %v4321_v51 = vsel %vm309_vm0, 0.0, %v4320_v57 }
 0x582   : > { %4419 = vrot.lane.b32.xlu0 %v4377_v5, %s5588_s29  ;;  %v8624_v5 = vperm.slane %v3479_v26, %v9333_v46  ;;  %v5397_v60 = vpack.i.bf16 %v3161_v28, %v3105_v11  ;;  %v2802_v26 = vsel %vm485_vm8, %v2801_v34, %v5245_v58  ;;  %v4116_v11 = vrot.slane %v8426_v56, 4  ;;  %v9404_v58 = vld [vmem:[#allocation14_spill] sm:$0xff] }
 0x583   : > { %v2803_v18 = vsel %vm487_vm9, %v2802_v26, %v5215_v7  ;;  %v3958_v7 = vrot.slane %v8437_v19, 4  ;;  %v5271_v56 = vunpack.i.h.bf16 %v8540_v31  ;;  %v9407_v26 = vld [vmem:[#allocation58_spill] sm:$0xff] }
 0x584   : > { %v3502_v62 = vrot.slane %v8624_v5, 4  ;;  %v8661_v38 = vsel %vm489_vm10, %v2803_v18, %v5250_v59  ;;  %v5230_v59 = vunpack.i.l.bf16 %v9404_v58 }
 0x585   : > { %5383 = vrot.lane.b32.xlu1 %v5382_v16, %s5592_s26  ;;  %v5246_v16 = vunpack.i.h.bf16 %v8312_v61  ;;  %v4295_v61 = vsel %vm309_vm0, %v4294_v0, %v9403_v2  ;;  %v3959_v19 = vsel %vm309_vm0, 0.0, %v3958_v7  ;;  %v9406_v2 = vld [vmem:[#allocation50_spill] sm:$0xff] }
 0x586   : > { %v8654_v0 = vperm.slane %v4295_v61, %v9333_v46  ;;  %v3956_v61 = vrot.slane %v9406_v2, 4 }
 0x587   : > { %5413 = vrot.lane.b32.xlu2 %v5412_v43, %s5591_s17  ;;  %v8633_v43 = vpop.permute.xlu2 %5288  ;;  %v2809_v48 = vsel %vm485_vm8, %v2808_v39, %v5246_v16  ;;  %v4117_v16 = vsel %vm309_vm0, 0.0, %v4116_v11  ;;  %v9405_v39 = vld [vmem:[#allocation56_spill] sm:$0xff]  ;;  %v9408_v11 = vld [vmem:[#allocation45_spill] sm:$0xff] }
 0x588   : > { %v2810_v20 = vsel %vm487_vm9, %v2809_v48, %v5216_v42  ;;  %v3503_v42 = vsel %vm309_vm0, 0.0, %v3502_v62  ;;  %v4114_v34 = vrot.slane %v9405_v39, 4  ;;  %v5452_v48 = vpack.i.bf16 %v4117_v16, %v3959_v19 }
 0x589   : > { %v8658_v15 = vsel %vm489_vm10, %v2810_v20, %v5251_v41  ;;  %v5402_v28 = vpack.i.bf16 %v3559_v35, %v3503_v42  ;;  %v5231_v41 = vunpack.i.h.bf16 %v9404_v58  ;;  %v3508_v62 = vrot.slane %v9407_v26, 4 }
 0x58a   : > { %5443 = vrot.lane.b32.xlu0 %v5442_v12, %s5591_s17  ;;  %v4318_v12 = vrot.slane %v8654_v0, 4  ;;  %v3413_v20 = vsel %vm487_vm9, %v8488_v33, %v5230_v59  ;;  %v4115_v42 = vsel %vm309_vm0, 0.0, %v4114_v34  ;;  %v8709_v16 = vperm.slane %v8531_v63, %v9333_v46 }
 0x58b   : > { %v3420_v55 = vsel %vm487_vm9, %v8491_v10, %v5231_v41  ;;  %v3509_v35 = vsel %vm309_vm0, 0.0, %v3508_v62  ;;  %v3957_v10 = vsel %vm309_vm0, 0.0, %v3956_v61  ;;  %v4118_v59 = vrot.slane %v8382_v36, 4 }
 0x58c   : > { %v4319_v37 = vsel %vm309_vm0, 0.0, %v4318_v12  ;;  %v8691_v57 = vsel %vm489_vm10, %v3420_v55, %v5271_v56  ;;  %v5437_v33 = vpack.i.bf16 %v4115_v42, %v3957_v10  ;;  %v3710_v12 = vrot.slane %v9408_v11, 4 }
 0x58d   : > { %5398 = vrot.lane.b32.xlu1 %v5397_v60, %s5594_s28  ;;  %v5270_v60 = vunpack.i.l.bf16 %v8540_v31  ;;  %v3960_v34 = vrot.slane %v8100_v3, 4  ;;  %v4119_v19 = vsel %vm309_vm0, 0.0, %v4118_v59  ;;  %v4324_v62 = vrot.slane %v8523_v54, 4 }
 0x58f   : > { %4411 = vrot.lane.b32.xlu2 %v4375_v21, %s5592_s26  ;;  %v8665_v23 = vpop.permute.xlu2 %5303  ;;  %v8694_v31 = vsel %vm489_vm10, %v3413_v20, %v5270_v60  ;;  %v8696_v21 = vpop.permute.xlu0 %5273  ;;  %v3708_v60 = vrot.slane %v8709_v16, 4  ;;  %v3961_v3 = vsel %vm309_vm0, 0.0, %v3960_v34  ;;  %v9411_v20 = vld [vmem:[#allocation43_spill] sm:$0xff]  ;;  %v4325_v10 = vsel %vm309_vm0, 0.0, %v4324_v62  ;;  %v9414_v34 = vld [vmem:[#allocation54_spill] sm:$0xff] }
 0x590   : > { %v5467_v61 = vpack.i.bf16 %v4119_v19, %v3961_v3  ;;  %v4378_v42 = vrot.slane %v9411_v20, 4  ;;  %v5276_v62 = vunpack.i.h.bf16 %v8696_v21 }
 0x592   : > { %4391 = vrot.lane.b32.xlu0 %v4321_v51, %s5588_s29  ;;  %v4322_v51 = vrot.slane %v8364_v17, 4  ;;  %v3711_v17 = vsel %vm309_vm0, 0.0, %v3710_v12  ;;  %v4379_v54 = vsel %vm309_vm0, 0.0, %v4378_v42 }
 0x594   : > { %v4323_v41 = vsel %vm309_vm0, 0.0, %v4322_v51 }
 0x595   : > { %5403 = vrot.lane.b32.xlu1 %v5402_v28, %s5592_s26  ;;  %v9409_v28 = vld [vmem:[#allocation48_spill] sm:$0xff] }
 0x596   : > { %v3900_v7 = vrot.slane %v9409_v28, 4  ;;  %v9412_v28 = vld [vmem:[#allocation32_spill] sm:$0xff] }
 0x597   : > { %4383 = vrot.lane.b32.xlu2 %v4319_v37, %s5592_s26  ;;  %v9410_v37 = vld [vmem:[#allocation42_spill] sm:$0xff]  ;;  %v8722_v56 = vpop.permute.xlu0 %5298 }
 0x598   : > { %v8719_v39 = vperm.slane %v9410_v37, %v9333_v46  ;;  %v3901_v63 = vsel %vm309_vm0, 0.0, %v3900_v7  ;;  %v8732_v46 = vpop.permute.xlu1 %5283  ;;  %v4380_v7 = vrot.slane %v9412_v28, 4  ;;  %v3714_v37 = vrot.slane %v8443_v44, 4 }
 0x599   : > { %v8688_v18 = vpop.permute.xlu2 %4415  ;;  %v5447_v36 = vpack.i.bf16 %v3901_v63, %v3711_v17  ;;  %v3564_v63 = vrot.slane %v9414_v34, 4  ;;  %v5275_v44 = vunpack.i.l.bf16 %v8696_v21 }
 0x59a   : > { %5453 = vrot.lane.b32.xlu0 %v5452_v48, %s5591_s17  ;;  %v3898_v2 = vrot.slane %v8719_v39, 4  ;;  %v3709_v48 = vsel %vm309_vm0, 0.0, %v3708_v60  ;;  %v4381_v17 = vsel %vm309_vm0, 0.0, %v4380_v7  ;;  %v3715_v30 = vsel %vm309_vm0, 0.0, %v3714_v37 }
 0x59c   : > { %v3899_v52 = vsel %vm309_vm0, 0.0, %v3898_v2 }
 0x59d   : > { %3591 = vrot.lane.b32.xlu1 %v3509_v35, %s5594_s28  ;;  %v5432_v50 = vpack.i.bf16 %v3899_v52, %v3709_v48 }
 0x59f   : > { %5438 = vrot.lane.b32.xlu2 %v5437_v33, %s5588_s29  ;;  %v3904_v33 = vrot.slane %v8466_v24, 4 }
 0x5a0   : > { %v8745_v55 = vpop.permute.xlu1 %5293 }
 0x5a1   : > { %v8711_v58 = vpop.permute.xlu2 %4423  ;;  %v3905_v11 = vsel %vm309_vm0, 0.0, %v3904_v33 }
 0x5a2   : > { %4399 = vrot.lane.b32.xlu0 %v4323_v41, %s5591_s17 }
 0x5a5   : > { %5428 = vrot.lane.b32.xlu1 %v5427_v49, %s5588_s29  ;;  %v8741_v49 = vpop.permute.xlu0 %5313 }
 0x5a7   : > { %5448 = vrot.lane.b32.xlu2 %v5447_v36, %s5588_s29  ;;  %v3565_v36 = vsel %vm309_vm0, 0.0, %v3564_v63 }
 0x5a8   : > { %v8762_v32 = vpop.permute.xlu1 %5308  ;;  %v5472_v19 = vpack.i.bf16 %v3715_v30, %v3565_v36 }
 0x5a9   : > { %v8737_v26 = vpop.permute.xlu2 %5343 }
 0x5aa   : > { %5468 = vrot.lane.b32.xlu0 %v5467_v61, %s5594_s28 }
 0x5ad   : > { %5433 = vrot.lane.b32.xlu1 %v5432_v50, %s5592_s26  ;;  %v8757_v51 = vpop.permute.xlu0 %5323 }
 0x5ae   : > { %v5325_v37 = vunpack.i.l.bf16 %v8757_v51 }
 0x5af   : > { %5463 = vrot.lane.b32.xlu2 %v5462_v40, %s5591_s17 }
 0x5b1   : > { %v8752_v35 = vpop.permute.xlu2 %4395 }
 0x5b2   : > { %4407 = vrot.lane.b32.xlu0 %v4325_v10, %s5594_s28 }
 0x5b5   : > { %4427 = vrot.lane.b32.xlu1 %v4379_v54, %s5591_s17  ;;  %s4658_s17 = sshll.u32 %s5649_s22, 3  ;;  %s244_s22 = scalar_lea.vmem [#allocation6], %s4643_s16 }
 0x5b6   : > { %s4562_s9 = sshll.u32 %s244_s22, 4  ;;  %s4563_s9 = int_to_ptr.vmem [resolvable:$true] %s4562_s9 }
 0x5b7   : > { %3987 = vrot.lane.b32.xlu2 %v3905_v11, %s5594_s28 }
 0x5b9   : > { %v8768_v40 = vpop.permute.xlu2 %5353 }
 0x5ba   : > { %4486 = vperm.xlu0 %5101, %v501_v45  }
 0x5bb   : > { %v8770_v24 = vpop.permute.xlu0 %5333 }
 0x5bd   : > { %5458 = vrot.lane.b32.xlu1 %v5457_v8, %s5594_s28  ;;  %v5319_v12 = vpop.permute.xlu1 %5318 }
 0x5c1   : > { %v8777_v41 = vpop.permute.xlu2 %5358 }
 0x5c3   : > { %v8779_v59 = vpop.permute.xlu0 %4431 }
 0x5c4   : > { %9413 = vst [vmem:[#allocation40_spill] sm:$0xff] %v8779_v59 }
 0x5c5   : > { %4435 = vrot.lane.b32.xlu1 %v4381_v17, %s5594_s28 }
 0x5c6   : > { %v8785_v60 = vpop.permute.xlu1 %5328 }
 0x5c9   : > { %v5364_v6 = vpop.permute.xlu2 %5363 }
 0x5ca   : > { %v5365_v8 = vunpack.i.l.bf16 %v5364_v6  ;;  %v5366_v2 = vunpack.i.h.bf16 %v5364_v6 }
 0x5cc   : > { %v8789_v3 = vpop.permute.xlu0 %5373  ;;  %v3012_v61 = vsel %vm477_vm4, %v8457_v25, %v5365_v8  ;;  %v3019_v52 = vsel %vm477_vm4, %v8460_v14, %v5366_v2  ;;  %v5281_v2 = vunpack.i.h.bf16 %v8586_v27 }
 0x5cd   : > { %5473 = vrot.lane.b32.xlu1 %v5472_v19, %s5594_s28  ;;  %v3013_v50 = vsel %vm479_vm5, %v3012_v61, %v5275_v44  ;;  %v3020_v42 = vsel %vm479_vm5, %v3019_v52, %v5276_v62  ;;  %v5280_v61 = vunpack.i.l.bf16 %v8586_v27  ;;  %s4560_s28 = scalar_lea.hbm %s9131_s5, %s4658_s17 }
 0x5ce   : > { %s4564_s10 = sshll.u32 %s4560_s28, 4  ;;  %s4565_s10 = int_to_ptr.hbm [resolvable:$true] %s4564_s10 }
 0x5cf   : > { %v8795_v48 = vpop.permute.xlu1 %4387  ;;  %s5528_s11 = sshra.s32 %s4565_s10, 4  ;;  %s5529_s11 = int_to_ptr.hbm [resolvable:$true] %s5528_s11 }
 0x5d0   : > { %s5530_s14 = scalar_lea.hbm %s5529_s11, 8  ;;  %p5535_p0 = scmp.lt.s32.totalorder %s5529_s11, %s9131_s5 }
 0x5d1   : > { %v8801_v20 = vpop.permute.xlu2 %5378  ;;  %p5531_p6 = scmp.ne.s32.totalorder %s5529_s11, %s5530_s14  ;;  %p5536_p1 = scmp.lt.s32.totalorder %s5534_s13, %s5530_s14 }
 0x5d3   : > { %p5532_p9 = pnand %p5531_p6, %p5678_p11  ;;  %p5537_p3 = por %p5536_p1, %p5535_p0 }
 0x5d4   : > { %v5389_v10 = vpop.permute.xlu0 %5388 }
 0x5d5   : > { %p5533_p13 = pneg %p5532_p9 }
 0x5d7   : > { %v5339_v33 = vpop.permute.xlu1 %5338  ;;  %p5538_p4 = pnand %p5537_p3, %p5533_p13 }
 0x5d9   : > { %v8804_v25 = vpop.permute.xlu2 %5393 }
 0x5dc   : > { %v8806_v54 = vpop.permute.xlu0 %5408 }
 0x5df   : > { %v8808_v11 = vpop.permute.xlu1 %5348 }
 0x5e1   : > { %v8810_v45 = vpop.permute.xlu2 %5413 }
 0x5e4   : > { %v5419_v28 = vpop.permute.xlu0 %5418 }
 0x5e5   : > { %v5421_v34 = vunpack.i.h.bf16 %v5419_v28  ;;  %v5420_v63 = vunpack.i.l.bf16 %v5419_v28 }
 0x5e7   : > { %v8812_v14 = vpop.permute.xlu1 %4403  ;;  %v3835_v52 = vsel %vm477_vm4, %v8477_v13, %v5421_v34  ;;  %v4239_v62 = vsel %vm477_vm4, %v8485_v4, %v5420_v63 }
 0x5e9   : > { %v8814_v7 = vpop.permute.xlu2 %4411 }
 0x5ec   : > { %v5424_v21 = vpop.permute.xlu0 %5423 }
 0x5ed   : > { %v5425_v17 = vunpack.i.l.bf16 %v5424_v21  ;;  %v5426_v27 = vunpack.i.h.bf16 %v5424_v21  ;;  %v5326_v21 = vunpack.i.h.bf16 %v8757_v51 }
 0x5ef   : > { %v4025_v30 = vsel %vm477_vm4, %v8510_v47, %v5425_v17  ;;  %v5369_v6 = vpop.permute.xlu1 %5368  ;;  %v5321_v17 = vunpack.i.h.bf16 %v5319_v12  ;;  %v4232_v34 = vsel %vm477_vm4, %v8505_v22, %v5426_v27 }
 0x5f0   : > { %v5371_v8 = vunpack.i.h.bf16 %v5369_v6  ;;  %v5370_v36 = vunpack.i.l.bf16 %v5369_v6  ;;  %v4026_v19 = vsel %vm479_vm5, %v4025_v30, %v5325_v37  ;;  %v5320_v6 = vunpack.i.l.bf16 %v5319_v12 }
 0x5f1   : > { %v8822_v44 = vpop.permute.xlu2 %4383  ;;  %v8839_v13 = vsel %vm479_vm5, %v3835_v52, %v5321_v17  ;;  %v5290_v12 = vunpack.i.l.bf16 %v8633_v43  ;;  %v4233_v27 = vsel %vm479_vm5, %v4232_v34, %v5326_v21 }
 0x5f2   : > { %v3014_v28 = vsel %vm481_vm6, %v3013_v50, %v5370_v36  ;;  %v3021_v47 = vsel %vm481_vm6, %v3020_v42, %v5371_v8  ;;  %v8842_v4 = vsel %vm479_vm5, %v4239_v62, %v5320_v6  ;;  %v5291_v50 = vunpack.i.h.bf16 %v8633_v43 }
 0x5f3   : > { %v8831_v37 = vsel %vm483_vm7, %v3014_v28, %v5280_v61  ;;  %v8834_v30 = vsel %vm483_vm7, %v3021_v47, %v5281_v2  ;;  %v5391_v36 = vunpack.i.h.bf16 %v5389_v10  ;;  %v5390_v2 = vunpack.i.l.bf16 %v5389_v10 }
 0x5f4   : > { %v8836_v59 = vpop.permute.xlu0 %4419  ;;  %v5341_v61 = vunpack.i.h.bf16 %v5339_v33  ;;  %v5340_v43 = vunpack.i.l.bf16 %v5339_v33 }
 0x5f7   : > { %v5384_v42 = vpop.permute.xlu1 %5383 }
 0x5f8   : > { %v5386_v63 = vunpack.i.h.bf16 %v5384_v42  ;;  %v5385_v8 = vunpack.i.l.bf16 %v5384_v42 }
 0x5f9   : > { %v5439_v52 = vpop.permute.xlu2 %5438 }
 0x5fa   : > { %v3225_v62 = vsel %vm477_vm4, %v8553_v9, %v5386_v63  ;;  %v3218_v28 = vsel %vm477_vm4, %v8548_v1, %v5385_v8  ;;  %v5441_v47 = vunpack.i.h.bf16 %v5439_v52  ;;  %v5440_v17 = vunpack.i.l.bf16 %v5439_v52 }
 0x5fb   : > { %v3226_v6 = vsel %vm479_vm5, %v3225_v62, %v5291_v50  ;;  %v3219_v22 = vsel %vm479_vm5, %v3218_v28, %v5290_v12  ;;  %v5411_v52 = vunpack.i.h.bf16 %v8806_v54  ;;  %v5310_v28 = vunpack.i.l.bf16 %v8762_v32 }
 0x5fc   : > { %v8857_v51 = vsel %vm481_vm6, %v3226_v6, %v5391_v36  ;;  %v8860_v10 = vsel %vm481_vm6, %v3219_v22, %v5390_v2  ;;  %v4234_v9 = vsel %vm481_vm6, %v4233_v27, %v5441_v47  ;;  %v4027_v42 = vsel %vm481_vm6, %v4026_v19, %v5440_v17  ;;  %v8864_v1 = vpop.permute.xlu0 %5443 }
 0x5fd   : > { %v4028_v33 = vsel %vm483_vm7, %v4027_v42, %v5340_v43  ;;  %v4235_v50 = vsel %vm483_vm7, %v4234_v9, %v5341_v61  ;;  %v5306_v36 = vunpack.i.h.bf16 %v8665_v23  ;;  %v5305_v2 = vunpack.i.l.bf16 %v8665_v23 }
 0x5fe   : > { %v5410_v19 = vunpack.i.l.bf16 %v8806_v54  ;;  %v5415_v43 = vunpack.i.l.bf16 %v8810_v45  ;;  %v5315_v22 = vunpack.i.l.bf16 %v8741_v49 }
 0x5ff   : > { %v8868_v63 = vpop.permute.xlu1 %5398 }
 0x604   : > { %v4392_v12 = vpop.permute.xlu0 %4391 }
 0x607   : > { %v5404_v34 = vpop.permute.xlu1 %5403 }
 0x608   : > { %v5406_v8 = vunpack.i.h.bf16 %v5404_v34  ;;  %v5405_v21 = vunpack.i.l.bf16 %v5404_v34 }
 0x60a   : > { %v3629_v62 = vsel %vm477_vm4, %v8627_v53, %v5406_v8  ;;  %v3622_v61 = vsel %vm477_vm4, %v8624_v5, %v5405_v21  ;;  %v5356_v5 = vunpack.i.h.bf16 %v8768_v40 }
 0x60b   : > { %v3630_v47 = vsel %vm479_vm5, %v3629_v62, %v5306_v36  ;;  %v3623_v17 = vsel %vm479_vm5, %v3622_v61, %v5305_v2  ;;  %v8897_v36 = vpop.permute.xlu2 %5448 }
 0x60c   : > { %v8883_v23 = vsel %vm481_vm6, %v3630_v47, %v5411_v52  ;;  %v5454_v6 = vpop.permute.xlu0 %5453  ;;  %v3624_v54 = vsel %vm481_vm6, %v3623_v17, %v5410_v19  ;;  %v5286_v52 = vunpack.i.h.bf16 %v8732_v46  ;;  %v5316_v17 = vunpack.i.h.bf16 %v8741_v49 }
 0x60d   : > { %v5456_v53 = vunpack.i.h.bf16 %v5454_v6  ;;  %v3625_v27 = vsel %vm483_vm7, %v3624_v54, %v5310_v28  ;;  %v5455_v2 = vunpack.i.l.bf16 %v5454_v6  ;;  %v5346_v54 = vunpack.i.h.bf16 %v8737_v26 }
 0x60e   : > { %v3626_v9 = vsel %vm485_vm8, %v3625_v27, %v5415_v43  ;;  %v5311_v43 = vunpack.i.h.bf16 %v8762_v32  ;;  %v4438_v27 = vsel %vm477_vm4, %v8654_v0, %v8822_v44  ;;  %v5331_v6 = vunpack.i.h.bf16 %v8785_v60 }
 0x60f   : > { %v4236_v42 = vsel %vm485_vm8, %v4235_v50, %v5456_v53  ;;  %v8891_v34 = vpop.permute.xlu1 %3591  ;;  %v8894_v8 = vsel %vm487_vm9, %v3626_v9, %v5315_v22  ;;  %v5345_v22 = vunpack.i.l.bf16 %v8737_v26  ;;  %v5355_v53 = vunpack.i.l.bf16 %v8768_v40 }
 0x610   : > { %v4237_v21 = vsel %vm487_vm9, %v4236_v42, %v5356_v5  ;;  %v4029_v5 = vsel %vm485_vm8, %v4028_v33, %v5455_v2  ;;  %v5336_v9 = vunpack.i.h.bf16 %v8770_v24  ;;  %v5335_v42 = vunpack.i.l.bf16 %v8770_v24 }
 0x611   : > { %v5330_v26 = vunpack.i.l.bf16 %v8785_v60  ;;  %v5376_v28 = vunpack.i.h.bf16 %v8789_v3  ;;  %v5375_v0 = vunpack.i.l.bf16 %v8789_v3  ;;  %v4439_v44 = vsel %vm479_vm5, %v4438_v27, %v8795_v48 }
 0x612   : > { %v8926_v24 = vsel %vm487_vm9, %v4029_v5, %v5355_v53  ;;  %v5445_v33 = vunpack.i.l.bf16 %v8864_v1  ;;  %v4440_v2 = vsel %vm481_vm6, %v4439_v44, %v4392_v12  ;;  %v5396_v3 = vunpack.i.h.bf16 %v8804_v25 }
 0x613   : > { %v5395_v53 = vunpack.i.l.bf16 %v8804_v25  ;;  %v5351_v27 = vunpack.i.h.bf16 %v8808_v11  ;;  %v5350_v12 = vunpack.i.l.bf16 %v8808_v11  ;;  %v5464_v5 = vpop.permute.xlu2 %5463  ;;  %v5446_v25 = vunpack.i.h.bf16 %v8864_v1 }
 0x614   : > { %v4400_v47 = vpop.permute.xlu0 %4399  ;;  %v5400_v11 = vunpack.i.l.bf16 %v8868_v63  ;;  %v3023_v1 = vsel %vm485_vm8, %v8834_v30, %v5376_v28 }
 0x617   : > { %v5429_v61 = vpop.permute.xlu1 %5428 }
 0x618   : > { %v5431_v40 = vunpack.i.h.bf16 %v5429_v61  ;;  %v5430_v62 = vunpack.i.l.bf16 %v5429_v61  ;;  %v5381_v61 = vunpack.i.h.bf16 %v8801_v20 }
 0x61a   : > { %v3837_v19 = vsel %vm481_vm6, %v8839_v13, %v5431_v40  ;;  %v4241_v60 = vsel %vm481_vm6, %v8842_v4, %v5430_v62  ;;  %v5416_v4 = vunpack.i.h.bf16 %v8810_v45  ;;  %v4441_v62 = vsel %vm483_vm7, %v4440_v2, %v8752_v35 }
 0x61b   : > { %v3838_v32 = vsel %vm483_vm7, %v3837_v19, %v5331_v6  ;;  %v4242_v48 = vsel %vm483_vm7, %v4241_v60, %v5330_v26  ;;  %v5401_v26 = vunpack.i.h.bf16 %v8868_v63  ;;  %v4442_v40 = vsel %vm485_vm8, %v4441_v62, %v4400_v47 }
 0x61c   : > { %v8941_v44 = vpop.permute.xlu0 %5468  ;;  %v4243_v13 = vsel %vm485_vm8, %v4242_v48, %v5445_v33  ;;  %v5451_v33 = vunpack.i.h.bf16 %v8897_v36  ;;  %v5450_v45 = vunpack.i.l.bf16 %v8897_v36  ;;  %v5466_v60 = vunpack.i.h.bf16 %v5464_v5 }
 0x61d   : > { %v5471_v19 = vunpack.i.h.bf16 %v8941_v44  ;;  %v8949_v6 = vsel %vm487_vm9, %v4243_v13, %v5345_v22  ;;  %v5465_v2 = vunpack.i.l.bf16 %v5464_v5  ;;  %v4443_v13 = vsel %vm487_vm9, %v4442_v40, %v8812_v14 }
 0x61e   : > { %v3024_v47 = vsel %vm487_vm9, %v3023_v1, %v5286_v52  ;;  %v3016_v62 = vsel %vm485_vm8, %v8831_v37, %v5375_v0  ;;  %v3632_v5 = vsel %vm483_vm7, %v8883_v23, %v5311_v43  ;;  %v3839_v30 = vsel %vm485_vm8, %v3838_v32, %v5446_v25 }
 0x61f   : > { %v5434_v48 = vpop.permute.xlu1 %5433  ;;  %v4238_v35 = vsel %vm489_vm10, %v4237_v21, %v5471_v19  ;;  %v3633_v52 = vsel %vm485_vm8, %v3632_v5, %v5416_v4  ;;  %v3840_v19 = vsel %vm487_vm9, %v3839_v30, %v5346_v54  ;;  %v3025_v23 = vsel %vm489_vm10, %v3024_v47, %v5381_v61 }
 0x620   : > { %v5436_v50 = vunpack.i.h.bf16 %v5434_v48  ;;  %v5435_v22 = vunpack.i.l.bf16 %v5434_v48  ;;  %v4472_v63 = vrot.slane %v4238_v35, 4  ;;  %v4455_v32 = vrot.slane %v3025_v23, 4 }
 0x621   : > { %v9415_v4 = vunpack.i.h.bf16 %v8745_v55  ;;  %v9420_v35 = vunpack.i.l.bf16 %v8722_v56 }
 0x622   : > { %v4018_v36 = vsel %vm477_vm4, %v8719_v39, %v5436_v50  ;;  %v3828_v21 = vsel %vm477_vm4, %v8709_v16, %v5435_v22  ;;  %v3634_v16 = vsel %vm487_vm9, %v3633_v52, %v5316_v17  ;;  %v9416_v17 = vunpack.i.l.bf16 %v8745_v55  ;;  %v9423_v52 = vld [vmem:[#allocation40_spill] sm:$0xff] }
 0x623   : > { %v4019_v28 = vsel %vm479_vm5, %v4018_v36, %v5336_v9  ;;  %v3829_v14 = vsel %vm479_vm5, %v3828_v21, %v5335_v42  ;;  %v3228_v49 = vsel %vm483_vm7, %v8857_v51, %v9415_v4  ;;  %v9419_v55 = vunpack.i.h.bf16 %v8722_v56  ;;  %v9427_v4 = vld [vmem:[#allocation11_spill] sm:$0xff] }
 0x624   : > { %v3830_v37 = vsel %vm481_vm6, %v3829_v14, %v5450_v45  ;;  %v4020_v39 = vsel %vm481_vm6, %v4019_v28, %v5451_v33  ;;  %v4408_v50 = vpop.permute.xlu0 %4407  ;;  %v3221_v61 = vsel %vm483_vm7, %v8860_v10, %v9416_v17  ;;  %v9418_v33 = vunpack.i.l.bf16 %v8777_v41  ;;  %v9428_v17 = vld [vmem:[#allocation27_spill] sm:$0xff] }
 0x625   : > { %v4444_v43 = vsel %vm489_vm10, %v4443_v13, %v4408_v50  ;;  %v4021_v9 = vsel %vm483_vm7, %v4020_v39, %v5351_v27  ;;  %v3831_v42 = vsel %vm483_vm7, %v3830_v37, %v5350_v12  ;;  %v3988_v27 = vpop.permute.xlu2 %3987  ;;  %v9417_v12 = vunpack.i.h.bf16 %v8777_v41 }
 0x626   : > { %4648 = vmatpush.msk.msra.mxu2 %vm2356_vm11, %v4444_v43  ;;  %v4022_v54 = vsel %vm485_vm8, %v4021_v9, %v5466_v60  ;;  %v3832_v0 = vsel %vm485_vm8, %v3831_v42, %v5465_v2  ;;  %v3229_v60 = vsel %vm485_vm8, %v3228_v49, %v5396_v3  ;;  %v3222_v48 = vsel %vm485_vm8, %v3221_v61, %v5395_v53 }
 0x627   : > { %v4428_v25 = vpop.permute.xlu1 %4427  ;;  %v4023_v40 = vsel %vm487_vm9, %v4022_v54, %v9417_v12  ;;  %v3833_v45 = vsel %vm487_vm9, %v3832_v0, %v9418_v33  ;;  %v3230_v10 = vsel %vm487_vm9, %v3229_v60, %v9419_v55  ;;  %v3223_v2 = vsel %vm487_vm9, %v3222_v48, %v9420_v35  ;;  %v9426_v0 = vld [vmem:[#allocation13_spill] sm:$0xff]  ;;  %v9430_v12 = vld [vmem:[#allocation23_spill] sm:$0xff]  ;;  %v9432_v60 = vld [vmem:[#allocation30_spill] sm:$0xff] }
 0x628   : > { %v4024_v51 = vsel %vm489_vm10, %v4023_v40, %v3988_v27  ;;  %v4460_v22 = vrot.slane %v8694_v31, 4  ;;  %v5380_v41 = vunpack.i.l.bf16 %v8801_v20  ;;  %v3231_v3 = vsel %vm489_vm10, %v3230_v10, %v5401_v26  ;;  %v9429_v27 = vld [vmem:[#allocation20_spill] sm:$0xff]  ;;  %v9431_v33 = vld [vmem:[#allocation19_spill] sm:$0xff]  ;;  %v9434_v10 = vld [vmem:[#allocation29_spill] sm:$0xff] }
 0x629   : > { %v4482_v1 = vsel %vm2356_vm11, %v4024_v51, %v4472_v63  ;;  %v3224_v53 = vsel %vm489_vm10, %v3223_v2, %v5400_v11  ;;  %v9421_v13 = vrot.slane %v8691_v57, 4  ;;  %v4477_v56 = vsel %vm2356_vm11, %v8658_v15, %v4455_v32  ;;  %v9433_v51 = vld [vmem:[#allocation16_spill] sm:$0xff]  ;;  %v9435_v2 = vld [vmem:[#allocation25_spill] sm:$0xff] }
 0x62a   : > { %4510 = vmatpush.msra.mxu2 %v4482_v1  ;;  %v4478_v36 = vsel %vm2356_vm11, %v3224_v53, %v4460_v22  ;;  %v9422_v31 = vunpack.i.l.bf16 %v8732_v46  ;;  %v4445_v26 = vsel %vm477_vm4, %v8612_v29, %v8814_v7  ;;  %v5470_v46 = vunpack.i.l.bf16 %v8941_v44 }
 0x62b   : > { %v4479_v47 = vsel %vm2356_vm11, %v3231_v3, %v9421_v13  ;;  %v4446_v21 = vsel %vm479_vm5, %v4445_v26, %v8688_v18  ;;  %v3628_v32 = vsel %vm489_vm10, %v8894_v8, %v8891_v34  ;;  %v9425_v34 = vld [vmem:[#allocation12_spill] sm:$0xff]  ;;  %v478_v49 = vsel %vm477_vm4, %v9427_v4, %v9426_v0  ;;  %v9436_v3 = vld [vmem:[#allocation26_spill] sm:$0xff] }
 0x62c   : > { %v3017_v20 = vsel %vm487_vm9, %v3016_v62, %v9422_v31  ;;  %v4447_v15 = vsel %vm481_vm6, %v4446_v21, %v8836_v59  ;;  %v9439_v21 = vld [vmem:[#allocation18_spill] sm:$0xff] }
 0x62d   : > { %v3018_v63 = vsel %vm489_vm10, %v3017_v20, %v5380_v41  ;;  %v4448_v29 = vsel %vm483_vm7, %v4447_v15, %v8711_v58  ;;  %v4487_v41 = vpop.permute.xlu0 %4486 }
 0x62e   : > { %v4454_v11 = vrot.slane %v3018_v63, 4  ;;  %v4449_v28 = vsel %vm485_vm8, %v4448_v29, %v4428_v25  ;;  %v480_v25 = vsel %vm479_vm5, %v478_v49, %v9429_v27  ;;  %v9438_v63 = vld [vmem:[#allocation31_spill] sm:$0xff] }
 0x62f   : > { %v5459_v5 = vpop.permute.xlu1 %5458  ;;  %v4450_v59 = vsel %vm487_vm9, %v4449_v28, %v9423_v52 }
 0x630   : > { %v4476_v57 = vsel %vm2356_vm11, %v8661_v38, %v4454_v11  ;;  %v5460_v62 = vunpack.i.l.bf16 %v5459_v5  ;;  %v4031_v38 = vsel %vm489_vm10, %v8926_v24, %v5470_v46 }
 0x632   : > { %v4245_v30 = vsel %vm489_vm10, %v8949_v6, %v5460_v62  ;;  %v5461_v6 = vunpack.i.h.bf16 %v5459_v5 }
 0x633   : > { %v4473_v7 = vrot.slane %v4245_v30, 4 }
 0x634   : > { %v3841_v58 = vsel %vm489_vm10, %v3840_v19, %v5461_v6  ;;  %v499_v19 = vld [vmem:[%s9129_s3] sm:$0xf] }
 0x635   : > { %v4483_v18 = vsel %vm2356_vm11, %v4031_v38, %v4473_v7  ;;  %v4467_v23 = vrot.slane %v3841_v58, 4 }
 0x637   : > { %v4436_v14 = vpop.permute.xlu1 %4435 }
 0x638   : > { %v4451_v44 = vsel %vm489_vm10, %v4450_v59, %v4436_v14 }
 0x639   : > { %4650 = vmatpush.msk.msra.mxu3 %vm2356_vm11, %v4451_v44 }
 0x63b   : > { %4530 = vmatpush.msra.mxu3 %v4483_v18 }
 0x63f   : > { %v5474_v37 = vpop.permute.xlu1 %5473 }
 0x640   : > { %v5476_v39 = vunpack.i.h.bf16 %v5474_v37  ;;  %v5475_v50 = vunpack.i.l.bf16 %v5474_v37 }
 0x642   : > { %v3834_v24 = vsel %vm489_vm10, %v3833_v45, %v5476_v39  ;;  %v3635_v43 = vsel %vm489_vm10, %v3634_v16, %v5475_v50  ;;  %v9424_v16 = vld [vmem:[#allocation28_spill] sm:$0xff]  ;;  %v482_v45 = vsel %vm481_vm6, %v480_v25, %v9431_v33 }
 0x643   : > { %v4481_v9 = vsel %vm2356_vm11, %v3635_v43, %v4467_v23  ;;  %v4466_v42 = vrot.slane %v3834_v24, 4  ;;  %v491_v8 = vsel %vm477_vm4, %v9425_v34, %v9424_v16  ;;  %v484_v55 = vsel %vm483_vm7, %v482_v45, %v9433_v51 }
 0x644   : > { %4531 = vmatpush.msra.mxu3 %v4481_v9  ;;  %v492_v61 = vsel %vm479_vm5, %v491_v8, %v9428_v17  ;;  %v486_v22 = vsel %vm485_vm8, %v484_v55, %v9435_v2 }
 0x645   : > { %v4480_v54 = vsel %vm2356_vm11, %v3628_v32, %v4466_v42  ;;  %v493_v40 = vsel %vm481_vm6, %v492_v61, %v9430_v12 }
 0x646   : > { %4511 = vmatpush.msra.mxu2 %v4480_v54  ;;  %4532 = vmatpush.msra.mxu3 %v4479_v47  ;;  %v494_v48 = vsel %vm483_vm7, %v493_v40, %v9432_v60 }
 0x647   : > { %v495_v35 = vsel %vm485_vm8, %v494_v48, %v9434_v10 }
 0x648   : > { %4512 = vmatpush.msra.mxu2 %v4478_v36  ;;  %4533 = vmatpush.msra.mxu3 %v4477_v56  ;;  %v496_v53 = vsel %vm487_vm9, %v495_v35, %v9436_v3  ;;  %v9437_v36 = vld [vmem:[#allocation24_spill] sm:$0xff] }
 0x649   : > { %4651 = vmatmul.msk.f32.vlgmr.msra.gmra.mxu3 %vm2370_vm12, %v499_v19  ;;  %v488_v56 = vsel %vm487_vm9, %v486_v22, %v9437_v36  ;;  %v497_v26 = vsel %vm489_vm10, %v496_v53, %v9438_v63 }
 0x64a   : > { %4513 = vmatpush.msra.mxu2 %v4476_v57  ;;  %v490_v5 = vsel %vm489_vm10, %v488_v56, %v9439_v21 }
 0x64b   : > { %4649 = vmatmul.msk.f32.vlgmr.msra.gmra.mxu2 %vm2370_vm12, %v499_v19 }
 0x6cc   : > { %v4535_v1 = vpop.f32.mrf.mxu3 }
 0x6cd   : > { %v4536_v13 = vadd.f32 %v4535_v1, %v4487_v41 }
 0x6ce   : > { %v4515_v47 = vpop.f32.mrf.mxu2 }
 0x6cf   : > { %v4539_v31 = vmul.f32 0.1, %v4536_v13  ;;  %v4516_v20 = vadd.f32 %v4515_v47, %v4487_v41 }
 0x6d1   : > { %v4541_v11 = vadd.f32 %v4539_v31, %v497_v26  ;;  %v4538_v57 = vmul.f32 0.1, %v4516_v20 }
 0x6d3   : > { %v4544_v15 = vrot.slane %v4541_v11, 4  ;;  %v4540_v46 = vadd.f32 %v4538_v57, %v490_v5 }
 0x6d5   : > { %v4545_v62 = vsel %vm2356_vm11, %v4540_v46, %v4544_v15 }
 0x6d6   : > { %4547 = vst [vmem:[%s244_s22] sm:$0xff] %v4545_v62 }
 0x6d7   : > { %5541 = shalt.err (!%p5538_p4)
}
 0x6d8   : > { %4661 = dma.vmem_to_hbm [thread:$0]  (%p5678_p11), %s4563_s9, 128, %s4565_s10, %s4549_s7  }
 0x6d9 PF: > { %s4576_s12 = sand.u32 1, %s5568_s18   ;;  %p9440_p7 = scmp.ge.s32.totalorder %s5580_s21, 2 }
 0x6da   : > { %s4577_s16 = scalar_lea.sflag [#allocation5], %s4576_s12 }
 0x6db   : > { %p4668_p5 = pnand %p9440_p7, %p5682_p12 }
 0x6dd   : > { %p4669_p8 = pneg %p4668_p5 }
 0x6df   : > { %5563 = dma.done.wait (%p4669_p8), %s4577_s16, 128  }
 0x6e0   : > { %5565 = vsyncadd (%p4669_p8), %s4577_s16, 4294967168  ;;  %p18_p10 = scmp.ge.s32.totalorder %s5653_s24, 4   ;;  %s9441_s18 = smov %s5572_s19 }
 0x6e1   : > { %s9442_s19 = smov %s5576_s20  ;;  %s9443_s20 = smov %s5665_s27 }
 0x6e2   : > { %s9444_s21 = smov %s5653_s24  ;;  %20 = sbr.rel (!%p18_p10) target bundleno = 5 (0x5), region = 85 }
 0x6e7   :  { %4583 = vsyncpa [#allocation4], 1 }
 0x6e8   :  { %4585 = vsyncpa [#allocation4 + $0x1], 1 }
 0x6e9   :  { %4586 = vsyncpa [#allocation5], 1 }
 0x6ea   :  { %4588 = vsyncpa [#allocation5 + $0x1], 1 }

</bundles_post_ra>
